<compile_context>
chip_gen: v7x
topology: tpu7x:2x2x1
jax: 0.10.0
libtpu: 0.0.40
codegen_flags: <defaults>
</compile_context>

<pallas_src>
import math
import numpy as np
import jax
import jax.numpy as jnp
from jax import lax
from jax.experimental import pallas as pl
from jax.experimental.pallas import tpu as pltpu


# ----------------------------- kernel helpers ------------------------------

def _adain_lrelu(v, s_vec, fcw_ref, fcb_ref, C):
    """InstanceNorm (stats over axis 0, biased var, eps=1e-5) + style affine
    (1+gamma)*norm + beta + LeakyReLU(0.2).

    v: (P, C) f32; s_vec: (1, S) f32; fcw_ref: (S, 2C) f32; fcb_ref: (1, 2C) f32.
    gamma/beta come from a single fused (1,S)@(S,2C) matmul; kept in f32.
    """
    mean = jnp.mean(v, axis=0, keepdims=True)                     # (1, C)
    d = v - mean
    var = jnp.mean(d * d, axis=0, keepdims=True)                  # (1, C)
    nrm = d * lax.rsqrt(var + 1e-5)
    h = jnp.dot(s_vec, fcw_ref[...],
                preferred_element_type=jnp.float32) + fcb_ref[...]  # (1, 2C)
    gamma = h[:, :C]
    beta = h[:, C:]
    y = (1.0 + gamma) * nrm + beta                                # (P, C)
    return jnp.where(y >= 0.0, y, 0.2 * y)


def _conv3x3_im2col(y, ybuf_ref, w_ref, b_ref, ml, mr, H, W, B):
    """3x3 conv, stride 1, zero pad 1, as ONE im2col MXU matmul (K = 9*C).

    y: (H*W, C) f32 activation;  ybuf_ref: (H*W + 2B, C) f32 VMEM scratch whose
    top/bottom B rows act as the zero halo;  w_ref: (9*C, Cout) bf16 with tap
    index t = kh*3 + kw major;  b_ref: (1, Cout) f32;
    ml / mr: (H*W + 2W, 1) f32 W-periodic masks zeroing w==0 / w==W-1 columns.
    Returns (H*W, Cout) f32.
    """
    P = H * W
    C = y.shape[1]
    Wrow = P + 2 * W

    # Zero only the halo rows (interior is fully overwritten every step).
    ybuf_ref[pl.ds(0, B), :] = jnp.zeros((B, C), jnp.float32)
    ybuf_ref[pl.ds(B + P, B), :] = jnp.zeros((B, C), jnp.float32)
    ybuf_ref[pl.ds(B, P), :] = y

    # Three column-shifted slabs (dj = -1, 0, +1).  Only dj = +/-1 are
    # sublane-unaligned reads; column wrap is fixed by the periodic masks.
    slab_l = (ybuf_ref[pl.ds(B - W - 1, Wrow), :] * ml).astype(jnp.bfloat16)
    slab_c = ybuf_ref[pl.ds(B - W, Wrow), :].astype(jnp.bfloat16)
    slab_r = (ybuf_ref[pl.ds(B - W + 1, Wrow), :] * mr).astype(jnp.bfloat16)

    taps = []
    for kh in range(3):                       # row shift di = kh - 1
        r0 = kh * W                           # multiple of W -> aligned slice
        for slab in (slab_l, slab_c, slab_r):  # kw = 0, 1, 2  (dj = kw - 1)
            taps.append(slab[r0:r0 + P, :])
    patches = jnp.concatenate(taps, axis=1)   # (P, 9*C) bf16 im2col

    out = jnp.dot(patches, w_ref[...], preferred_element_type=jnp.float32)
    return out + b_ref[...]


def _make_adain_resblk_kernel(H, W, B, learned_sc):
    inv_sqrt2 = 1.0 / math.sqrt(2.0)

    def kernel(x_ref, s_ref, ml_ref, mr_ref,
               f1w_ref, f1b_ref, c1w_ref, c1b_ref,
               f2w_ref, f2b_ref, c2w_ref, c2b_ref, *rest):
        if learned_sc:
            scw_ref, o_ref, ybuf1_ref, ybuf2_ref = rest
        else:
            o_ref, ybuf1_ref, ybuf2_ref = rest

        Cin = x_ref.shape[2]
        Cout = o_ref.shape[2]

        x2 = x_ref[0].astype(jnp.float32)        # (P, Cin)
        s_vec = s_ref[0].astype(jnp.float32)     # (1, S)
        ml = ml_ref[...]                         # (P + 2W, 1)
        mr = mr_ref[...]

        # Shortcut first so x2 dies right after AdaIN1; identity case does no matmul.
        if learned_sc:
            sc = jnp.dot(x2.astype(jnp.bfloat16), scw_ref[...],
                         preferred_element_type=jnp.float32)       # (P, Cout)
        else:
            sc = x2

        # ----- residual branch -----
        y = _adain_lrelu(x2, s_vec, f1w_ref, f1b_ref, Cin)                       # (P, Cin)
        h1 = _conv3x3_im2col(y, ybuf1_ref, c1w_ref, c1b_ref, ml, mr, H, W, B)    # (P, Cout)
        z = _adain_lrelu(h1, s_vec, f2w_ref, f2b_ref, Cout)                      # (P, Cout)
        h2 = _conv3x3_im2col(z, ybuf2_ref, c2w_ref, c2b_ref, ml, mr, H, W, B)    # (P, Cout)

        o_ref[0] = ((h2 + sc) * inv_sqrt2).astype(o_ref.dtype)

    return kernel


# ------------------------------- wrapper ------------------------------------

def adain_resblk(x, s, params, w_hpf=0.0, upsample=False):
    """Forward pass of AdainResBlk (default config: w_hpf=0, upsample=False).

    x: (N, C_in, H, W) float32 (NCHW, like PyTorch); s: (N, style_dim).
    Returns (N, C_out, H, W) float32.
    """
    if upsample:
        # TODO(synk): nearest 2x upsample (F.interpolate) path not implemented.
        raise NotImplementedError("upsample=True not implemented")
    if w_hpf != 0.0:
        # TODO(synk): w_hpf != 0 path (residual only, no /sqrt(2)) not exercised.
        raise NotImplementedError("w_hpf != 0 not implemented")

    N, Cin, H, W = x.shape
    Cout = params["conv1_w"].shape[0]
    S = s.shape[1]
    P = H * W
    B = ((W + 1 + 7) // 8) * 8           # halo rows per side: >= W+1, multiple of 8
    f32 = jnp.float32
    bf16 = jnp.bfloat16
    learned_sc = (Cin != Cout)

    # ---- wrapper-side layout plumbing: NCHW -> (N, P, C) channel-last slab ----
    # TODO(synk): drop these transposes if the surrounding network stays NHWC.
    x_flat = jnp.transpose(x.astype(f32), (0, 2, 3, 1)).reshape(N, P, Cin)
    s3 = s.astype(f32).reshape(N, 1, S)

    # W-periodic column-boundary masks for the dj = -1 / +1 taps.
    rowpos = jnp.arange(P + 2 * W, dtype=jnp.int32) % W
    mask_l = (rowpos != 0).astype(f32).reshape(P + 2 * W, 1)
    mask_r = (rowpos != W - 1).astype(f32).reshape(P + 2 * W, 1)

    # Style FC weights kept fused as (S, 2C) so gamma/beta come from one dot.
    fc1_wT = params["fc1_w"].astype(f32).T                       # (S, 2*Cin)
    fc1_b = params["fc1_b"].astype(f32).reshape(1, 2 * Cin)
    fc2_wT = params["fc2_w"].astype(f32).T                       # (S, 2*Cout)
    fc2_b = params["fc2_b"].astype(f32).reshape(1, 2 * Cout)

    # Conv weights: torch OIHW -> (kh, kw, Cin, Cout) -> (9*Cin, Cout), bf16.
    c1w = jnp.transpose(params["conv1_w"].astype(f32), (2, 3, 1, 0)
                        ).reshape(9 * Cin, Cout).astype(bf16)
    c1b = params["conv1_b"].astype(f32).reshape(1, Cout)
    c2w = jnp.transpose(params["conv2_w"].astype(f32), (2, 3, 1, 0)
                        ).reshape(9 * Cout, Cout).astype(bf16)
    c2b = params["conv2_b"].astype(f32).reshape(1, Cout)

    inputs = [x_flat, s3, mask_l, mask_r,
              fc1_wT, fc1_b, c1w, c1b, fc2_wT, fc2_b, c2w, c2b]
    in_specs = [
        pl.BlockSpec((1, P, Cin), lambda n: (n, 0, 0)),          # x slab
        pl.BlockSpec((1, 1, S), lambda n: (n, 0, 0)),            # s
        pl.BlockSpec((P + 2 * W, 1), lambda n: (0, 0)),          # mask_l
        pl.BlockSpec((P + 2 * W, 1), lambda n: (0, 0)),          # mask_r
        pl.BlockSpec((S, 2 * Cin), lambda n: (0, 0)),            # fc1 W (fused)
        pl.BlockSpec((1, 2 * Cin), lambda n: (0, 0)),            # fc1 b
        pl.BlockSpec((9 * Cin, Cout), lambda n: (0, 0)),         # conv1 W (im2col, bf16)
        pl.BlockSpec((1, Cout), lambda n: (0, 0)),               # conv1 b
        pl.BlockSpec((S, 2 * Cout), lambda n: (0, 0)),           # fc2 W (fused)
        pl.BlockSpec((1, 2 * Cout), lambda n: (0, 0)),           # fc2 b
        pl.BlockSpec((9 * Cout, Cout), lambda n: (0, 0)),        # conv2 W (im2col, bf16)
        pl.BlockSpec((1, Cout), lambda n: (0, 0)),               # conv2 b
    ]
    if learned_sc:
        scw = params["conv1x1_w"].astype(f32)[:, :, 0, 0].T.astype(bf16)  # (Cin, Cout)
        inputs.append(scw)
        in_specs.append(pl.BlockSpec((Cin, Cout), lambda n: (0, 0)))

    grid_spec = pltpu.PrefetchScalarGridSpec(
        num_scalar_prefetch=0,
        grid=(N,),
        in_specs=in_specs,
        out_specs=pl.BlockSpec((1, P, Cout), lambda n: (n, 0, 0)),
        scratch_shapes=[
            pltpu.VMEM((P + 2 * B, Cin), jnp.float32),           # padded act for conv1
            pltpu.VMEM((P + 2 * B, Cout), jnp.float32),          # padded act for conv2
        ],
    )

    out2 = pl.pallas_call(
        _make_adain_resblk_kernel(H, W, B, learned_sc),
        out_shape=jax.ShapeDtypeStruct((N, P, Cout), f32),
        grid_spec=grid_spec,
        compiler_params=pltpu.CompilerParams(
            dimension_semantics=("parallel",)),
    )(*inputs)

    return jnp.transpose(out2.reshape(N, H, W, Cout), (0, 3, 1, 2))  # back to NCHW


# ------------------------------ plain-JAX reference --------------------------

def adain_resblk_ref(x, s, params, w_hpf=0.0, upsample=False):
    assert not upsample and w_hpf == 0.0
    f32 = jnp.float32
    hp = lax.Precision.HIGHEST

    def inorm(v):
        m = jnp.mean(v, axis=(2, 3), keepdims=True)
        var = jnp.mean((v - m) ** 2, axis=(2, 3), keepdims=True)
        return (v - m) / jnp.sqrt(var + 1e-5)

    def adain(v, w, b):
        hvec = jnp.dot(s.astype(f32), w.T, precision=hp) + b
        C = v.shape[1]
        g = hvec[:, :C][:, :, None, None]
        bt = hvec[:, C:][:, :, None, None]
        return (1.0 + g) * inorm(v) + bt

    def act(v):
        return jnp.where(v >= 0, v, 0.2 * v)

    def conv(v, w, b=None, padding="SAME"):
        o = lax.conv_general_dilated(v, w, (1, 1), padding,
                                     dimension_numbers=("NCHW", "OIHW", "NCHW"),
                                     precision=hp)
        return o if b is None else o + b[None, :, None, None]

    xf = x.astype(f32)
    h = adain(xf, params["fc1_w"].astype(f32), params["fc1_b"].astype(f32))
    h = act(h)
    h = conv(h, params["conv1_w"].astype(f32), params["conv1_b"].astype(f32))
    h = adain(h, params["fc2_w"].astype(f32), params["fc2_b"].astype(f32))
    h = act(h)
    h = conv(h, params["conv2_w"].astype(f32), params["conv2_b"].astype(f32))
    if x.shape[1] != params["conv1_w"].shape[0]:
        sc = conv(xf, params["conv1x1_w"].astype(f32), None, "VALID")
    else:
        sc = xf
    return (h + sc) / math.sqrt(2.0)


# ----------------------------------- test ------------------------------------

if __name__ == "__main__":
    N, Cin, Cout, H, W, S = 2, 32, 64, 16, 16, 64
    key = jax.random.PRNGKey(0)
    ks = jax.random.split(key, 11)
    wscale = 0.05
    params = {
        "fc1_w":     jax.random.normal(ks[0], (2 * Cin, S), jnp.float32) * wscale,
        "fc1_b":     jax.random.normal(ks[1], (2 * Cin,), jnp.float32) * wscale,
        "conv1_w":   jax.random.normal(ks[2], (Cout, Cin, 3, 3), jnp.float32) * wscale,
        "conv1_b":   jax.random.normal(ks[3], (Cout,), jnp.float32) * wscale,
        "fc2_w":     jax.random.normal(ks[4], (2 * Cout, S), jnp.float32) * wscale,
        "fc2_b":     jax.random.normal(ks[5], (2 * Cout,), jnp.float32) * wscale,
        "conv2_w":   jax.random.normal(ks[6], (Cout, Cout, 3, 3), jnp.float32) * wscale,
        "conv2_b":   jax.random.normal(ks[7], (Cout,), jnp.float32) * wscale,
        "conv1x1_w": jax.random.normal(ks[8], (Cout, Cin, 1, 1), jnp.float32) * wscale,
    }
    x = jax.random.normal(ks[9], (N, Cin, H, W), jnp.float32)
    s = jax.random.normal(ks[10], (N, S), jnp.float32)

    fwd = jax.jit(lambda xx, ss: adain_resblk(xx, ss, params))
    y = jax.block_until_ready(fwd(x, s))

    y_ref = adain_resblk_ref(x, s, params)
    assert y.shape == (N, Cout, H, W)
    # Tolerance widened vs. the pure-f32 version: conv/shortcut matmul operands are
    # bf16 on the MXU (per perf feedback); norm stats / affine / residual stay f32.
    np.testing.assert_allclose(np.asarray(y), np.asarray(y_ref), rtol=5e-2, atol=5e-2)
    print("KERNEL_OK")
</pallas_src>

<mosaic_0001>
module attributes {stable_mosaic.version = 11 : i64} {
  func.func @kernel(%arg0: i32, %arg1: memref<1x256x32xf32, #tpu.memory_space<vmem>>, %arg2: memref<1x1x64xf32, #tpu.memory_space<vmem>>, %arg3: memref<288x1xf32, #tpu.memory_space<vmem>>, %arg4: memref<288x1xf32, #tpu.memory_space<vmem>>, %arg5: memref<64x64xf32, #tpu.memory_space<vmem>>, %arg6: memref<1x64xf32, #tpu.memory_space<vmem>>, %arg7: memref<288x64xbf16, #tpu.memory_space<vmem>>, %arg8: memref<1x64xf32, #tpu.memory_space<vmem>>, %arg9: memref<64x128xf32, #tpu.memory_space<vmem>>, %arg10: memref<1x128xf32, #tpu.memory_space<vmem>>, %arg11: memref<576x64xbf16, #tpu.memory_space<vmem>>, %arg12: memref<1x64xf32, #tpu.memory_space<vmem>>, %arg13: memref<32x64xbf16, #tpu.memory_space<vmem>>, %arg14: memref<1x256x64xf32, #tpu.memory_space<vmem>>, %arg15: memref<304x32xf32, #tpu.memory_space<vmem>>, %arg16: memref<304x64xf32, #tpu.memory_space<vmem>>) attributes {dimension_semantics = [#tpu.dimension_semantics<parallel>], iteration_bounds = array<i64: 2>, scalar_prefetch = 0 : i64, scratch_operands = 2 : i64, tpu.core_type = #tpu.core_type<tc>, window_params = [{transform_indices = @transform_0, window_bounds = array<i64: 1, 256, 32>}, {transform_indices = @transform_1, window_bounds = array<i64: 1, 1, 64>}, {pipeline_mode = #tpu.pipeline_mode<synchronous>, transform_indices = @transform_2, window_bounds = array<i64: 288, 1>}, {pipeline_mode = #tpu.pipeline_mode<synchronous>, transform_indices = @transform_3, window_bounds = array<i64: 288, 1>}, {pipeline_mode = #tpu.pipeline_mode<synchronous>, transform_indices = @transform_4, window_bounds = array<i64: 64, 64>}, {pipeline_mode = #tpu.pipeline_mode<synchronous>, transform_indices = @transform_5, window_bounds = array<i64: 1, 64>}, {pipeline_mode = #tpu.pipeline_mode<synchronous>, transform_indices = @transform_6, window_bounds = array<i64: 288, 64>}, {pipeline_mode = #tpu.pipeline_mode<synchronous>, transform_indices = @transform_7, window_bounds = array<i64: 1, 64>}, {pipeline_mode = #tpu.pipeline_mode<synchronous>, transform_indices = @transform_8, window_bounds = array<i64: 64, 128>}, {pipeline_mode = #tpu.pipeline_mode<synchronous>, transform_indices = @transform_9, window_bounds = array<i64: 1, 128>}, {pipeline_mode = #tpu.pipeline_mode<synchronous>, transform_indices = @transform_10, window_bounds = array<i64: 576, 64>}, {pipeline_mode = #tpu.pipeline_mode<synchronous>, transform_indices = @transform_11, window_bounds = array<i64: 1, 64>}, {pipeline_mode = #tpu.pipeline_mode<synchronous>, transform_indices = @transform_12, window_bounds = array<i64: 32, 64>}, {transform_indices = @transform_13, window_bounds = array<i64: 1, 256, 64>}]} {
    %c0 = arith.constant 0 : index
    %c0_0 = arith.constant 0 : index
    %c0_1 = arith.constant 0 : index
    %0 = vector.load %arg1[%c0, %c0_0, %c0_1] : memref<1x256x32xf32, #tpu.memory_space<vmem>>, vector<1x256x32xf32>
    %1 = vector.shape_cast %0 : vector<1x256x32xf32> to vector<256x32xf32>
    %c0_2 = arith.constant 0 : index
    %c0_3 = arith.constant 0 : index
    %c0_4 = arith.constant 0 : index
    %2 = vector.load %arg2[%c0_2, %c0_3, %c0_4] : memref<1x1x64xf32, #tpu.memory_space<vmem>>, vector<1x1x64xf32>
    %3 = vector.shape_cast %2 : vector<1x1x64xf32> to vector<1x64xf32>
    %c0_5 = arith.constant 0 : index
    %c0_6 = arith.constant 0 : index
    %4 = vector.load %arg3[%c0_5, %c0_6] : memref<288x1xf32, #tpu.memory_space<vmem>>, vector<288x1xf32>
    %c0_7 = arith.constant 0 : index
    %c0_8 = arith.constant 0 : index
    %5 = vector.load %arg4[%c0_7, %c0_8] : memref<288x1xf32, #tpu.memory_space<vmem>>, vector<288x1xf32>
    %6 = arith.truncf %1 : vector<256x32xf32> to vector<256x32xbf16>
    %c0_9 = arith.constant 0 : index
    %c0_10 = arith.constant 0 : index
    %7 = vector.load %arg13[%c0_9, %c0_10] : memref<32x64xbf16, #tpu.memory_space<vmem>>, vector<32x64xbf16>
    %cst = arith.constant dense<0.000000e+00> : vector<256x64xf32>
    %8 = tpu.matmul %6, %7, %cst {dimension_numbers = #tpu.dot_dimension_numbers<[1], [0], [0], [1], [0, 0, 1, 1], [], []>} : vector<256x32xbf16>, vector<32x64xbf16>, vector<256x64xf32> -> vector<256x64xf32>
    %cst_11 = arith.constant dense<0.000000e+00> : vector<32xf32>
    %9 = vector.multi_reduction <add>, %1, %cst_11 [0] : vector<256x32xf32> to vector<32xf32>
    %10 = vector.shape_cast %9 : vector<32xf32> to vector<1x32xf32>
    %cst_12 = arith.constant 2.560000e+02 : f32
    %11 = vector.broadcast %cst_12 : f32 to vector<1x32xf32>
    %12 = arith.divf %10, %11 : vector<1x32xf32>
    %13 = vector.broadcast %12 : vector<1x32xf32> to vector<256x32xf32>
    %14 = arith.subf %1, %13 : vector<256x32xf32>
    %15 = arith.mulf %14, %14 : vector<256x32xf32>
    %cst_13 = arith.constant dense<0.000000e+00> : vector<32xf32>
    %16 = vector.multi_reduction <add>, %15, %cst_13 [0] : vector<256x32xf32> to vector<32xf32>
    %17 = vector.shape_cast %16 : vector<32xf32> to vector<1x32xf32>
    %cst_14 = arith.constant 2.560000e+02 : f32
    %18 = vector.broadcast %cst_14 : f32 to vector<1x32xf32>
    %19 = arith.divf %17, %18 : vector<1x32xf32>
    %cst_15 = arith.constant 9.99999974E-6 : f32
    %20 = vector.broadcast %cst_15 : f32 to vector<1x32xf32>
    %21 = arith.addf %19, %20 : vector<1x32xf32>
    %22 = math.rsqrt %21 : vector<1x32xf32>
    %23 = vector.broadcast %22 : vector<1x32xf32> to vector<256x32xf32>
    %24 = arith.mulf %14, %23 : vector<256x32xf32>
    %c0_16 = arith.constant 0 : index
    %c0_17 = arith.constant 0 : index
    %25 = vector.load %arg5[%c0_16, %c0_17] : memref<64x64xf32, #tpu.memory_space<vmem>>, vector<64x64xf32>
    %cst_18 = arith.constant dense<0.000000e+00> : vector<1x64xf32>
    %26 = tpu.matmul %3, %25, %cst_18 {dimension_numbers = #tpu.dot_dimension_numbers<[1], [0], [0], [1], [0, 0, 1, 1], [], []>} : vector<1x64xf32>, vector<64x64xf32>, vector<1x64xf32> -> vector<1x64xf32>
    %c0_19 = arith.constant 0 : index
    %c0_20 = arith.constant 0 : index
    %27 = vector.load %arg6[%c0_19, %c0_20] : memref<1x64xf32, #tpu.memory_space<vmem>>, vector<1x64xf32>
    %28 = arith.addf %26, %27 : vector<1x64xf32>
    %29 = vector.extract_strided_slice %28 {offsets = [0, 0], sizes = [1, 32], strides = [1, 1]} : vector<1x64xf32> to vector<1x32xf32>
    %30 = vector.extract_strided_slice %28 {offsets = [0, 32], sizes = [1, 32], strides = [1, 1]} : vector<1x64xf32> to vector<1x32xf32>
    %cst_21 = arith.constant 1.000000e+00 : f32
    %31 = vector.broadcast %cst_21 : f32 to vector<1x32xf32>
    %32 = arith.addf %31, %29 : vector<1x32xf32>
    %33 = vector.broadcast %32 : vector<1x32xf32> to vector<256x32xf32>
    %34 = arith.mulf %33, %24 : vector<256x32xf32>
    %35 = vector.broadcast %30 : vector<1x32xf32> to vector<256x32xf32>
    %36 = arith.addf %34, %35 : vector<256x32xf32>
    %cst_22 = arith.constant 0.000000e+00 : f32
    %37 = vector.broadcast %cst_22 : f32 to vector<256x32xf32>
    %38 = arith.cmpf oge, %36, %37 : vector<256x32xf32>
    %cst_23 = arith.constant 2.000000e-01 : f32
    %39 = vector.broadcast %cst_23 : f32 to vector<256x32xf32>
    %40 = arith.mulf %39, %36 : vector<256x32xf32>
    %41 = arith.select %38, %36, %40 : vector<256x32xi1>, vector<256x32xf32>
    %cst_24 = arith.constant 0.000000e+00 : f32
    %42 = vector.broadcast %cst_24 : f32 to vector<24x32xf32>
    %c0_25 = arith.constant 0 : index
    %c0_26 = arith.constant 0 : index
    %43 = vector.load %arg15[%c0_25, %c0_26] : memref<304x32xf32, #tpu.memory_space<vmem>>, vector<24x32xf32>
    tpu.vector_store %arg15[%c0_25, %c0_26], %42 {strides = array<i32>} : memref<304x32xf32, #tpu.memory_space<vmem>>, vector<24x32xf32>,
    %cst_27 = arith.constant 0.000000e+00 : f32
    %44 = vector.broadcast %cst_27 : f32 to vector<24x32xf32>
    %c280 = arith.constant 280 : index
    %c0_28 = arith.constant 0 : index
    %45 = vector.load %arg15[%c280, %c0_28] : memref<304x32xf32, #tpu.memory_space<vmem>>, vector<24x32xf32>
    tpu.vector_store %arg15[%c280, %c0_28], %44 {strides = array<i32>} : memref<304x32xf32, #tpu.memory_space<vmem>>, vector<24x32xf32>,
    %c24 = arith.constant 24 : index
    %c0_29 = arith.constant 0 : index
    %46 = vector.load %arg15[%c24, %c0_29] : memref<304x32xf32, #tpu.memory_space<vmem>>, vector<256x32xf32>
    tpu.vector_store %arg15[%c24, %c0_29], %41 {strides = array<i32>} : memref<304x32xf32, #tpu.memory_space<vmem>>, vector<256x32xf32>,
    %c7 = arith.constant 7 : index
    %c0_30 = arith.constant 0 : index
    %47 = vector.load %arg15[%c7, %c0_30] : memref<304x32xf32, #tpu.memory_space<vmem>>, vector<288x32xf32>
    %48 = vector.broadcast %4 : vector<288x1xf32> to vector<288x32xf32>
    %49 = arith.mulf %47, %48 : vector<288x32xf32>
    %50 = arith.truncf %49 : vector<288x32xf32> to vector<288x32xbf16>
    %c8 = arith.constant 8 : index
    %c0_31 = arith.constant 0 : index
    %51 = vector.load %arg15[%c8, %c0_31] : memref<304x32xf32, #tpu.memory_space<vmem>>, vector<288x32xf32>
    %52 = arith.truncf %51 : vector<288x32xf32> to vector<288x32xbf16>
    %c9 = arith.constant 9 : index
    %c0_32 = arith.constant 0 : index
    %53 = vector.load %arg15[%c9, %c0_32] : memref<304x32xf32, #tpu.memory_space<vmem>>, vector<288x32xf32>
    %54 = vector.broadcast %5 : vector<288x1xf32> to vector<288x32xf32>
    %55 = arith.mulf %53, %54 : vector<288x32xf32>
    %56 = arith.truncf %55 : vector<288x32xf32> to vector<288x32xbf16>
    %57 = vector.extract_strided_slice %50 {offsets = [0, 0], sizes = [256, 32], strides = [1, 1]} : vector<288x32xbf16> to vector<256x32xbf16>
    %58 = vector.extract_strided_slice %52 {offsets = [0, 0], sizes = [256, 32], strides = [1, 1]} : vector<288x32xbf16> to vector<256x32xbf16>
    %59 = vector.extract_strided_slice %56 {offsets = [0, 0], sizes = [256, 32], strides = [1, 1]} : vector<288x32xbf16> to vector<256x32xbf16>
    %60 = vector.extract_strided_slice %50 {offsets = [16, 0], sizes = [256, 32], strides = [1, 1]} : vector<288x32xbf16> to vector<256x32xbf16>
    %61 = vector.extract_strided_slice %52 {offsets = [16, 0], sizes = [256, 32], strides = [1, 1]} : vector<288x32xbf16> to vector<256x32xbf16>
    %62 = vector.extract_strided_slice %56 {offsets = [16, 0], sizes = [256, 32], strides = [1, 1]} : vector<288x32xbf16> to vector<256x32xbf16>
    %63 = vector.extract_strided_slice %50 {offsets = [32, 0], sizes = [256, 32], strides = [1, 1]} : vector<288x32xbf16> to vector<256x32xbf16>
    %64 = vector.extract_strided_slice %52 {offsets = [32, 0], sizes = [256, 32], strides = [1, 1]} : vector<288x32xbf16> to vector<256x32xbf16>
    %65 = vector.extract_strided_slice %56 {offsets = [32, 0], sizes = [256, 32], strides = [1, 1]} : vector<288x32xbf16> to vector<256x32xbf16>
    %66 = tpu.concatenate %57, %58, %59, %60, %61, %62, %63, %64, %65 in 1 : vector<256x32xbf16>, vector<256x32xbf16>, vector<256x32xbf16>, vector<256x32xbf16>, vector<256x32xbf16>, vector<256x32xbf16>, vector<256x32xbf16>, vector<256x32xbf16>, vector<256x32xbf16> -> vector<256x288xbf16>
    %c0_33 = arith.constant 0 : index
    %c0_34 = arith.constant 0 : index
    %67 = vector.load %arg7[%c0_33, %c0_34] : memref<288x64xbf16, #tpu.memory_space<vmem>>, vector<288x64xbf16>
    %cst_35 = arith.constant dense<0.000000e+00> : vector<256x64xf32>
    %68 = tpu.matmul %66, %67, %cst_35 {dimension_numbers = #tpu.dot_dimension_numbers<[1], [0], [0], [1], [0, 0, 1, 1], [], []>} : vector<256x288xbf16>, vector<288x64xbf16>, vector<256x64xf32> -> vector<256x64xf32>
    %c0_36 = arith.constant 0 : index
    %c0_37 = arith.constant 0 : index
    %69 = vector.load %arg8[%c0_36, %c0_37] : memref<1x64xf32, #tpu.memory_space<vmem>>, vector<1x64xf32>
    %70 = vector.broadcast %69 : vector<1x64xf32> to vector<256x64xf32>
    %71 = arith.addf %68, %70 : vector<256x64xf32>
    %cst_38 = arith.constant dense<0.000000e+00> : vector<64xf32>
    %72 = vector.multi_reduction <add>, %71, %cst_38 [0] : vector<256x64xf32> to vector<64xf32>
    %73 = vector.shape_cast %72 : vector<64xf32> to vector<1x64xf32>
    %cst_39 = arith.constant 2.560000e+02 : f32
    %74 = vector.broadcast %cst_39 : f32 to vector<1x64xf32>
    %75 = arith.divf %73, %74 : vector<1x64xf32>
    %76 = vector.broadcast %75 : vector<1x64xf32> to vector<256x64xf32>
    %77 = arith.subf %71, %76 : vector<256x64xf32>
    %78 = arith.mulf %77, %77 : vector<256x64xf32>
    %cst_40 = arith.constant dense<0.000000e+00> : vector<64xf32>
    %79 = vector.multi_reduction <add>, %78, %cst_40 [0] : vector<256x64xf32> to vector<64xf32>
    %80 = vector.shape_cast %79 : vector<64xf32> to vector<1x64xf32>
    %cst_41 = arith.constant 2.560000e+02 : f32
    %81 = vector.broadcast %cst_41 : f32 to vector<1x64xf32>
    %82 = arith.divf %80, %81 : vector<1x64xf32>
    %cst_42 = arith.constant 9.99999974E-6 : f32
    %83 = vector.broadcast %cst_42 : f32 to vector<1x64xf32>
    %84 = arith.addf %82, %83 : vector<1x64xf32>
    %85 = math.rsqrt %84 : vector<1x64xf32>
    %86 = vector.broadcast %85 : vector<1x64xf32> to vector<256x64xf32>
    %87 = arith.mulf %77, %86 : vector<256x64xf32>
    %c0_43 = arith.constant 0 : index
    %c0_44 = arith.constant 0 : index
    %88 = vector.load %arg9[%c0_43, %c0_44] : memref<64x128xf32, #tpu.memory_space<vmem>>, vector<64x128xf32>
    %cst_45 = arith.constant dense<0.000000e+00> : vector<1x128xf32>
    %89 = tpu.matmul %3, %88, %cst_45 {dimension_numbers = #tpu.dot_dimension_numbers<[1], [0], [0], [1], [0, 0, 1, 1], [], []>} : vector<1x64xf32>, vector<64x128xf32>, vector<1x128xf32> -> vector<1x128xf32>
    %c0_46 = arith.constant 0 : index
    %c0_47 = arith.constant 0 : index
    %90 = vector.load %arg10[%c0_46, %c0_47] : memref<1x128xf32, #tpu.memory_space<vmem>>, vector<1x128xf32>
    %91 = arith.addf %89, %90 : vector<1x128xf32>
    %92 = vector.extract_strided_slice %91 {offsets = [0, 0], sizes = [1, 64], strides = [1, 1]} : vector<1x128xf32> to vector<1x64xf32>
    %93 = vector.extract_strided_slice %91 {offsets = [0, 64], sizes = [1, 64], strides = [1, 1]} : vector<1x128xf32> to vector<1x64xf32>
    %cst_48 = arith.constant 1.000000e+00 : f32
    %94 = vector.broadcast %cst_48 : f32 to vector<1x64xf32>
    %95 = arith.addf %94, %92 : vector<1x64xf32>
    %96 = vector.broadcast %95 : vector<1x64xf32> to vector<256x64xf32>
    %97 = arith.mulf %96, %87 : vector<256x64xf32>
    %98 = vector.broadcast %93 : vector<1x64xf32> to vector<256x64xf32>
    %99 = arith.addf %97, %98 : vector<256x64xf32>
    %cst_49 = arith.constant 0.000000e+00 : f32
    %100 = vector.broadcast %cst_49 : f32 to vector<256x64xf32>
    %101 = arith.cmpf oge, %99, %100 : vector<256x64xf32>
    %cst_50 = arith.constant 2.000000e-01 : f32
    %102 = vector.broadcast %cst_50 : f32 to vector<256x64xf32>
    %103 = arith.mulf %102, %99 : vector<256x64xf32>
    %104 = arith.select %101, %99, %103 : vector<256x64xi1>, vector<256x64xf32>
    %cst_51 = arith.constant 0.000000e+00 : f32
    %105 = vector.broadcast %cst_51 : f32 to vector<24x64xf32>
    %c0_52 = arith.constant 0 : index
    %c0_53 = arith.constant 0 : index
    %106 = vector.load %arg16[%c0_52, %c0_53] : memref<304x64xf32, #tpu.memory_space<vmem>>, vector<24x64xf32>
    tpu.vector_store %arg16[%c0_52, %c0_53], %105 {strides = array<i32>} : memref<304x64xf32, #tpu.memory_space<vmem>>, vector<24x64xf32>,
    %cst_54 = arith.constant 0.000000e+00 : f32
    %107 = vector.broadcast %cst_54 : f32 to vector<24x64xf32>
    %c280_55 = arith.constant 280 : index
    %c0_56 = arith.constant 0 : index
    %108 = vector.load %arg16[%c280_55, %c0_56] : memref<304x64xf32, #tpu.memory_space<vmem>>, vector<24x64xf32>
    tpu.vector_store %arg16[%c280_55, %c0_56], %107 {strides = array<i32>} : memref<304x64xf32, #tpu.memory_space<vmem>>, vector<24x64xf32>,
    %c24_57 = arith.constant 24 : index
    %c0_58 = arith.constant 0 : index
    %109 = vector.load %arg16[%c24_57, %c0_58] : memref<304x64xf32, #tpu.memory_space<vmem>>, vector<256x64xf32>
    tpu.vector_store %arg16[%c24_57, %c0_58], %104 {strides = array<i32>} : memref<304x64xf32, #tpu.memory_space<vmem>>, vector<256x64xf32>,
    %c7_59 = arith.constant 7 : index
    %c0_60 = arith.constant 0 : index
    %110 = vector.load %arg16[%c7_59, %c0_60] : memref<304x64xf32, #tpu.memory_space<vmem>>, vector<288x64xf32>
    %111 = vector.broadcast %4 : vector<288x1xf32> to vector<288x64xf32>
    %112 = arith.mulf %110, %111 : vector<288x64xf32>
    %113 = arith.truncf %112 : vector<288x64xf32> to vector<288x64xbf16>
    %c8_61 = arith.constant 8 : index
    %c0_62 = arith.constant 0 : index
    %114 = vector.load %arg16[%c8_61, %c0_62] : memref<304x64xf32, #tpu.memory_space<vmem>>, vector<288x64xf32>
    %115 = arith.truncf %114 : vector<288x64xf32> to vector<288x64xbf16>
    %c9_63 = arith.constant 9 : index
    %c0_64 = arith.constant 0 : index
    %116 = vector.load %arg16[%c9_63, %c0_64] : memref<304x64xf32, #tpu.memory_space<vmem>>, vector<288x64xf32>
    %117 = vector.broadcast %5 : vector<288x1xf32> to vector<288x64xf32>
    %118 = arith.mulf %116, %117 : vector<288x64xf32>
    %119 = arith.truncf %118 : vector<288x64xf32> to vector<288x64xbf16>
    %120 = vector.extract_strided_slice %113 {offsets = [0, 0], sizes = [256, 64], strides = [1, 1]} : vector<288x64xbf16> to vector<256x64xbf16>
    %121 = vector.extract_strided_slice %115 {offsets = [0, 0], sizes = [256, 64], strides = [1, 1]} : vector<288x64xbf16> to vector<256x64xbf16>
    %122 = vector.extract_strided_slice %119 {offsets = [0, 0], sizes = [256, 64], strides = [1, 1]} : vector<288x64xbf16> to vector<256x64xbf16>
    %123 = vector.extract_strided_slice %113 {offsets = [16, 0], sizes = [256, 64], strides = [1, 1]} : vector<288x64xbf16> to vector<256x64xbf16>
    %124 = vector.extract_strided_slice %115 {offsets = [16, 0], sizes = [256, 64], strides = [1, 1]} : vector<288x64xbf16> to vector<256x64xbf16>
    %125 = vector.extract_strided_slice %119 {offsets = [16, 0], sizes = [256, 64], strides = [1, 1]} : vector<288x64xbf16> to vector<256x64xbf16>
    %126 = vector.extract_strided_slice %113 {offsets = [32, 0], sizes = [256, 64], strides = [1, 1]} : vector<288x64xbf16> to vector<256x64xbf16>
    %127 = vector.extract_strided_slice %115 {offsets = [32, 0], sizes = [256, 64], strides = [1, 1]} : vector<288x64xbf16> to vector<256x64xbf16>
    %128 = vector.extract_strided_slice %119 {offsets = [32, 0], sizes = [256, 64], strides = [1, 1]} : vector<288x64xbf16> to vector<256x64xbf16>
    %129 = tpu.concatenate %120, %121, %122, %123, %124, %125, %126, %127, %128 in 1 : vector<256x64xbf16>, vector<256x64xbf16>, vector<256x64xbf16>, vector<256x64xbf16>, vector<256x64xbf16>, vector<256x64xbf16>, vector<256x64xbf16>, vector<256x64xbf16>, vector<256x64xbf16> -> vector<256x576xbf16>
    %c0_65 = arith.constant 0 : index
    %c0_66 = arith.constant 0 : index
    %130 = vector.load %arg11[%c0_65, %c0_66] : memref<576x64xbf16, #tpu.memory_space<vmem>>, vector<576x64xbf16>
    %cst_67 = arith.constant dense<0.000000e+00> : vector<256x64xf32>
    %131 = tpu.matmul %129, %130, %cst_67 {dimension_numbers = #tpu.dot_dimension_numbers<[1], [0], [0], [1], [0, 0, 1, 1], [], []>} : vector<256x576xbf16>, vector<576x64xbf16>, vector<256x64xf32> -> vector<256x64xf32>
    %c0_68 = arith.constant 0 : index
    %c0_69 = arith.constant 0 : index
    %132 = vector.load %arg12[%c0_68, %c0_69] : memref<1x64xf32, #tpu.memory_space<vmem>>, vector<1x64xf32>
    %133 = vector.broadcast %132 : vector<1x64xf32> to vector<256x64xf32>
    %134 = arith.addf %131, %133 : vector<256x64xf32>
    %135 = arith.addf %134, %8 : vector<256x64xf32>
    %cst_70 = arith.constant 0.707106769 : f32
    %136 = vector.broadcast %cst_70 : f32 to vector<256x64xf32>
    %137 = arith.mulf %135, %136 : vector<256x64xf32>
    %c0_71 = arith.constant 0 : index
    %c0_72 = arith.constant 0 : index
    %c0_73 = arith.constant 0 : index
    %138 = vector.load %arg14[%c0_71, %c0_72, %c0_73] : memref<1x256x64xf32, #tpu.memory_space<vmem>>, vector<1x256x64xf32>
    %139 = vector.shape_cast %138 : vector<1x256x64xf32> to vector<256x64xf32>
    %140 = vector.shape_cast %137 : vector<256x64xf32> to vector<1x256x64xf32>
    tpu.vector_store %arg14[%c0_71, %c0_72, %c0_73], %140 {strides = array<i32>} : memref<1x256x64xf32, #tpu.memory_space<vmem>>, vector<1x256x64xf32>,
    return
  }
  func.func @transform_0(%arg0: i32) -> (i32, i32, i32) {
    %c0_i32 = arith.constant 0 : i32
    %c0_i32_0 = arith.constant 0 : i32
    %c0_i32_1 = arith.constant 0 : i32
    return %arg0, %c0_i32, %c0_i32_0 : i32, i32, i32
  }
  func.func @transform_1(%arg0: i32) -> (i32, i32, i32) {
    %c0_i32 = arith.constant 0 : i32
    %c0_i32_0 = arith.constant 0 : i32
    %c0_i32_1 = arith.constant 0 : i32
    return %arg0, %c0_i32, %c0_i32_0 : i32, i32, i32
  }
  func.func @transform_2(%arg0: i32) -> (i32, i32) {
    %c0_i32 = arith.constant 0 : i32
    %c0_i32_0 = arith.constant 0 : i32
    %c0_i32_1 = arith.constant 0 : i32
    return %c0_i32, %c0_i32_0 : i32, i32
  }
  func.func @transform_3(%arg0: i32) -> (i32, i32) {
    %c0_i32 = arith.constant 0 : i32
    %c0_i32_0 = arith.constant 0 : i32
    %c0_i32_1 = arith.constant 0 : i32
    return %c0_i32, %c0_i32_0 : i32, i32
  }
  func.func @transform_4(%arg0: i32) -> (i32, i32) {
    %c0_i32 = arith.constant 0 : i32
    %c0_i32_0 = arith.constant 0 : i32
    %c0_i32_1 = arith.constant 0 : i32
    return %c0_i32, %c0_i32_0 : i32, i32
  }
  func.func @transform_5(%arg0: i32) -> (i32, i32) {
    %c0_i32 = arith.constant 0 : i32
    %c0_i32_0 = arith.constant 0 : i32
    %c0_i32_1 = arith.constant 0 : i32
    return %c0_i32, %c0_i32_0 : i32, i32
  }
  func.func @transform_6(%arg0: i32) -> (i32, i32) {
    %c0_i32 = arith.constant 0 : i32
    %c0_i32_0 = arith.constant 0 : i32
    %c0_i32_1 = arith.constant 0 : i32
    return %c0_i32, %c0_i32_0 : i32, i32
  }
  func.func @transform_7(%arg0: i32) -> (i32, i32) {
    %c0_i32 = arith.constant 0 : i32
    %c0_i32_0 = arith.constant 0 : i32
    %c0_i32_1 = arith.constant 0 : i32
    return %c0_i32, %c0_i32_0 : i32, i32
  }
  func.func @transform_8(%arg0: i32) -> (i32, i32) {
    %c0_i32 = arith.constant 0 : i32
    %c0_i32_0 = arith.constant 0 : i32
    %c0_i32_1 = arith.constant 0 : i32
    return %c0_i32, %c0_i32_0 : i32, i32
  }
  func.func @transform_9(%arg0: i32) -> (i32, i32) {
    %c0_i32 = arith.constant 0 : i32
    %c0_i32_0 = arith.constant 0 : i32
    %c0_i32_1 = arith.constant 0 : i32
    return %c0_i32, %c0_i32_0 : i32, i32
  }
  func.func @transform_10(%arg0: i32) -> (i32, i32) {
    %c0_i32 = arith.constant 0 : i32
    %c0_i32_0 = arith.constant 0 : i32
    %c0_i32_1 = arith.constant 0 : i32
    return %c0_i32, %c0_i32_0 : i32, i32
  }
  func.func @transform_11(%arg0: i32) -> (i32, i32) {
    %c0_i32 = arith.constant 0 : i32
    %c0_i32_0 = arith.constant 0 : i32
    %c0_i32_1 = arith.constant 0 : i32
    return %c0_i32, %c0_i32_0 : i32, i32
  }
  func.func @transform_12(%arg0: i32) -> (i32, i32) {
    %c0_i32 = arith.constant 0 : i32
    %c0_i32_0 = arith.constant 0 : i32
    %c0_i32_1 = arith.constant 0 : i32
    return %c0_i32, %c0_i32_0 : i32, i32
  }
  func.func @transform_13(%arg0: i32) -> (i32, i32, i32) {
    %c0_i32 = arith.constant 0 : i32
    %c0_i32_0 = arith.constant 0 : i32
    %c0_i32_1 = arith.constant 0 : i32
    return %arg0, %c0_i32, %c0_i32_0 : i32, i32, i32
  }
}

</mosaic_0001>

<bundles_post_ra>
// kernel: _lambda_.1
= control target key start
LH: loop header
LB: loop body
LE: loop exit
PB: predicated region body
PF: predicated region fallthrough
CT: control target
= control target key end

     0   :  { %s9773_s0 = inlined_call_operand.vmem [shape: f32[2,256,32], index: 0, kind: input, shape index: {}]   ;;  %s9774_s1 = inlined_call_operand.vmem [shape: f32[2,1,64], index: 1, kind: input, shape index: {}]   ;;  %s9775_s2 = inlined_call_operand.vmem [shape: f32[288,1], index: 2, kind: input, shape index: {}]   ;;  %s9776_s3 = inlined_call_operand.vmem [shape: f32[288,1], index: 3, kind: input, shape index: {}]   ;;  %s9777_s4 = inlined_call_operand.vmem [shape: f32[64,64], index: 4, kind: input, shape index: {}]   ;;  %s9778_s5 = inlined_call_operand.vmem [shape: f32[1,64], index: 5, kind: input, shape index: {}]   ;;  %s9779_s6 = inlined_call_operand.hbm [shape: bf16[288,64], index: 6, kind: input, shape index: {}]   ;;  %s9780_s7 = inlined_call_operand.vmem [shape: f32[1,64], index: 7, kind: input, shape index: {}]   ;;  %s9781_s8 = inlined_call_operand.hbm [shape: f32[64,128], index: 8, kind: input, shape index: {}]   ;;  %s9782_s9 = inlined_call_operand.vmem [shape: f32[1,128], index: 9, kind: input, shape index: {}]   ;;  %s9783_s10 = inlined_call_operand.hbm [shape: bf16[576,64], index: 10, kind: input, shape index: {}]   ;;  %s9784_s11 = inlined_call_operand.vmem [shape: f32[1,64], index: 11, kind: input, shape index: {}]   ;;  %s9785_s12 = inlined_call_operand.vmem [shape: bf16[32,64], index: 12, kind: input, shape index: {}]   ;;  %s9786_s13 = inlined_call_operand.hbm [shape: f32[2,256,64], index: 13, kind: output, shape index: {}]  }
   0x1   :  { %9891 = sst [smem:[#allocation129_spill]] %s9781_s8 }
   0x2   :  { %9892 = sst [smem:[#allocation130_spill]] %s9786_s13 }
   0x3   :  { %18 = vsyncpa [#allocation5], 0 }
   0x4   :  { %19 = vsyncpa [#allocation8], 0 }
   0x5   :  { %20 = vsyncpa [#allocation6], 0 }
   0x6   :  { %22 = vsyncpa [#allocation6 + $0x1], 0  ;;  %s6312_s25 = smov 0   ;;  %s6314_s26 = smov 0  }
   0x7   :  { %s6316_s27 = smov 0   ;;  %s6318_s28 = smov 0  }
   0x8 LB: > { %9893 = sst [smem:[#allocation14_spill]] %s6211_s25  ;;  %s6333_s29 = sadd.s32 4294967295, %s6223_s28   ;;  %s6223_s28 = sphi %s6318_s28, %s10206_s28   ;;  %s6219_s27 = sphi %s6316_s27, %s10208_s27   ;;  %s6215_s26 = sphi %s6314_s26, %s10210_s26   ;;  %s6211_s25 = sphi %s6312_s25, %s10209_s25  }
   0x9   : > { %9894 = sst [smem:[#allocation15_spill]] %s6219_s27  ;;  %s5130_s30 = sadd.s32 4294967294, %s6223_s28  }
   0xa   : > { %9895 = sst [smem:[#allocation16_spill]] %s6223_s28  ;;  %s6337_s14 = sadd.s32 1, %s6223_s28  }
   0xb   : > { %9896 = sst [smem:[#allocation17_spill]] %s6337_s14  ;;  %s318_s15 = sadd.s32 1, %s6219_s27 }
   0xc   : > { %s315_s16 = ssub.s32 %s6223_s28, %s6337_s14  ;;  %p328_p0 = scmp.ne.s32.totalorder %s6219_s27, %s6215_s26 }
   0xd   : > { %p316_p1 = scmp.eq.s32.totalorder %s315_s16, 0  ;;  %p329_p2 = scmp.eq.s32.totalorder %s6333_s29, 1 }
   0xe   : > { %p334_p3 = scmp.ne.s32.totalorder %s6215_s26, %s6211_s25  ;;  %p335_p4 = scmp.eq.s32.totalorder %s5130_s30, 1 }
   0xf   : > { %s6348_s17 = scalar_select %p316_p1, %s6219_s27, %s318_s15  }
  0x10   : > { %p6350_p5 = por %p329_p2, %p328_p0  ;;  %p6354_p6 = por %p335_p4, %p334_p3 }
  0x11   : > { %9897 = sst [smem:[#allocation18_spill]] %s6348_s17  ;;  %p5131_p7 = scmp.ge.s32.totalorder %s6223_s28, 1 }
  0x12   : > { %s9898_s18 = scalar_select %p6350_p5, 1, 0 }
  0x13   : > { %s9900_s19 = scalar_select %p6354_p6, 1, 0 }
  0x14   : > { %9899 = sst [smem:[#allocation19_spill]] %s9898_s18  ;;  %p342_p8 = scmp.lt.s32.totalorder %s6223_s28, 3 }
  0x15   : > { %9901 = sst [smem:[#allocation20_spill]] %s9900_s19  ;;  %p9791_p9 = scmp.eq.s32.totalorder %s6333_s29, 0 }
  0x16   : > { %p6361_p10 = pnand %p5131_p7, %p342_p8  ;;  %s6225_s21 = smov [#allocation7]  }
  0x17   : > { %s382_s22 = sshll.u32 %s6225_s21, 4  ;;  %s6226_s24 = smov [#allocation4]   ;;  %s383_s22 = int_to_ptr.vmem [resolvable:$true] %s382_s22 }
  0x18   : > { %s9902_s20 = scalar_select %p6361_p10, 1, 0 }
  0x19   : > { %p5924_p11 = pneg %p6361_p10  ;;  %s366_s30 = sshll.u32 %s6226_s24, 4  ;;  %s6373_s30 = int_to_ptr.vmem [resolvable:$true] %s366_s30 }
  0x1a   : > { %s9904_s8 = sld [smem:[#allocation129_spill]] }
  0x1b   : > { %p6369_p12 = pnand %p9791_p9, %p5924_p11 }
  0x1d   : > { %p6383_p0 = pneg %p6369_p12 }
  0x20   : > { %s6069_s17 = scalar_lea.hbm %s9904_s8, 1024 }
  0x21   : > { %p6070_p13 = scmp.ne.s32.totalorder %s9904_s8, %s6069_s17  ;;  %p6076_p3 = scmp.lt.u32.totalorder %s6069_s17, %s9904_s8 }
  0x23   : > { %p6072_p1 = pnand %p6383_p0, %p6070_p13 }
  0x25   : > { %p6073_p2 = pneg %p6072_p1 }
  0x27   : > { %p6078_p4 = pnand %p6076_p3, %p6073_p2 }
  0x29   : > { %6081 = shalt.err (!%p6078_p4)
}
  0x2a   : > { %s6082_s15 = scalar_lea.vmem %s383_s22, 1024  ;;  %p6090_p9 = scmp.lt.s32.totalorder %s383_s22, %s383_s22 }
  0x2b   : > { %p6083_p7 = scmp.ne.s32.totalorder %s383_s22, %s6082_s15  ;;  %p6091_p6 = scmp.lt.s32.totalorder %s6082_s15, %s6082_s15 }
  0x2d   : > { %p6085_p8 = pnand %p6083_p7, %p6383_p0  ;;  %p6092_p5 = por %p6091_p6, %p6090_p9 }
  0x2f   : > { %p6086_p11 = pneg %p6085_p8 }
  0x31   : > { %p6093_p10 = pnand %p6092_p5, %p6086_p11 }
  0x33   : > { %6096 = shalt.err (!%p6093_p10)
}
  0x34   : > { %s6227_s27 = smov 128   ;;  %s6228_s14 = smov 8  }
  0x35   : > { %5930 = dma.hbm_to_vmem [thread:$0]  (!%p6369_p12), %s9904_s8, 1024, %s383_s22, [#allocation8], %s6227_s27, %s6227_s27, %s6228_s14  }
  0x36   : > { %s6097_s25 = scalar_lea.hbm %s9779_s6, 2304 }
  0x37   : > { %p6098_p13 = scmp.ne.s32.totalorder %s9779_s6, %s6097_s25  ;;  %p6104_p9 = scmp.lt.u32.totalorder %s6097_s25, %s9779_s6 }
  0x39   : > { %p6100_p5 = pnand %p6098_p13, %p6383_p0 }
  0x3b   : > { %p6101_p6 = pneg %p6100_p5 }
  0x3d   : > { %p6106_p10 = pnand %p6104_p9, %p6101_p6 }
  0x3f   : > { %6109 = shalt.err (!%p6106_p10)
}
  0x40   : > { %s6110_s22 = scalar_lea.vmem %s6373_s30, 2304  ;;  %p6118_p4 = scmp.lt.s32.totalorder %s6373_s30, %s6373_s30 }
  0x41   : > { %p6111_p1 = scmp.ne.s32.totalorder %s6373_s30, %s6110_s22  ;;  %p6119_p7 = scmp.lt.s32.totalorder %s6110_s22, %s6110_s22 }
  0x43   : > { %p6113_p2 = pnand %p6111_p1, %p6383_p0  ;;  %p6120_p8 = por %p6119_p7, %p6118_p4 }
  0x45   : > { %p6114_p3 = pneg %p6113_p2 }
  0x47   : > { %p6121_p11 = pnand %p6120_p8, %p6114_p3 }
  0x49   : > { %6124 = shalt.err (!%p6121_p11)
}
  0x4a   : > { %s6229_s13 = smov 64   ;;  %s6230_s25 = smov 4  }
  0x4b   : > { %5927 = dma.hbm_to_vmem [thread:$0]  (!%p6369_p12), %s9779_s6, 2304, %s6373_s30, [#allocation5], %s6229_s13, %s6229_s13, %s6230_s25  }
  0x4c   : > { %s6231_s27 = smov [#allocation9]   ;;  %s6125_s16 = scalar_lea.hbm %s9783_s10, 4608 }
  0x4d   : > { %s398_s14 = sshll.u32 %s6231_s27, 4  ;;  %p6126_p13 = scmp.ne.s32.totalorder %s9783_s10, %s6125_s16  ;;  %s399_s14 = int_to_ptr.vmem [resolvable:$true] %s398_s14 }
  0x4e   : > { %p6132_p9 = scmp.lt.u32.totalorder %s6125_s16, %s9783_s10 }
  0x4f   : > { %p6128_p5 = pnand %p6126_p13, %p6383_p0 }
  0x51   : > { %p6129_p6 = pneg %p6128_p5 }
  0x53   : > { %p6134_p10 = pnand %p6132_p9, %p6129_p6 }
  0x55   : > { %6137 = shalt.err (!%p6134_p10)
}
  0x56   : > { %s6138_s30 = scalar_lea.vmem %s399_s14, 4608  ;;  %p6146_p4 = scmp.lt.s32.totalorder %s399_s14, %s399_s14 }
  0x57   : > { %p6139_p1 = scmp.ne.s32.totalorder %s399_s14, %s6138_s30  ;;  %p6147_p7 = scmp.lt.s32.totalorder %s6138_s30, %s6138_s30 }
  0x59   : > { %p6141_p2 = pnand %p6139_p1, %p6383_p0  ;;  %p6148_p8 = por %p6147_p7, %p6146_p4 }
  0x5b   : > { %p6142_p3 = pneg %p6141_p2 }
  0x5d   : > { %p6149_p11 = pnand %p6148_p8, %p6142_p3 }
  0x5f   : > { %6152 = shalt.err (!%p6149_p11)
}
  0x60   : > { %5933 = dma.hbm_to_vmem [thread:$0]  (!%p6369_p12), %s9783_s10, 4608, %s399_s14, [#allocation8], %s6229_s13, %s6229_s13, %s6230_s25  }
  0x61   : > { %p9906_p13 = scmp.ne.s32.totalorder %s9902_s20, 0 }
  0x63   : > { %434 = sbr.rel (%p9906_p13) target bundleno = 1723 (0x6bb), region = 72 }
  0x6a   : > { %p9907_p5 = scmp.eq.s32.totalorder %s6333_s29, 0 }
  0x6c   : > { %6198 = dma.done.wait (%p9907_p5), [#allocation5], 2304   ;;  %p9908_p0 = pmov %p9907_p5 }
  0x6e   : > { %6200 = vsyncadd (%p9908_p0), [#allocation5], 4294964992  ;;  %p9909_p6 = pmov %p9908_p0 }
  0x6f   : > { %p9910_p9 = pmov %p9908_p0 }
  0x70   : > { %6202 = dma.done.wait (%p9909_p6), [#allocation8], 5632  }
  0x71   : > { %6204 = vsyncadd (%p9910_p9), [#allocation8], 4294961664  ;;  %v6232_v0 = vmov 0   ;;  %p489_p10 = scmp.lt.s32.totalorder %s6333_s29, 1  ;;  %vm635_vm0 = vcmask 261120   ;;  %vm1093_vm1 = vcmask 523264  }
  0x72   : > { %5993 = vset.pattern.permute.xlu0 %v6232_v0  ;;  %5994 = vset.pattern.permute.xlu1 %v6232_v0  ;;  %v9799_v1 = vmov 0.0   ;;  %v569_v2 = vld [vmem:[%s9776_s3 + $0x10] sm:$0xff]  ;;  %v5995_v3 = vld [vmem:[%s9785_s12] sm:$0xff]   ;;  %v5996_v5 = vld [vmem:[%s9785_s12 + $0x8] sm:$0xff]   ;;  %v9800_v13 = vmov 0.0|0.0   ;;  %vm6235_vm2 = vmmov 0  }
  0x73   : > { %1340 = vst.msk [vmem:[#allocation2] sm:$0xff] %vm635_vm0, %v9799_v1  ;;  %1341 = vst.msk [vmem:[#allocation2 + $0x8] sm:$0xff] %vm635_vm0, %v9799_v1  ;;  %s6478_s8 = scalar_select %p489_p10, %s6333_s29, 1  ;;  %1750 = vperm.xlu0 %5993, %v569_v2   ;;  %v567_v4 = vld [vmem:[%s9776_s3] sm:$0xff]  ;;  %5842 = vmatprep.subr.bf16.mxu1 %v5995_v3  ;;  %v533_v6 = vld [vmem:[%s9775_s2 + $0x10] sm:$0xff] }
  0x74   : > { %1342 = vst.msk [vmem:[#allocation2 + $0x10] sm:$0xff] %vm635_vm0, %v9799_v1  ;;  %1343 = vst.msk [vmem:[#allocation2 + $0x118] sm:$0xff] %vm635_vm0, %v9799_v1  ;;  %5668 = vmatprep.subr.bf16.mxu0 %v5995_v3  ;;  %5844 = vmatpush3.bf16.msra.mxu1 %v5995_v3  ;;  %v1084_v20 = vld [vmem:[%s9777_s4] sm:$0xff]  ;;  %v1085_v22 = vld [vmem:[%s9777_s4 + $0x8] sm:$0xff]  ;;  %s6236_s13 = smov 32   ;;  %s486_s23 = sand.u32 1, %s6215_s26  }
  0x75   : > { %1344 = vst.msk [vmem:[#allocation2 + $0x120] sm:$0xff] %vm635_vm0, %v9799_v1  ;;  %1345 = vst.msk [vmem:[#allocation2 + $0x128] sm:$0xff] %vm635_vm0, %v9799_v1  ;;  %s5256_s17 = sshll.u32 %s6478_s8, 8  ;;  %5669 = vmatpush3.bf16.msra.mxu0 %v5995_v3  ;;  %5843 = vmatprep.subr.bf16.mxu1 %v5996_v5  ;;  %v571_v23 = vld [vmem:[%s9776_s3 + $0x20] sm:$0xff]  ;;  %v5819_v24 = vpack.c.bf16 %v1085_v22, %v1084_v20  ;;  %v1086_v25 = vld [vmem:[%s9777_s4 + $0x10] sm:$0xff]  ;;  %s6679_s30 = scalar_lea.vmem %s9774_s1, %s6478_s8 }
  0x76   : > { %3484 = vst.msk [vmem:[#allocation3] sm:$0xff] %vm1093_vm1, %v9799_v1  ;;  %3485 = vst.msk [vmem:[#allocation3 + $0x8] sm:$0xff] %vm1093_vm1, %v9799_v1  ;;  %s6496_s15 = scalar_lea.vmem %s9773_s0, %s5256_s17  ;;  %5670 = vmatprep.subr.bf16.mxu0 %v5996_v5  ;;  %v1087_v26 = vld [vmem:[%s9777_s4 + $0x18] sm:$0xff]  ;;  %v537_v27 = vld [vmem:[%s9775_s2 + $0x30] sm:$0xff]  ;;  %s6237_s17 = smov 96  }
  0x77   : > { %3486 = vst.msk [vmem:[#allocation3 + $0x10] sm:$0xff] %vm1093_vm1, %v9799_v1  ;;  %3487 = vst.msk [vmem:[#allocation3 + $0x118] sm:$0xff] %vm1093_vm1, %v9799_v1  ;;  %1740 = vperm.xlu0 %5993, %v567_v4   ;;  %v6502_v7 = vld [vmem:[%s6496_s15 + $0x80] sm:$0xff]  ;;  %v6505_v8 = vld [vmem:[%s6496_s15 + $0x88] sm:$0xff]  ;;  %v5822_v30 = vpack.c.bf16 %v1087_v26, %v1086_v25  ;;  %s5140_s8 = sshll.u32 %s486_s23, 8  ;;  %s5257_s25 = sshll.u32 %s6333_s29, 12 }
  0x78   : > { %3488 = vst.msk [vmem:[#allocation3 + $0x120] sm:$0xff] %vm1093_vm1, %v9799_v1  ;;  %3489 = vst.msk [vmem:[#allocation3 + $0x128] sm:$0xff] %vm1093_vm1, %v9799_v1  ;;  %5845 = vmatpush3.bf16.msra.mxu1 %v5996_v5  ;;  %v6508_v9 = vld [vmem:[%s6496_s15 + $0x90] sm:$0xff]  ;;  %v6511_v10 = vld [vmem:[%s6496_s15 + $0x98] sm:$0xff]  ;;  %v611_v12 = vpack.c.bf16 %v6505_v8, %v6502_v7  ;;  %s9595_s21 = scalar_lea.vmem [#allocation10], %s5140_s8  ;;  %s10199_s14 = sld [smem:[#allocation19_spill]] }
  0x79   : > { %5671 = vmatpush3.bf16.msra.mxu0 %v5996_v5  ;;  %v6514_v11 = vld [vmem:[%s6496_s15 + $0xa0] sm:$0xff]  ;;  %5818 = vmatprep.subr.bf16.mxu1 %v9800_v13  ;;  %v6520_v14 = vld [vmem:[%s6496_s15 + $0xa8] sm:$0xff]  ;;  %v612_v15 = vpack.c.bf16 %v6511_v10, %v6508_v9  ;;  %v6526_v16 = vld [vmem:[%s6496_s15 + $0xb0] sm:$0xff]  ;;  %s5028_s27 = sshll.u32 %s9595_s21, 4  ;;  %s10200_s16 = sld [smem:[#allocation130_spill]]  ;;  %s9722_s27 = int_to_ptr.vmem [resolvable:$true] %s5028_s27 }
  0x7a   : > { %5688 = vmatprep.mubr.msk.bf16.mxu1 %vm635_vm0, %v611_v12  ;;  %v613_v17 = vpack.c.bf16 %v6520_v14, %v6514_v11  ;;  %v6532_v18 = vld [vmem:[%s6496_s15 + $0xb8] sm:$0xff]  ;;  %v6535_v19 = vld [vmem:[%s6496_s15 + $0xc0] sm:$0xff]  ;;  %v6541_v21 = vld [vmem:[%s6496_s15 + $0xc8] sm:$0xff]  ;;  %s9732_s29 = scalar_lea.sflag [#allocation6], %s486_s23 }
  0x7b   : > { %1426 = vperm.xlu0 %5993, %v533_v6   ;;  %5689 = vmatmul.mubr.msk.bf16.vlgmr.msra.gmra.mrb[0].mxu1 %vm635_vm0, %v612_v15  ;;  %v614_v28 = vpack.c.bf16 %v6532_v18, %v6526_v16  ;;  %v570_v29 = vld [vmem:[%s9776_s3 + $0x18] sm:$0xff]  ;;  %v615_v31 = vpack.c.bf16 %v6541_v21, %v6535_v19  ;;  %v1088_v32 = vld [vmem:[%s9777_s4 + $0x20] sm:$0xff]  ;;  %v1089_v33 = vld [vmem:[%s9777_s4 + $0x28] sm:$0xff] }
  0x7c   : > { %5692 = vmatprep.mubr.msk.bf16.mxu1 %vm635_vm0, %v613_v17  ;;  %5820 = vmatpush3.bf16.msra.mxu1 %v5819_v24  ;;  %v535_v34 = vld [vmem:[%s9775_s2 + $0x20] sm:$0xff]  ;;  %v6580_v36 = vld [vmem:[%s6496_s15 + $0x8] sm:$0xff]  ;;  %v573_v37 = vld [vmem:[%s9776_s3 + $0x30] sm:$0xff]  ;;  %v5825_v41 = vpack.c.bf16 %v1089_v33, %v1088_v32 }
  0x7d   : > { %1755 = vperm.xlu1 %5994, %v570_v29   ;;  %5821 = vmatprep.subr.bf16.mxu1 %v9800_v13  ;;  %v6577_v35 = vld [vmem:[%s6496_s15] sm:$0xff]  ;;  %v6587_v38 = vld [vmem:[%s6496_s15 + $0xd0] sm:$0xff]  ;;  %v6590_v39 = vld [vmem:[%s6496_s15 + $0xd8] sm:$0xff]  ;;  %v846_v47 = vsel %vm635_vm0, %v6580_v36, 0.0 }
  0x7e   : > { %v6593_v40 = vld [vmem:[%s6496_s15 + $0xe0] sm:$0xff]  ;;  %v6597_v42 = vld [vmem:[%s6496_s15 + $0xe8] sm:$0xff]  ;;  %v1090_v43 = vld [vmem:[%s9777_s4 + $0x30] sm:$0xff]  ;;  %v845_v46 = vsel %vm635_vm0, %v6577_v35, 0.0  ;;  %v616_v49 = vpack.c.bf16 %v6590_v39, %v6587_v38  ;;  %p10201_p1 = scmp.ne.s32.totalorder %s10199_s14, 0 }
  0x7f   : > { %1760 = vperm.xlu0 %5993, %v571_v23   ;;  %v1091_v44 = vld [vmem:[%s9777_s4 + $0x38] sm:$0xff]  ;;  %v536_v45 = vld [vmem:[%s9775_s2 + $0x28] sm:$0xff]  ;;  %v539_v48 = vld [vmem:[%s9775_s2 + $0x40] sm:$0xff]  ;;  %v617_v51 = vpack.c.bf16 %v6597_v42, %v6593_v40  ;;  %v847_v53 = vadd.f32 %v846_v47, %v845_v46  ;;  %s9720_s24 = scalar_lea.hbm %s10200_s16, %s5257_s25 }
  0x80   : > { %5823 = vmatpush3.bf16.msra.mxu1 %v5822_v30  ;;  %v6619_v50 = vld [vmem:[%s6496_s15 + $0x10] sm:$0xff]  ;;  %v5828_v52 = vpack.c.bf16 %v1091_v44, %v1090_v43  ;;  %v568_v54 = vld [vmem:[%s9776_s3 + $0x8] sm:$0xff]  ;;  %v575_v56 = vld [vmem:[%s9776_s3 + $0x40] sm:$0xff] }
  0x81   : > { %5824 = vmatprep.subr.bf16.mxu1 %v9800_v13  ;;  %1436 = vperm.xlu1 %5994, %v535_v34   ;;  %v848_v55 = vsel %vm635_vm0, %v6619_v50, 0.0  ;;  %v6634_v57 = vld [vmem:[%s6496_s15 + $0x18] sm:$0xff]  ;;  %v6637_v58 = vld [vmem:[%s6496_s15 + $0xf0] sm:$0xff]  ;;  %v6644_v60 = vld [vmem:[%s6496_s15 + $0x20] sm:$0xff] }
  0x82   : > { %v6640_v59 = vld [vmem:[%s6496_s15 + $0xf8] sm:$0xff]  ;;  %v6647_v61 = vld [vmem:[%s6496_s15 + $0x28] sm:$0xff]  ;;  %v6650_v62 = vld [vmem:[%s6496_s15 + $0x30] sm:$0xff]  ;;  %v849_v63 = vadd.f32 %v848_v55, %v847_v53  ;;  %v850_v2 = vsel %vm635_vm0, %v6634_v57, 0.0  ;;  %v852_v5 = vsel %vm635_vm0, %v6644_v60, 0.0 }
  0x83   : > { %1446 = vperm.xlu0 %5993, %v537_v27   ;;  %5693 = vmatmul.mubr.msk.bf16.gmra.mrb[4].mxu1 %vm635_vm0, %v614_v28  ;;  %v534_v0 = vld [vmem:[%s9775_s2 + $0x18] sm:$0xff]  ;;  %v541_v3 = vld [vmem:[%s9775_s2 + $0x50] sm:$0xff]  ;;  %v618_v4 = vpack.c.bf16 %v6640_v59, %v6637_v58  ;;  %v854_v6 = vsel %vm635_vm0, %v6647_v61, 0.0  ;;  %v856_v12 = vsel %vm635_vm0, %v6650_v62, 0.0  ;;  %v572_v17 = vld [vmem:[%s9776_s3 + $0x28] sm:$0xff] }
  0x84   : > { %5696 = vmatprep.mubr.msk.bf16.mxu1 %vm635_vm0, %v615_v31  ;;  %5826 = vmatpush3.bf16.msra.mxu1 %v5825_v41  ;;  %v577_v15 = vld [vmem:[%s9776_s3 + $0x50] sm:$0xff]  ;;  %v851_v20 = vadd.f32 %v850_v2, %v849_v63  ;;  %v538_v22 = vld [vmem:[%s9775_s2 + $0x38] sm:$0xff]  ;;  %v543_v23 = vld [vmem:[%s9775_s2 + $0x60] sm:$0xff] }
  0x85   : > { %1441 = vperm.xlu1 %5994, %v536_v45   ;;  %5827 = vmatprep.subr.bf16.mxu1 %v9800_v13  ;;  %v530_v25 = vld [vmem:[%s6679_s30] sm:$0x1]  ;;  %v6691_v26 = vld [vmem:[%s6496_s15 + $0x38] sm:$0xff]  ;;  %v540_v32 = vld [vmem:[%s9775_s2 + $0x48] sm:$0xff] }
  0x86   : > { %v853_v24 = vadd.f32 %v852_v5, %v851_v20  ;;  %v574_v27 = vld [vmem:[%s9776_s3 + $0x38] sm:$0xff]  ;;  %v579_v28 = vld [vmem:[%s9776_s3 + $0x60] sm:$0xff]  ;;  %v858_v31 = vsel %vm635_vm0, %v6691_v26, 0.0  ;;  %v545_v33 = vld [vmem:[%s9775_s2 + $0x70] sm:$0xff] }
  0x87   : > { %1770 = vperm.xlu0 %5993, %v573_v37   ;;  %v6700_v30 = vld [vmem:[%s6496_s15 + $0x40] sm:$0xff]  ;;  %v6712_v37 = vld [vmem:[%s6496_s15 + $0x48] sm:$0xff]  ;;  %v581_v44 = vld [vmem:[%s9776_s3 + $0x70] sm:$0xff] }
  0x88   : > { %5829 = vmatpush3.bf16.msra.mxu1 %v5828_v52  ;;  %v855_v29 = vadd.f32 %v854_v6, %v853_v24  ;;  %v860_v41 = vsel %vm635_vm0, %v6700_v30, 0.0  ;;  %v576_v43 = vld [vmem:[%s9776_s3 + $0x48] sm:$0xff]  ;;  %v6723_v46 = vld [vmem:[%s6496_s15 + $0x50] sm:$0xff]  ;;  %v862_v47 = vsel %vm635_vm0, %v6712_v37, 0.0  ;;  %v6734_v52 = vld [vmem:[%s6496_s15 + $0x58] sm:$0xff] }
  0x89   : > { %1745 = vperm.xlu1 %5994, %v568_v54   ;;  %v864_v53 = vsel %vm635_vm0, %v6723_v46, 0.0  ;;  %v578_v54 = vld [vmem:[%s9776_s3 + $0x58] sm:$0xff]  ;;  %v583_v55 = vld [vmem:[%s9776_s3 + $0x80] sm:$0xff]  ;;  %v549_v2 = vld [vmem:[%s9775_s2 + $0x90] sm:$0xff] }
  0x8a   : > { %v857_v34 = vadd.f32 %v856_v12, %v855_v29  ;;  %v6745_v63 = vld [vmem:[%s6496_s15 + $0x60] sm:$0xff]  ;;  %v6756_v5 = vld [vmem:[%s6496_s15 + $0x68] sm:$0xff]  ;;  %v585_v20 = vld [vmem:[%s9776_s3 + $0x90] sm:$0xff] }
  0x8b   : > { %1456 = vperm.xlu0 %5993, %v539_v48   ;;  %5697 = vmatmul.mubr.msk.bf16.gmra.mrb[8].mxu1 %vm635_vm0, %v616_v49  ;;  %v542_v48 = vld [vmem:[%s9775_s2 + $0x58] sm:$0xff]  ;;  %v547_v49 = vld [vmem:[%s9775_s2 + $0x80] sm:$0xff] }
  0x8c   : > { %5700 = vmatprep.mubr.msk.bf16.mxu1 %vm635_vm0, %v617_v51  ;;  %v859_v45 = vadd.f32 %v858_v31, %v857_v34  ;;  %v531_v6 = vld [vmem:[%s9775_s2] sm:$0xff]  ;;  %v546_v24 = vld [vmem:[%s9775_s2 + $0x78] sm:$0xff]  ;;  %v548_v34 = vld [vmem:[%s9775_s2 + $0x88] sm:$0xff] }
  0x8d   : > { %1431 = vperm.xlu1 %5994, %v534_v0   ;;  %v866_v0 = vsel %vm635_vm0, %v6734_v52, 0.0  ;;  %v551_v31 = vld [vmem:[%s9775_s2 + $0xa0] sm:$0xff] }
  0x8e   : > { %v861_v51 = vadd.f32 %v860_v41, %v859_v45  ;;  %v584_v45 = vld [vmem:[%s9776_s3 + $0x88] sm:$0xff] }
  0x8f   : > { %1780 = vperm.xlu0 %5993, %v575_v56  }
  0x90   : > { %v863_v56 = vadd.f32 %v862_v47, %v861_v51  ;;  %v876_v47 = vsel %vm635_vm0, %v6502_v7, 0.0  ;;  %v550_v51 = vld [vmem:[%s9775_s2 + $0x98] sm:$0xff] }
  0x91   : > { %1765 = vperm.xlu1 %5994, %v572_v17   ;;  %v580_v17 = vld [vmem:[%s9776_s3 + $0x68] sm:$0xff] }
  0x93   : > { %1466 = vperm.xlu0 %5993, %v541_v3   ;;  %5701 = vmatmul.mubr.msk.bf16.gmra.mrb[12].mxu1 %vm635_vm0, %v618_v4  ;;  %v544_v3 = vld [vmem:[%s9775_s2 + $0x68] sm:$0xff]  ;;  %v865_v4 = vadd.f32 %v864_v53, %v863_v56  ;;  %v878_v53 = vsel %vm635_vm0, %v6505_v8, 0.0 }
  0x94   : > { %5720 = vmatprep.mubr.msk.f32.mxu1 %vm6235_vm2, %v9799_v1  ;;  %v532_v56 = vld [vmem:[%s9775_s2 + $0x8] sm:$0xff] }
  0x95   : > { %1451 = vperm.xlu1 %5994, %v538_v22   ;;  %v867_v12 = vadd.f32 %v866_v0, %v865_v4  ;;  %v880_v0 = vsel %vm635_vm0, %v6508_v9, 0.0  ;;  %v586_v4 = vld [vmem:[%s9776_s3 + $0x98] sm:$0xff] }
  0x97   : > { %1790 = vperm.xlu0 %5993, %v577_v15   ;;  %v868_v15 = vsel %vm635_vm0, %v6745_v63, 0.0 }
  0x98   : > { %v869_v22 = vadd.f32 %v868_v15, %v867_v12  ;;  %v592_v12 = vld [vmem:[%s9776_s3 + $0xc8] sm:$0xff] }
  0x99   : > { %1775 = vperm.xlu1 %5994, %v574_v27  }
  0x9b   : > { %1476 = vperm.xlu0 %5993, %v543_v23   ;;  %5721 = vmatmul.mubr.msk.f32.vlgmr.msra.gmra.mrb[16].mxu1 %vm1093_vm1, %v530_v25  ;;  %v870_v23 = vsel %vm635_vm0, %v6756_v5, 0.0  ;;  %v6775_v25 = vld [vmem:[%s6496_s15 + $0x70] sm:$0xff] }
  0x9c   : > { %v871_v27 = vadd.f32 %v870_v23, %v869_v22  ;;  %v872_v29 = vsel %vm635_vm0, %v6775_v25, 0.0  ;;  %v1649_v22 = vld [vmem:[#allocation2 + $0x10] sm:$0xff]  ;;  %v884_v23 = vsel %vm635_vm0, %v6514_v11, 0.0  ;;  %v587_v11 = vld [vmem:[%s9776_s3 + $0xa0] sm:$0xff] }
  0x9d   : > { %1461 = vperm.xlu1 %5994, %v540_v32   ;;  %v6786_v32 = vld [vmem:[%s6496_s15 + $0x78] sm:$0xff] }
  0x9e   : > { %v874_v41 = vsel %vm635_vm0, %v6786_v32, 0.0 }
  0x9f   : > { %1800 = vperm.xlu0 %5993, %v579_v28   ;;  %v582_v28 = vld [vmem:[%s9776_s3 + $0x78] sm:$0xff] }
  0xa1   : > { %1785 = vperm.xlu1 %5994, %v576_v43   ;;  %v588_v43 = vld [vmem:[%s9776_s3 + $0xa8] sm:$0xff] }
  0xa3   : > { %1486 = vperm.xlu0 %5993, %v545_v33   ;;  %v873_v33 = vadd.f32 %v872_v29, %v871_v27  ;;  %v594_v29 = vld [vmem:[%s9776_s3 + $0xd8] sm:$0xff] }
  0xa5   : > { %1471 = vperm.xlu1 %5994, %v542_v48   ;;  %v553_v48 = vld [vmem:[%s9775_s2 + $0xb0] sm:$0xff] }
  0xa7   : > { %1810 = vperm.xlu0 %5993, %v581_v44   ;;  %v875_v44 = vadd.f32 %v874_v41, %v873_v33  ;;  %v888_v33 = vsel %vm635_vm0, %v6526_v16, 0.0  ;;  %v554_v41 = vld [vmem:[%s9775_s2 + $0xb8] sm:$0xff] }
  0xa9   : > { %1795 = vperm.xlu1 %5994, %v578_v54   ;;  %v590_v54 = vld [vmem:[%s9776_s3 + $0xb8] sm:$0xff] }
  0xab   : > { %1496 = vperm.xlu0 %5993, %v547_v49   ;;  %v877_v49 = vadd.f32 %v876_v47, %v875_v44  ;;  %v596_v44 = vld [vmem:[%s9776_s3 + $0xe8] sm:$0xff]  ;;  %v892_v47 = vsel %vm635_vm0, %v6535_v19, 0.0 }
  0xad   : > { %1481 = vperm.xlu1 %5994, %v544_v3  }
  0xaf   : > { %1820 = vperm.xlu0 %5993, %v583_v55   ;;  %v879_v55 = vadd.f32 %v878_v53, %v877_v49  ;;  %v556_v49 = vld [vmem:[%s9775_s2 + $0xc8] sm:$0xff]  ;;  %v598_v53 = vld [vmem:[%s9776_s3 + $0xf8] sm:$0xff] }
  0xb1   : > { %1805 = vperm.xlu1 %5994, %v580_v17   ;;  %v881_v3 = vadd.f32 %v880_v0, %v879_v55  ;;  %v552_v17 = vld [vmem:[%s9775_s2 + $0xa8] sm:$0xff]  ;;  %v896_v55 = vsel %vm635_vm0, %v6587_v38, 0.0  ;;  %v558_v0 = vld [vmem:[%s9775_s2 + $0xd8] sm:$0xff] }
  0xb3   : > { %1506 = vperm.xlu0 %5993, %v549_v2   ;;  %v555_v2 = vld [vmem:[%s9775_s2 + $0xc0] sm:$0xff] }
  0xb5   : > { %1491 = vperm.xlu1 %5994, %v546_v24  }
  0xb7   : > { %1416 = vperm.xlu0 %5993, %v531_v6   ;;  %v882_v6 = vsel %vm635_vm0, %v6511_v10, 0.0  ;;  %v557_v10 = vld [vmem:[%s9775_s2 + $0xd0] sm:$0xff] }
  0xb8   : > { %v883_v15 = vadd.f32 %v882_v6, %v881_v3  ;;  %v600_v3 = vld [vmem:[%s9776_s3 + $0x108] sm:$0xff]  ;;  %v900_v6 = vsel %vm635_vm0, %v6593_v40, 0.0  ;;  %v595_v40 = vld [vmem:[%s9776_s3 + $0xe0] sm:$0xff] }
  0xb9   : > { %1815 = vperm.xlu1 %5994, %v582_v28   ;;  %v886_v28 = vsel %vm635_vm0, %v6520_v14, 0.0  ;;  %v559_v14 = vld [vmem:[%s9775_s2 + $0xe0] sm:$0xff] }
  0xba   : > { %v885_v27 = vadd.f32 %v884_v23, %v883_v15  ;;  %v560_v15 = vld [vmem:[%s9775_s2 + $0xe8] sm:$0xff] }
  0xbb   : > { %1830 = vperm.xlu0 %5993, %v585_v20   ;;  %v1648_v20 = vld [vmem:[#allocation2 + $0x8] sm:$0xff] }
  0xbc   : > { %v1684_v24 = vpack.c.bf16 %v1649_v22, %v1648_v20  ;;  %v904_v22 = vsel %vm635_vm0, %v6637_v58, 0.0  ;;  %v564_v58 = vld [vmem:[%s9775_s2 + $0x108] sm:$0xff] }
  0xbd   : > { %1501 = vperm.xlu1 %5994, %v548_v34  }
  0xbf   : > { %1516 = vperm.xlu0 %5993, %v551_v31   ;;  %v887_v31 = vadd.f32 %v886_v28, %v885_v27  ;;  %v597_v27 = vld [vmem:[%s9776_s3 + $0xf0] sm:$0xff] }
  0xc1   : > { %1825 = vperm.xlu1 %5994, %v584_v45   ;;  %v889_v34 = vadd.f32 %v888_v33, %v887_v31  ;;  %v589_v45 = vld [vmem:[%s9776_s3 + $0xb0] sm:$0xff]  ;;  %v599_v31 = vld [vmem:[%s9776_s3 + $0x100] sm:$0xff] }
  0xc3   : > { %1845 = vperm.xlu0 %5993, %v588_v43   ;;  %v890_v43 = vsel %vm635_vm0, %v6532_v18, 0.0 }
  0xc4   : > { %v891_v16 = vadd.f32 %v890_v43, %v889_v34  ;;  %v603_v34 = vpack.c.bf16 %v6580_v36, %v6577_v35  ;;  %v605_v43 = vpack.c.bf16 %v6647_v61, %v6644_v60 }
  0xc5   : > { %1511 = vperm.xlu1 %5994, %v550_v51   ;;  %v894_v51 = vsel %vm635_vm0, %v6541_v21, 0.0 }
  0xc6   : > { %v893_v18 = vadd.f32 %v892_v47, %v891_v16  ;;  %5672 = vmatprep.mubr.msk.bf16.mxu0 %vm635_vm0, %v603_v34  ;;  %v606_v47 = vpack.c.bf16 %v6691_v26, %v6650_v62 }
  0xc7   : > { %1526 = vperm.xlu0 %5993, %v553_v48   ;;  %v561_v48 = vld [vmem:[%s9775_s2 + $0xf0] sm:$0xff] }
  0xc8   : > { %v895_v19 = vadd.f32 %v894_v51, %v893_v18 }
  0xc9   : > { %1421 = vperm.xlu1 %5994, %v532_v56   ;;  %v563_v56 = vld [vmem:[%s9775_s2 + $0x100] sm:$0xff] }
  0xca   : > { %v897_v21 = vadd.f32 %v896_v55, %v895_v19 }
  0xcb   : > { %1855 = vperm.xlu0 %5993, %v590_v54   ;;  %v591_v54 = vld [vmem:[%s9776_s3 + $0xc0] sm:$0xff] }
  0xcd   : > { %1835 = vperm.xlu1 %5994, %v586_v4   ;;  %v593_v4 = vld [vmem:[%s9776_s3 + $0xd0] sm:$0xff] }
  0xcf   : > { %1536 = vperm.xlu0 %5993, %v555_v2   ;;  %v898_v2 = vsel %vm635_vm0, %v6590_v39, 0.0 }
  0xd0   : > { %v899_v38 = vadd.f32 %v898_v2, %v897_v21 }
  0xd1   : > { %1521 = vperm.xlu1 %5994, %v552_v17   ;;  %v902_v17 = vsel %vm635_vm0, %v6597_v42, 0.0 }
  0xd2   : > { %v901_v39 = vadd.f32 %v900_v6, %v899_v38 }
  0xd3   : > { %1865 = vperm.xlu0 %5993, %v592_v12   ;;  %v565_v12 = vld [vmem:[%s9775_s2 + $0x110] sm:$0xff] }
  0xd4   : > { %v903_v20 = vadd.f32 %v902_v17, %v901_v39 }
  0xd5   : > { %1988 = vrot.lane.b32.xlu1 %v1684_v24, %s6236_s13  ;;  %v906_v24 = vsel %vm635_vm0, %v6640_v59, 0.0 }
  0xd6   : > { %v905_v23 = vadd.f32 %v904_v22, %v903_v20 }
  0xd7   : > { %1546 = vperm.xlu0 %5993, %v557_v10   ;;  %v562_v10 = vld [vmem:[%s9775_s2 + $0xf8] sm:$0xff] }
  0xd8   : > { %v907_v42 = vadd.f32 %v906_v24, %v905_v23 }
  0xd9   : > { %1840 = vperm.xlu1 %5994, %v587_v11   ;;  %v566_v11 = vld [vmem:[%s9775_s2 + $0x118] sm:$0xff] }
  0xda   : > { %v908_v28 = vrot.slane %v907_v42, 4 }
  0xdb   : > { %1875 = vperm.xlu0 %5993, %v594_v29  }
  0xdc   : > { %v909_v29 = vadd.f32 %v908_v28, %v907_v42 }
  0xdd   : > { %1531 = vperm.xlu1 %5994, %v554_v41   ;;  %v604_v41 = vpack.c.bf16 %v6634_v57, %v6619_v50 }
  0xde   : > { %v910_v59 = vrot.slane %v909_v29, 2 }
  0xdf   : > { %1556 = vperm.xlu0 %5993, %v559_v14   ;;  %v601_v14 = vld [vmem:[%s9776_s3 + $0x110] sm:$0xff]  ;;  %5673 = vmatmul.mubr.msk.bf16.vlgmr.msra.gmra.mrb[0].mxu0 %vm635_vm0, %v604_v41 }
  0xe0   : > { %v911_v33 = vadd.f32 %v910_v59, %v909_v29  ;;  %5676 = vmatprep.mubr.msk.bf16.mxu0 %vm635_vm0, %v605_v43 }
  0xe1   : > { %1850 = vperm.xlu1 %5994, %v589_v45  }
  0xe3   : > { %1885 = vperm.xlu0 %5993, %v596_v44   ;;  %v912_v44 = vrot.slane %v911_v33, 1 }
  0xe5   : > { %1541 = vperm.xlu1 %5994, %v556_v49   ;;  %v913_v16 = vadd.f32 %v912_v44, %v911_v33 }
  0xe7   : > { %1566 = vperm.xlu0 %5993, %v561_v48   ;;  %v6941_v48 = vmul.f32 0.00390625, %v913_v16  ;;  %5677 = vmatmul.mubr.msk.bf16.gmra.mrb[4].mxu0 %vm635_vm0, %v606_v47 }
  0xe9   : > { %1860 = vperm.xlu1 %5994, %v591_v54   ;;  %v6948_v49 = vsub.f32 %v6577_v35, %v6941_v48  ;;  %v6952_v51 = vsub.f32 %v6580_v36, %v6941_v48  ;;  %v6966_v35 = vsub.f32 %v6634_v57, %v6941_v48  ;;  %v6976_v2 = vsub.f32 %v6644_v60, %v6941_v48 }
  0xea   : > { %v6992_v60 = vsub.f32 %v6650_v62, %v6941_v48  ;;  %v7001_v22 = vsub.f32 %v6691_v26, %v6941_v48  ;;  %v7008_v62 = vsub.f32 %v6700_v30, %v6941_v48  ;;  %v7017_v26 = vsub.f32 %v6712_v37, %v6941_v48 }
  0xeb   : > { %1895 = vperm.xlu0 %5993, %v598_v53   ;;  %v6956_v53 = vsub.f32 %v6619_v50, %v6941_v48  ;;  %v948_v19 = vmul.f32 %v6948_v49, %v6948_v49  ;;  %v949_v54 = vmul.f32 %v6952_v51, %v6952_v51  ;;  %v952_v6 = vmul.f32 %v6976_v2, %v6976_v2 }
  0xec   : > { %v954_v23 = vmul.f32 %v6992_v60, %v6992_v60  ;;  %v955_v42 = vmul.f32 %v7001_v22, %v7001_v22  ;;  %v956_v29 = vmul.f32 %v7008_v62, %v7008_v62  ;;  %v7026_v33 = vsub.f32 %v6723_v46, %v6941_v48 }
  0xed   : > { %1551 = vperm.xlu1 %5994, %v558_v0   ;;  %v950_v36 = vmul.f32 %v6956_v53, %v6956_v53  ;;  %v981_v50 = vsel %vm635_vm0, %v949_v54, 0.0  ;;  %v987_v20 = vsel %vm635_vm0, %v952_v6, 0.0  ;;  %v7033_v43 = vsub.f32 %v6734_v52, %v6941_v48 }
  0xee   : > { %v995_v34 = vsel %vm635_vm0, %v956_v29, 0.0  ;;  %v958_v44 = vmul.f32 %v7026_v33, %v7026_v33  ;;  %v7042_v54 = vsub.f32 %v6745_v63, %v6941_v48 }
  0xef   : > { %1576 = vperm.xlu0 %5993, %v563_v56   ;;  %v980_v56 = vsel %vm635_vm0, %v948_v19, 0.0  ;;  %v983_v57 = vsel %vm635_vm0, %v950_v36, 0.0  ;;  %v959_v36 = vmul.f32 %v7033_v43, %v7033_v43 }
  0xf0   : > { %v982_v21 = vadd.f32 %v981_v50, %v980_v56  ;;  %v999_v56 = vsel %vm635_vm0, %v958_v44, 0.0 }
  0xf1   : > { %1870 = vperm.xlu1 %5994, %v593_v4   ;;  %v6983_v4 = vsub.f32 %v6647_v61, %v6941_v48 }
  0xf2   : > { %v6937_v45 = vpop.permute.xlu0 %1750  ;;  %v984_v38 = vadd.f32 %v983_v57, %v982_v21 }
  0xf3   : > { %1905 = vperm.xlu0 %5993, %v600_v3   ;;  %9911 = vst [vmem:[#allocation21_spill] sm:$0xff] %v6937_v45  ;;  %v951_v3 = vmul.f32 %v6966_v35, %v6966_v35  ;;  %v953_v17 = vmul.f32 %v6983_v4, %v6983_v4 }
  0xf5   : > { %1561 = vperm.xlu1 %5994, %v560_v15  }
  0xf6   : > { %v6944_v18 = vpop.permute.xlu0 %1740 }
  0xf7   : > { %1586 = vperm.xlu0 %5993, %v565_v12   ;;  %9912 = vst [vmem:[#allocation22_spill] sm:$0xff] %v6944_v18  ;;  %v985_v12 = vsel %vm635_vm0, %v951_v3, 0.0 }
  0xf8   : > { %v986_v15 = vadd.f32 %v985_v12, %v984_v38 }
  0xf9   : > { %1880 = vperm.xlu1 %5994, %v595_v40  }
  0xfa   : > { %v6962_v55 = vpop.permute.xlu0 %1426  ;;  %v988_v40 = vadd.f32 %v987_v20, %v986_v15  ;;  %v7061_v15 = vsub.f32 %v6756_v5, %v6941_v48  ;;  %v1001_v20 = vsel %vm635_vm0, %v959_v36, 0.0 }
  0xfb   : > { %9913 = vst [vmem:[#allocation23_spill] sm:$0xff] %v6962_v55 }
  0xfc   : > { %v7051_v3 = vpop.permute.xlu1 %1755 }
  0xfd   : > { %1571 = vperm.xlu1 %5994, %v562_v10   ;;  %v989_v10 = vsel %vm635_vm0, %v953_v17, 0.0  ;;  %9922 = vst [vmem:[#allocation32_spill] sm:$0xff] %v7051_v3  ;;  %v960_v17 = vmul.f32 %v7042_v54, %v7042_v54 }
  0xfe   : > { %v6972_v0 = vpop.permute.xlu0 %1760  ;;  %v990_v24 = vadd.f32 %v989_v10, %v988_v40  ;;  %v961_v10 = vmul.f32 %v7061_v15, %v7061_v15 }
  0xff   : > { %9914 = vst [vmem:[#allocation24_spill] sm:$0xff] %v6972_v0 }
 0x100   : > { %v1005_v44 = vsel %vm635_vm0, %v961_v10, 0.0 }
 0x101   : > { %1890 = vperm.xlu1 %5994, %v597_v27   ;;  %v991_v27 = vsel %vm635_vm0, %v954_v23, 0.0  ;;  %v7068_v23 = vsub.f32 %v6775_v25, %v6941_v48 }
 0x102   : > { %v6988_v39 = vpop.permute.xlu0 %1446 }
 0x103   : > { %9915 = vst [vmem:[#allocation25_spill] sm:$0xff] %v6988_v39  ;;  %v6065_v39 = vld [vmem:[%s6496_s15 + $0xe8] sm:$0xff] }
 0x105   : > { %1581 = vperm.xlu1 %5994, %v564_v58   ;;  %v992_v58 = vadd.f32 %v991_v27, %v990_v24  ;;  %v1003_v24 = vsel %vm635_vm0, %v960_v17, 0.0 }
 0x106   : > { %v6997_v61 = vpop.permute.xlu0 %1770 }
 0x107   : > { %9916 = vst [vmem:[#allocation26_spill] sm:$0xff] %v6997_v61 }
 0x109   : > { %1900 = vperm.xlu1 %5994, %v599_v31   ;;  %v993_v31 = vsel %vm635_vm0, %v955_v42, 0.0  ;;  %v7073_v42 = vpop.permute.xlu1 %1436 }
 0x10a   : > { %v7013_v28 = vpop.permute.xlu0 %1456  ;;  %v994_v59 = vadd.f32 %v993_v31, %v992_v58  ;;  %9926 = vst [vmem:[#allocation36_spill] sm:$0xff] %v7073_v42  ;;  %v6067_v42 = vld [vmem:[%s6496_s15 + $0xf8] sm:$0xff] }
 0x10b   : > { %9917 = vst [vmem:[#allocation27_spill] sm:$0xff] %v7013_v28  ;;  %v6064_v28 = vld [vmem:[%s6496_s15 + $0xe0] sm:$0xff] }
 0x10c   : > { %v996_v41 = vadd.f32 %v995_v34, %v994_v59  ;;  %v7087_v34 = vsub.f32 %v6786_v32, %v6941_v48 }
 0x10d   : > { %1591 = vperm.xlu1 %5994, %v566_v11  }
 0x10e   : > { %v7022_v11 = vpop.permute.xlu0 %1780 }
 0x10f   : > { %9918 = vst [vmem:[#allocation28_spill] sm:$0xff] %v7022_v11 }
 0x111   : > { %1910 = vperm.xlu1 %5994, %v601_v14   ;;  %v957_v14 = vmul.f32 %v7017_v26, %v7017_v26 }
 0x112   : > { %v7038_v47 = vpop.permute.xlu0 %1466 }
 0x113   : > { %v997_v16 = vsel %vm635_vm0, %v957_v14, 0.0  ;;  %9919 = vst [vmem:[#allocation29_spill] sm:$0xff] %v7038_v47  ;;  %v6063_v47 = vld [vmem:[%s6496_s15 + $0xd8] sm:$0xff] }
 0x114   : > { %v998_v19 = vadd.f32 %v997_v16, %v996_v41  ;;  %v962_v41 = vmul.f32 %v7068_v23, %v7068_v23  ;;  %v7092_v16 = vpop.permute.xlu1 %1441 }
 0x115   : > { %9932 = vst [vmem:[#allocation42_spill] sm:$0xff] %v7092_v16 }
 0x116   : > { %v1000_v38 = vadd.f32 %v999_v56, %v998_v19  ;;  %v7055_v6 = vpop.permute.xlu0 %1790  ;;  %v7098_v56 = vsub.f32 %v6502_v7, %v6941_v48  ;;  %v1007_v17 = vsel %vm635_vm0, %v962_v41, 0.0 }
 0x117   : > { %9924 = vst [vmem:[#allocation34_spill] sm:$0xff] %v7055_v6 }
 0x118   : > { %v1002_v40 = vadd.f32 %v1001_v20, %v1000_v38  ;;  %v963_v38 = vmul.f32 %v7087_v34, %v7087_v34  ;;  %v964_v7 = vmul.f32 %v7098_v56, %v7098_v56  ;;  %v7118_v13 = vpop.permute.xlu1 %1745 }
 0x119   : > { %9938 = vst [vmem:[#allocation48_spill] sm:$0xff] %v7118_v13 }
 0x11a   : > { %v7077_v58 = vpop.permute.xlu0 %1476  ;;  %v1004_v59 = vadd.f32 %v1003_v24, %v1002_v40 }
 0x11b   : > { %9928 = vst [vmem:[#allocation38_spill] sm:$0xff] %v7077_v58 }
 0x11c   : > { %v1006_v19 = vadd.f32 %v1005_v44, %v1004_v59  ;;  %v7113_v59 = vsub.f32 %v6505_v8, %v6941_v48  ;;  %v1009_v44 = vsel %vm635_vm0, %v963_v38, 0.0  ;;  %v609_v8 = vpack.c.bf16 %v6756_v5, %v6745_v63 }
 0x11e   : > { %v7094_v36 = vpop.permute.xlu0 %1800  ;;  %v1008_v10 = vadd.f32 %v1007_v17, %v1006_v19  ;;  %v607_v19 = vpack.c.bf16 %v6712_v37, %v6700_v30  ;;  %v608_v17 = vpack.c.bf16 %v6734_v52, %v6723_v46  ;;  %v965_v38 = vmul.f32 %v7113_v59, %v7113_v59  ;;  %v5998_v30 = vld [vmem:[#allocation4 + $0x88] sm:$0xff]   ;;  %v7140_v46 = vpop.permute.xlu1 %1431 }
 0x11f   : > { %9933 = vst [vmem:[#allocation43_spill] sm:$0xff] %v7094_v36  ;;  %9942 = vst [vmem:[#allocation52_spill] sm:$0xff] %v7140_v46  ;;  %v6066_v46 = vld [vmem:[%s6496_s15 + $0xf0] sm:$0xff] }
 0x120   : > { %5680 = vmatprep.mubr.msk.bf16.mxu0 %vm635_vm0, %v607_v19  ;;  %v946_v55 = vsub.f32 %v6066_v46, %v6941_v48 }
 0x121   : > { %5681 = vmatmul.mubr.msk.bf16.gmra.mrb[8].mxu0 %vm635_vm0, %v608_v17 }
 0x122   : > { %v7120_v41 = vpop.permute.xlu0 %1486  ;;  %5684 = vmatprep.mubr.msk.bf16.mxu0 %vm635_vm0, %v609_v8  ;;  %v6056_v8 = vld [vmem:[%s6496_s15 + $0xa0] sm:$0xff]  ;;  %v978_v18 = vmul.f32 %v946_v55, %v946_v55 }
 0x123   : > { %9939 = vst [vmem:[#allocation49_spill] sm:$0xff] %v7120_v41 }
 0x124   : > { %v1039_v46 = vsel %vm635_vm0, %v978_v18, 0.0 }
 0x126   : > { %v7145_v63 = vpop.permute.xlu0 %1810 }
 0x127   : > { %9944 = vst [vmem:[#allocation54_spill] sm:$0xff] %v7145_v63 }
 0x14e   : > { %v7047_v50 = vpop.f32.mrb[0].mxu1 }
 0x14f   : > { %9920 = vst [vmem:[#allocation30_spill] sm:$0xff] %v7047_v50  ;;  %v7049_v21 = vpop.f32.mrb[1].mxu1 }
 0x150   : > { %9921 = vst [vmem:[#allocation31_spill] sm:$0xff] %v7049_v21  ;;  %v7053_v57 = vpop.f32.mrb[2].mxu1  ;;  %v6060_v21 = vld [vmem:[%s6496_s15 + $0xc0] sm:$0xff] }
 0x151   : > { %9923 = vst [vmem:[#allocation33_spill] sm:$0xff] %v7053_v57  ;;  %v7057_v12 = vpop.f32.mrb[3].mxu1 }
 0x152   : > { %9925 = vst [vmem:[#allocation35_spill] sm:$0xff] %v7057_v12 }
 0x156   : > { %v7075_v27 = vpop.f32.mrb[4].mxu1 }
 0x157   : > { %9927 = vst [vmem:[#allocation37_spill] sm:$0xff] %v7075_v27  ;;  %v7079_v29 = vpop.f32.mrb[5].mxu1  ;;  %v9948_v27 = vmov 0.0|0.0  }
 0x158   : > { %9929 = vst [vmem:[#allocation39_spill] sm:$0xff] %v7079_v29  ;;  %v7081_v31 = vpop.f32.mrb[6].mxu1  ;;  %v6059_v29 = vld [vmem:[%s6496_s15 + $0xb8] sm:$0xff] }
 0x159   : > { %9930 = vst [vmem:[#allocation40_spill] sm:$0xff] %v7081_v31  ;;  %v7083_v14 = vpop.f32.mrb[7].mxu1  ;;  %v7205_v57 = vsub.f32 %v6059_v29, %v6941_v48 }
 0x15a   : > { %9931 = vst [vmem:[#allocation41_spill] sm:$0xff] %v7083_v14 }
 0x15e   : > { %v7103_v20 = vpop.f32.mrb[8].mxu1 }
 0x15f   : > { %9934 = vst [vmem:[#allocation44_spill] sm:$0xff] %v7103_v20  ;;  %v7105_v40 = vpop.f32.mrb[9].mxu1  ;;  %v1168_v20 = vlaneseq }
 0x160   : > { %9935 = vst [vmem:[#allocation45_spill] sm:$0xff] %v7105_v40  ;;  %v7107_v24 = vpop.f32.mrb[10].mxu1  ;;  %v1010_v40 = vadd.f32 %v1009_v44, %v1008_v10  ;;  %v1011_v10 = vsel %vm635_vm0, %v964_v7, 0.0 }
 0x161   : > { %9936 = vst [vmem:[#allocation46_spill] sm:$0xff] %v7107_v24  ;;  %v7109_v1 = vpop.f32.mrb[11].mxu1  ;;  %v5997_v24 = vld [vmem:[#allocation4 + $0x80] sm:$0xff]   ;;  %v1169_v7 = vshrl.u32 %v1168_v20, 7  ;;  %v610_v20 = vpack.c.bf16 %v6786_v32, %v6775_v25  ;;  %v7174_v25 = vpop.permute.xlu0 %1496 }
 0x162   : > { %9937 = vst [vmem:[#allocation47_spill] sm:$0xff] %v7109_v1  ;;  %v7130_v1 = vsub.f32 %v6508_v9, %v6941_v48  ;;  %5723 = vmatprep.subr.bf16.mxu0 %v5997_v24  ;;  %v1012_v9 = vadd.f32 %v1011_v10, %v1010_v40  ;;  %v1092_v40 = vld [vmem:[%s9778_s5] sm:$0x1]  ;;  %v7166_v10 = vsub.f32 %v6056_v8, %v6941_v48  ;;  %9949 = vst [vmem:[#allocation58_spill] sm:$0xff] %v7174_v25  ;;  %v6061_v25 = vld [vmem:[%s6496_s15 + $0xc8] sm:$0xff] }
 0x163   : > { %5724 = vmatpush3.bf16.msra.mxu0 %v5997_v24  ;;  %v7162_v24 = vsub.s32 0, %v1169_v7  ;;  %v6057_v7 = vld [vmem:[%s6496_s15 + $0xa8] sm:$0xff]  ;;  %v7227_v41 = vsub.f32 %v6061_v25, %v6941_v48 }
 0x164   : > { %5725 = vmatprep.subr.bf16.mxu0 %v5998_v30  ;;  %5685 = vmatmul.mubr.msk.bf16.gmra.mrb[12].mxu0 %vm635_vm0, %v610_v20  ;;  %v968_v8 = vmul.f32 %v7166_v10, %v7166_v10 }
 0x165   : > { %9946 = vst [vmem:[#allocation56_spill] sm:$0xff] %v7162_v24 }
 0x166   : > { %v7135_v44 = vpop.f32.mrb[12].mxu1 }
 0x167   : > { %9940 = vst [vmem:[#allocation50_spill] sm:$0xff] %v7135_v44  ;;  %v7137_v37 = vpop.f32.mrb[13].mxu1  ;;  %v6055_v44 = vld [vmem:[%s6496_s15 + $0x98] sm:$0xff]  ;;  %5726 = vmatpush3.bf16.msra.mxu0 %v5998_v30 }
 0x168   : > { %9941 = vst [vmem:[#allocation51_spill] sm:$0xff] %v7137_v37  ;;  %v7142_v52 = vpop.f32.mrb[14].mxu1  ;;  %v7152_v19 = vsub.f32 %v6055_v44, %v6941_v48  ;;  %v966_v37 = vmul.f32 %v7130_v1, %v7130_v1  ;;  %5830 = vmatprep.subr.bf16.mxu0 %v9948_v27 }
 0x169   : > { %9943 = vst [vmem:[#allocation53_spill] sm:$0xff] %v7142_v52  ;;  %v7147_v5 = vpop.f32.mrb[15].mxu1  ;;  %v1013_v52 = vsel %vm635_vm0, %v965_v38, 0.0 }
 0x16a   : > { %9945 = vst [vmem:[#allocation55_spill] sm:$0xff] %v7147_v5  ;;  %v1014_v17 = vadd.f32 %v1013_v52, %v1012_v9  ;;  %v967_v38 = vmul.f32 %v7152_v19, %v7152_v19  ;;  %v1015_v44 = vsel %vm635_vm0, %v966_v37, 0.0  ;;  %v7171_v5 = vpop.permute.xlu1 %1765  ;;  %v7183_v37 = vsub.f32 %v6057_v7, %v6941_v48 }
 0x16b   : > { %9947 = vst [vmem:[#allocation57_spill] sm:$0xff] %v7171_v5  ;;  %v1019_v7 = vsel %vm635_vm0, %v968_v8, 0.0  ;;  %v7216_v8 = vsub.f32 %v6060_v21, %v6941_v48 }
 0x16c   : > { %v1016_v52 = vadd.f32 %v1015_v44, %v1014_v17  ;;  %v1017_v14 = vsel %vm635_vm0, %v967_v38, 0.0  ;;  %v7194_v17 = vpop.permute.xlu0 %1820  ;;  %v6058_v44 = vld [vmem:[%s6496_s15 + $0xb0] sm:$0xff]  ;;  %v969_v38 = vmul.f32 %v7183_v37, %v7183_v37 }
 0x16d   : > { %9951 = vst [vmem:[#allocation60_spill] sm:$0xff] %v7194_v17 }
 0x16e   : > { %v1163_v31 = vpop.f32.mrb[16].mxu1  ;;  %v1018_v20 = vadd.f32 %v1017_v14, %v1016_v52  ;;  %v1021_v52 = vsel %vm635_vm0, %v969_v38, 0.0 }
 0x16f   : > { %v7176_v32 = vadd.f32 %v1163_v31, %v1092_v40  ;;  %v5722_v30 = vpop.f32.mrb[17].mxu1  ;;  %v7189_v31 = vpop.permute.xlu1 %1451  ;;  %v602_v40 = vld [vmem:[%s9776_s3 + $0x118] sm:$0xff] }
 0x170   : > { %9950 = vst [vmem:[#allocation59_spill] sm:$0xff] %v7189_v31  ;;  %v7198_v30 = vsub.f32 %v6058_v44, %v6941_v48  ;;  %v7212_v50 = vpop.permute.xlu0 %1506  ;;  %v7256_v31 = vsub.f32 %v6064_v28, %v6941_v48 }
 0x171   : > { %v1207_v9 = vrot.slane %v7176_v32, %v7162_v24  ;;  %9953 = vst [vmem:[#allocation62_spill] sm:$0xff] %v7212_v50  ;;  %v6062_v50 = vld [vmem:[%s6496_s15 + $0xd0] sm:$0xff]  ;;  %s6238_s15 = smov 64  }
 0x172   : > { %v970_v14 = vmul.f32 %v7198_v30, %v7198_v30 }
 0x173   : > { %1209 = vrot.lane.b32.xlu0 %v1207_v9, %s6237_s17  ;;  %v1020_v9 = vadd.f32 %v1019_v7, %v1018_v20  ;;  %v7210_v44 = vpop.permute.xlu1 %1775 }
 0x174   : > { %9952 = vst [vmem:[#allocation61_spill] sm:$0xff] %v7210_v44  ;;  %v1023_v29 = vsel %vm635_vm0, %v970_v14, 0.0  ;;  %v7223_v38 = vpop.permute.xlu0 %1416  ;;  %v7234_v14 = vsub.f32 %v6062_v50, %v6941_v48 }
 0x175   : > { %v1022_v12 = vadd.f32 %v1021_v52, %v1020_v9  ;;  %9955 = vst [vmem:[#allocation64_spill] sm:$0xff] %v7223_v38  ;;  %v972_v9 = vmul.f32 %v7216_v8, %v7216_v8 }
 0x177   : > { %1915 = vperm.xlu0 %5993, %v602_v40   ;;  %v971_v40 = vmul.f32 %v7205_v57, %v7205_v57  ;;  %v7221_v20 = vpop.permute.xlu1 %1461  ;;  %v1024_v7 = vadd.f32 %v1023_v29, %v1022_v12  ;;  %v973_v12 = vmul.f32 %v7227_v41, %v7227_v41  ;;  %v1027_v29 = vsel %vm635_vm0, %v972_v9, 0.0 }
 0x178   : > { %9954 = vst [vmem:[#allocation63_spill] sm:$0xff] %v7221_v20  ;;  %v7241_v25 = vpop.permute.xlu0 %1830 }
 0x179   : > { %v1025_v21 = vsel %vm635_vm0, %v971_v40, 0.0  ;;  %9957 = vst [vmem:[#allocation66_spill] sm:$0xff] %v7241_v25  ;;  %v7245_v40 = vsub.f32 %v6063_v47, %v6941_v48  ;;  %v1029_v50 = vsel %vm635_vm0, %v973_v12, 0.0  ;;  %v7263_v12 = vsub.f32 %v6065_v39, %v6941_v48 }
 0x17a   : > { %v1026_v52 = vadd.f32 %v1025_v21, %v1024_v7  ;;  %v974_v7 = vmul.f32 %v7234_v14, %v7234_v14 }
 0x17b   : > { %v7239_v38 = vpop.permute.xlu1 %1785 }
 0x17c   : > { %9956 = vst [vmem:[#allocation65_spill] sm:$0xff] %v7239_v38  ;;  %v1028_v58 = vadd.f32 %v1027_v29, %v1026_v52  ;;  %v7252_v9 = vpop.permute.xlu0 %1516  ;;  %v975_v52 = vmul.f32 %v7245_v40, %v7245_v40  ;;  %v1031_v47 = vsel %vm635_vm0, %v974_v7, 0.0 }
 0x17d   : > { %9959 = vst [vmem:[#allocation68_spill] sm:$0xff] %v7252_v9 }
 0x17e   : > { %v1030_v20 = vadd.f32 %v1029_v50, %v1028_v58  ;;  %v976_v58 = vmul.f32 %v7256_v31, %v7256_v31  ;;  %v1033_v50 = vsel %vm635_vm0, %v975_v52, 0.0  ;;  %v947_v52 = vsub.f32 %v6067_v42, %v6941_v48 }
 0x17f   : > { %v7250_v21 = vpop.permute.xlu1 %1471 }
 0x180   : > { %9958 = vst [vmem:[#allocation67_spill] sm:$0xff] %v7250_v21  ;;  %v1032_v29 = vadd.f32 %v1031_v47, %v1030_v20  ;;  %v7270_v28 = vpop.permute.xlu0 %1845  ;;  %v977_v20 = vmul.f32 %v7263_v12, %v7263_v12  ;;  %v1035_v7 = vsel %vm635_vm0, %v976_v58, 0.0 }
 0x181   : > { %9961 = vst [vmem:[#allocation70_spill] sm:$0xff] %v7270_v28 }
 0x182   : > { %v1034_v21 = vadd.f32 %v1033_v50, %v1032_v29  ;;  %v1037_v13 = vsel %vm635_vm0, %v977_v20, 0.0  ;;  %v979_v50 = vmul.f32 %v947_v52, %v947_v52 }
 0x183   : > { %v7268_v9 = vpop.permute.xlu1 %1795 }
 0x184   : > { %9960 = vst [vmem:[#allocation69_spill] sm:$0xff] %v7268_v9  ;;  %v1036_v47 = vadd.f32 %v1035_v7, %v1034_v21  ;;  %v7279_v16 = vpop.permute.xlu0 %1526 }
 0x185   : > { %9963 = vst [vmem:[#allocation72_spill] sm:$0xff] %v7279_v16 }
 0x186   : > { %v1038_v29 = vadd.f32 %v1037_v13, %v1036_v47 }
 0x187   : > { %v7277_v39 = vpop.permute.xlu1 %1481 }
 0x188   : > { %9962 = vst [vmem:[#allocation71_spill] sm:$0xff] %v7277_v39  ;;  %v7287_v45 = vpop.permute.xlu0 %1855  ;;  %v1040_v58 = vadd.f32 %v1039_v46, %v1038_v29  ;;  %v1041_v39 = vsel %vm635_vm0, %v979_v50, 0.0 }
 0x189   : > { %9965 = vst [vmem:[#allocation74_spill] sm:$0xff] %v7287_v45 }
 0x18a   : > { %v1042_v7 = vadd.f32 %v1041_v39, %v1040_v58 }
 0x18b   : > { %v7285_v3 = vpop.permute.xlu1 %1805 }
 0x18c   : > { %9964 = vst [vmem:[#allocation73_spill] sm:$0xff] %v7285_v3  ;;  %v7292_v16 = vpop.permute.xlu0 %1536  ;;  %v1043_v48 = vrot.slane %v1042_v7, 4 }
 0x18d   : > { %9967 = vst [vmem:[#allocation76_spill] sm:$0xff] %v7292_v16 }
 0x18e   : > { %v1044_v13 = vadd.f32 %v1043_v48, %v1042_v7 }
 0x18f   : > { %v7290_v21 = vpop.permute.xlu1 %1491 }
 0x190   : > { %9966 = vst [vmem:[#allocation75_spill] sm:$0xff] %v7290_v21  ;;  %v7296_v20 = vpop.permute.xlu0 %1865  ;;  %v1045_v18 = vrot.slane %v1044_v13, 2 }
 0x191   : > { %9969 = vst [vmem:[#allocation78_spill] sm:$0xff] %v7296_v20 }
 0x192   : > { %v1046_v45 = vadd.f32 %v1045_v18, %v1044_v13 }
 0x193   : > { %v7294_v42 = vpop.permute.xlu1 %1815 }
 0x194   : > { %9968 = vst [vmem:[#allocation77_spill] sm:$0xff] %v7294_v42  ;;  %v7300_v28 = vpop.permute.xlu0 %1546  ;;  %v1047_v46 = vrot.slane %v1046_v45, 1 }
 0x195   : > { %9971 = vst [vmem:[#allocation80_spill] sm:$0xff] %v7300_v28 }
 0x196   : > { %v1048_v58 = vadd.f32 %v1047_v46, %v1046_v45 }
 0x197   : > { %v7298_v47 = vpop.permute.xlu1 %1501 }
 0x198   : > { %9970 = vst [vmem:[#allocation79_spill] sm:$0xff] %v7298_v47  ;;  %v7304_v50 = vpop.permute.xlu0 %1875  ;;  %v1049_v21 = vmul.f32 0.00390625, %v1048_v58 }
 0x199   : > { %9973 = vst [vmem:[#allocation82_spill] sm:$0xff] %v7304_v50 }
 0x19a   : > { %v1050_v48 = vadd.f32 1e-05, %v1049_v21 }
 0x19b   : > { %v7302_v29 = vpop.permute.xlu1 %1825 }
 0x19c   : > { %9972 = vst [vmem:[#allocation81_spill] sm:$0xff] %v7302_v29  ;;  %v7308_v16 = vpop.permute.xlu0 %1556  ;;  %6051 = vrsqrt.f32 %v1050_v48  ;;  %v1167_v48 = vadd.f32 1.0, %v7176_v32 }
 0x19d   : > { %9975 = vst [vmem:[#allocation84_spill] sm:$0xff] %v7308_v16 }
 0x19f   : > { %v7306_v39 = vpop.permute.xlu1 %1511 }
 0x1a0   : > { %9974 = vst [vmem:[#allocation83_spill] sm:$0xff] %v7306_v39  ;;  %v7312_v7 = vpop.permute.xlu0 %1885 }
 0x1a1   : > { %9977 = vst [vmem:[#allocation86_spill] sm:$0xff] %v7312_v7 }
 0x1a3   : > { %v7310_v25 = vpop.permute.xlu1 %1421 }
 0x1a4   : > { %9976 = vst [vmem:[#allocation85_spill] sm:$0xff] %v7310_v25  ;;  %v7316_v13 = vpop.permute.xlu0 %1566 }
 0x1a5   : > { %9979 = vst [vmem:[#allocation88_spill] sm:$0xff] %v7316_v13 }
 0x1a6   : > { %v6052_v50 = vpop.eup %6051 }
 0x1a7   : > { %v7314_v47 = vpop.permute.xlu1 %1835  ;;  %v1068_v46 = vmul.f32 %v6052_v50, %v7098_v56  ;;  %v1069_v58 = vmul.f32 %v6052_v50, %v7113_v59  ;;  %v1070_v21 = vmul.f32 %v6052_v50, %v7130_v1  ;;  %v1071_v25 = vmul.f32 %v6052_v50, %v7152_v19 }
 0x1a8   : > { %9978 = vst [vmem:[#allocation87_spill] sm:$0xff] %v7314_v47  ;;  %v7320_v28 = vpop.permute.xlu0 %1895  ;;  %v1072_v13 = vmul.f32 %v6052_v50, %v7166_v10  ;;  %v1073_v16 = vmul.f32 %v6052_v50, %v7183_v37  ;;  %v1076_v56 = vmul.f32 %v6052_v50, %v7216_v8  ;;  %v1077_v59 = vmul.f32 %v6052_v50, %v7227_v41 }
 0x1a9   : > { %9981 = vst [vmem:[#allocation90_spill] sm:$0xff] %v7320_v28  ;;  %v1078_v1 = vmul.f32 %v6052_v50, %v7234_v14  ;;  %v7341_v19 = vmul.f32 %v6052_v50, %v7245_v40  ;;  %v7344_v32 = vmul.f32 %v6052_v50, %v7256_v31  ;;  %v7347_v10 = vmul.f32 %v6052_v50, %v7263_v12 }
 0x1aa   : > { %v7349_v37 = vmul.f32 %v6052_v50, %v946_v55  ;;  %v1052_v41 = vmul.f32 %v6052_v50, %v6948_v49  ;;  %v1053_v14 = vmul.f32 %v6052_v50, %v6952_v51  ;;  %v1054_v40 = vmul.f32 %v6052_v50, %v6956_v53 }
 0x1ab   : > { %v7318_v18 = vpop.permute.xlu1 %1521  ;;  %v1055_v31 = vmul.f32 %v6052_v50, %v6966_v35  ;;  %v1056_v12 = vmul.f32 %v6052_v50, %v6976_v2  ;;  %v1057_v55 = vmul.f32 %v6052_v50, %v6983_v4  ;;  %v1062_v49 = vmul.f32 %v6052_v50, %v7026_v33 }
 0x1ac   : > { %9980 = vst [vmem:[#allocation89_spill] sm:$0xff] %v7318_v18  ;;  %v7324_v45 = vpop.permute.xlu0 %1576  ;;  %v1074_v18 = vmul.f32 %v6052_v50, %v7198_v30  ;;  %v7354_v30 = vrot.slane %v1167_v48, %v7162_v24  ;;  %v1060_v48 = vmul.f32 %v6052_v50, %v7008_v62  ;;  %v1061_v24 = vmul.f32 %v6052_v50, %v7017_v26 }
 0x1ad   : > { %9983 = vst [vmem:[#allocation92_spill] sm:$0xff] %v7324_v45  ;;  %v1059_v45 = vmul.f32 %v6052_v50, %v7001_v22  ;;  %v1063_v51 = vmul.f32 %v6052_v50, %v7033_v43  ;;  %v1064_v53 = vmul.f32 %v6052_v50, %v7042_v54  ;;  %v1065_v35 = vmul.f32 %v6052_v50, %v7061_v15 }
 0x1ae   : > { %v1066_v2 = vmul.f32 %v6052_v50, %v7068_v23  ;;  %v7376_v4 = vmul.f32 %v7354_v30, %v1068_v46  ;;  %v7382_v22 = vmul.f32 %v7354_v30, %v1070_v21  ;;  %v1067_v62 = vmul.f32 %v6052_v50, %v7087_v34 }
 0x1af   : > { %v7322_v39 = vpop.permute.xlu1 %1988  ;;  %v7386_v26 = vmul.f32 %v7354_v30, %v1071_v25  ;;  %v7389_v33 = vmul.f32 %v7354_v30, %v1072_v13  ;;  %v7392_v43 = vmul.f32 %v7354_v30, %v1073_v16  ;;  %v7395_v54 = vmul.f32 %v7354_v30, %v1074_v18 }
 0x1b0   : > { %9982 = vst [vmem:[#allocation91_spill] sm:$0xff] %v7322_v39  ;;  %v1075_v39 = vmul.f32 %v6052_v50, %v7205_v57  ;;  %v7351_v57 = vmul.f32 %v6052_v50, %v947_v52  ;;  %v7356_v8 = vpop.permute.xlu0 %1905  ;;  %v1058_v52 = vmul.f32 %v6052_v50, %v6992_v60  ;;  %v7379_v60 = vmul.f32 %v7354_v30, %v1069_v58 }
 0x1b1   : > { %9985 = vst [vmem:[#allocation94_spill] sm:$0xff] %v7356_v8  ;;  %v7401_v23 = vmul.f32 %v7354_v30, %v1076_v56  ;;  %v7404_v34 = vmul.f32 %v7354_v30, %v1077_v59  ;;  %v7407_v25 = vmul.f32 %v7354_v30, %v1078_v1  ;;  %v1172_v16 = vmul.f32 %v7354_v30, %v1052_v41 }
 0x1b2   : > { %v7398_v15 = vmul.f32 %v7354_v30, %v1075_v39  ;;  %v1173_v13 = vmul.f32 %v7354_v30, %v1053_v14  ;;  %v1174_v18 = vmul.f32 %v7354_v30, %v1054_v40  ;;  %v1175_v39 = vmul.f32 %v7354_v30, %v1055_v31 }
 0x1b3   : > { %v7335_v28 = vpop.permute.xlu1 %1840  ;;  %v1176_v46 = vmul.f32 %v7354_v30, %v1056_v12  ;;  %v1177_v58 = vmul.f32 %v7354_v30, %v1057_v55  ;;  %v1178_v21 = vmul.f32 %v7354_v30, %v1058_v52  ;;  %v1179_v56 = vmul.f32 %v7354_v30, %v1059_v45 }
 0x1b4   : > { %9984 = vst [vmem:[#allocation93_spill] sm:$0xff] %v7335_v28  ;;  %v7409_v50 = vpop.permute.xlu0 %1586  ;;  %v1180_v1 = vmul.f32 %v7354_v30, %v1060_v48  ;;  %v1181_v41 = vmul.f32 %v7354_v30, %v1061_v24  ;;  %v1182_v14 = vmul.f32 %v7354_v30, %v1062_v49  ;;  %v1183_v40 = vmul.f32 %v7354_v30, %v1063_v51 }
 0x1b5   : > { %9987 = vst [vmem:[#allocation96_spill] sm:$0xff] %v7409_v50  ;;  %v1184_v31 = vmul.f32 %v7354_v30, %v1064_v53  ;;  %v1185_v12 = vmul.f32 %v7354_v30, %v1065_v35  ;;  %v1186_v55 = vmul.f32 %v7354_v30, %v1066_v2  ;;  %v7429_v52 = vmul.f32 %v7354_v30, %v1067_v62 }
 0x1b7   : > { %v7369_v8 = vpop.permute.xlu1 %1531 }
 0x1b8   : > { %9986 = vst [vmem:[#allocation95_spill] sm:$0xff] %v7369_v8 }
 0x1bb   : > { %v7419_v59 = vpop.permute.xlu1 %1850 }
 0x1bc   : > { %9988 = vst [vmem:[#allocation97_spill] sm:$0xff] %v7419_v59 }
 0x1bf   : > { %v7441_v7 = vpop.permute.xlu1 %1541 }
 0x1c0   : > { %9989 = vst [vmem:[#allocation98_spill] sm:$0xff] %v7441_v7 }
 0x1e5   : > { %v7431_v45 = vpop.permute.xlu0 %1209 }
 0x1e6   : > { %v1214_v50 = vadd.f32 %v7431_v45, %v1174_v18  ;;  %v1215_v48 = vadd.f32 %v7431_v45, %v1175_v39  ;;  %v1212_v24 = vadd.f32 %v7431_v45, %v1172_v16  ;;  %v1213_v49 = vadd.f32 %v7431_v45, %v1173_v13 }
 0x1e7   : > { %v1216_v51 = vadd.f32 %v7431_v45, %v1176_v46  ;;  %v1217_v53 = vadd.f32 %v7431_v45, %v1177_v58  ;;  %v1218_v35 = vadd.f32 %v7431_v45, %v1178_v21  ;;  %v1219_v2 = vadd.f32 %v7431_v45, %v1179_v56 }
 0x1e8   : > { %vm1246_vm3 = vcmp.ge.f32.partialorder %v1214_v50, 0.0  ;;  %vm1247_vm4 = vcmp.ge.f32.partialorder %v1215_v48, 0.0  ;;  %v1278_v62 = vmul.f32 0.2, %v1214_v50  ;;  %v1279_v8 = vmul.f32 0.2, %v1215_v48 }
 0x1e9   : > { %vm1244_vm5 = vcmp.ge.f32.partialorder %v1212_v24, 0.0  ;;  %vm1245_vm6 = vcmp.ge.f32.partialorder %v1213_v49, 0.0  ;;  %v1276_v18 = vmul.f32 0.2, %v1212_v24  ;;  %v1277_v39 = vmul.f32 0.2, %v1213_v49 }
 0x1ea   : > { %v1310_v16 = vsel %vm1246_vm3, %v1214_v50, %v1278_v62  ;;  %v1311_v13 = vsel %vm1247_vm4, %v1215_v48, %v1279_v8  ;;  %vm1248_vm7 = vcmp.ge.f32.partialorder %v1216_v51, 0.0  ;;  %v1280_v46 = vmul.f32 0.2, %v1216_v51 }
 0x1eb   : > { %1348 = vst.msk [vmem:[#allocation2 + $0x28] sm:$0xff] %vm635_vm0, %v1310_v16  ;;  %1349 = vst.msk [vmem:[#allocation2 + $0x30] sm:$0xff] %vm635_vm0, %v1311_v13  ;;  %v1308_v58 = vsel %vm1244_vm5, %v1212_v24, %v1276_v18  ;;  %v1309_v21 = vsel %vm1245_vm6, %v1213_v49, %v1277_v39  ;;  %vm1249_vm8 = vcmp.ge.f32.partialorder %v1217_v53, 0.0  ;;  %vm1250_vm9 = vcmp.ge.f32.partialorder %v1218_v35, 0.0  ;;  %v7453_v39 = vpop.permute.xlu1 %1860  ;;  %v7465_v13 = vld [vmem:[#allocation7] sm:$0xff] }
 0x1ec   : > { %1346 = vst.msk [vmem:[#allocation2 + $0x18] sm:$0xff] %vm635_vm0, %v1308_v58  ;;  %1347 = vst.msk [vmem:[#allocation2 + $0x20] sm:$0xff] %vm635_vm0, %v1309_v21  ;;  %v1312_v56 = vsel %vm1248_vm7, %v1216_v51, %v1280_v46  ;;  %v1281_v20 = vmul.f32 0.2, %v1217_v53  ;;  %v1282_v59 = vmul.f32 0.2, %v1218_v35  ;;  %v1220_v50 = vadd.f32 %v7431_v45, %v1180_v1 }
 0x1ed   : > { %1350 = vst.msk [vmem:[#allocation2 + $0x38] sm:$0xff] %vm635_vm0, %v1312_v56  ;;  %vm1251_vm10 = vcmp.ge.f32.partialorder %v1219_v2, 0.0  ;;  %v1283_v8 = vmul.f32 0.2, %v1219_v2  ;;  %v1221_v48 = vadd.f32 %v7431_v45, %v1181_v41  ;;  %v1222_v24 = vadd.f32 %v7431_v45, %v1182_v14  ;;  %9990 = vst [vmem:[#allocation99_spill] sm:$0xff] %v7453_v39  ;;  %v7467_v46 = vld [vmem:[#allocation7 + $0x8] sm:$0xff] }
 0x1ee   : > { %v1313_v49 = vsel %vm1249_vm8, %v1217_v53, %v1281_v20  ;;  %v1314_v62 = vsel %vm1250_vm9, %v1218_v35, %v1282_v59  ;;  %vm1252_vm11 = vcmp.ge.f32.partialorder %v1220_v50, 0.0  ;;  %v1284_v18 = vmul.f32 0.2, %v1220_v50 }
 0x1ef   : > { %1351 = vst.msk [vmem:[#allocation2 + $0x40] sm:$0xff] %vm635_vm0, %v1313_v49  ;;  %1352 = vst.msk [vmem:[#allocation2 + $0x48] sm:$0xff] %vm635_vm0, %v1314_v62  ;;  %v1315_v51 = vsel %vm1251_vm10, %v1219_v2, %v1283_v8  ;;  %vm1253_vm12 = vcmp.ge.f32.partialorder %v1221_v48, 0.0  ;;  %vm1254_vm13 = vcmp.ge.f32.partialorder %v1222_v24, 0.0  ;;  %v1285_v1 = vmul.f32 0.2, %v1221_v48 }
 0x1f0   : > { %v1316_v16 = vsel %vm1252_vm11, %v1220_v50, %v1284_v18  ;;  %1353 = vst.msk [vmem:[#allocation2 + $0x50] sm:$0xff] %vm635_vm0, %v1315_v51  ;;  %v1286_v41 = vmul.f32 0.2, %v1222_v24  ;;  %v1223_v14 = vadd.f32 %v7431_v45, %v1183_v40  ;;  %v1224_v20 = vadd.f32 %v7431_v45, %v1184_v31 }
 0x1f1   : > { %v7460_v59 = vmul.f32 %v7354_v30, %v7341_v19  ;;  %1354 = vst.msk [vmem:[#allocation2 + $0x58] sm:$0xff] %vm635_vm0, %v1316_v16  ;;  %v1317_v53 = vsel %vm1253_vm12, %v1221_v48, %v1285_v1  ;;  %v1225_v35 = vadd.f32 %v7431_v45, %v1185_v12  ;;  %v1226_v2 = vadd.f32 %v7431_v45, %v1186_v55  ;;  %v7475_v12 = vld [vmem:[#allocation7 + $0x10] sm:$0xff]  ;;  %v7477_v55 = vld [vmem:[#allocation7 + $0x18] sm:$0xff]  ;;  %v7489_v1 = vld [vmem:[#allocation7 + $0x20] sm:$0xff] }
 0x1f2   : > { %v1652_v58 = vld [vmem:[#allocation2 + $0x28] sm:$0xff]  ;;  %v1653_v21 = vld [vmem:[#allocation2 + $0x30] sm:$0xff]  ;;  %v1318_v31 = vsel %vm1254_vm13, %v1222_v24, %v1286_v41  ;;  %1355 = vst.msk [vmem:[#allocation2 + $0x60] sm:$0xff] %vm635_vm0, %v1317_v53  ;;  %vm1255_vm14 = vcmp.ge.f32.partialorder %v1223_v14, 0.0  ;;  %vm1256_vm15 = vcmp.ge.f32.partialorder %v1224_v20, 0.0  ;;  %v7473_v19 = vadd.f32 %v7431_v45, %v7429_v52  ;;  %v7491_v16 = vld [vmem:[#allocation7 + $0x28] sm:$0xff] }
 0x1f3   : > { %v1706_v40 = vld [vmem:[#allocation2 + $0x29] sm:$0xff]  ;;  %v7479_v56 = vpack.c.bf16 %v1653_v21, %v1652_v58  ;;  %v1650_v50 = vld [vmem:[#allocation2 + $0x18] sm:$0xff]  ;;  %v1651_v8 = vld [vmem:[#allocation2 + $0x20] sm:$0xff]  ;;  %1356 = vst.msk [vmem:[#allocation2 + $0x68] sm:$0xff] %vm635_vm0, %v1318_v31  ;;  %v1287_v24 = vmul.f32 0.2, %v1223_v14  ;;  %v7487_v51 = vadd.f32 %v7431_v45, %v7376_v4  ;;  %v7500_v31 = vmul.f32 %v7354_v30, %v7344_v32  ;;  %v7502_v4 = vpop.permute.xlu1 %1551 }
 0x1f4   : > { %v1922_v48 = vmul.f32 %v6972_v0, %v1706_v40  ;;  %v1288_v49 = vmul.f32 0.2, %v1224_v20  ;;  %v7483_v62 = vpack.c.bf16 %v1651_v8, %v1650_v50  ;;  %v1707_v18 = vld [vmem:[#allocation2 + $0x31] sm:$0xff]  ;;  %vm1257_vm3 = vcmp.ge.f32.partialorder %v1225_v35, 0.0  ;;  %9991 = vst [vmem:[#allocation100_spill] sm:$0xff] %v7502_v4 }
 0x1f5   : > { %v1289_v52 = vmul.f32 0.2, %v1225_v35  ;;  %2184 = vrot.lane.b32.xlu0 %v7479_v56, %s6237_s17  ;;  %v1923_v41 = vmul.f32 %v7171_v5, %v1707_v18  ;;  %v1654_v53 = vld [vmem:[#allocation2 + $0x38] sm:$0xff]  ;;  %v1319_v58 = vsel %vm1255_vm14, %v1223_v14, %v1287_v24  ;;  %v1290_v40 = vmul.f32 0.2, %v1226_v2 }
 0x1f6   : > { %v1320_v21 = vsel %vm1256_vm15, %v1224_v20, %v1288_v49  ;;  %1990 = vrot.lane.b32.xlu1 %v7483_v62, %s6236_s13  ;;  %v1708_v50 = vld [vmem:[#allocation2 + $0x39] sm:$0xff]  ;;  %v1709_v8 = vld [vmem:[#allocation2 + $0x41] sm:$0xff]  ;;  %1357 = vst.msk [vmem:[#allocation2 + $0x70] sm:$0xff] %vm635_vm0, %v1319_v58  ;;  %vm1258_vm4 = vcmp.ge.f32.partialorder %v1226_v2, 0.0  ;;  %v5831_v20 = vpack.c.bf16 %v7467_v46, %v7465_v13  ;;  %vm1259_vm5 = vcmp.ge.f32.partialorder %v7473_v19, 0.0 }
 0x1f7   : > { %v1655_v0 = vld [vmem:[#allocation2 + $0x40] sm:$0xff]  ;;  %1358 = vst.msk [vmem:[#allocation2 + $0x78] sm:$0xff] %vm635_vm0, %v1320_v21  ;;  %v1321_v14 = vsel %vm1257_vm3, %v1225_v35, %v1289_v52  ;;  %v7511_v32 = vpack.c.bf16 %v1923_v41, %v1922_v48  ;;  %v1924_v24 = vmul.f32 %v6997_v61, %v1708_v50  ;;  %v1710_v49 = vld [vmem:[#allocation2 + $0x49] sm:$0xff]  ;;  %v1925_v35 = vmul.f32 %v7210_v44, %v1709_v8  ;;  %v10024_v61 = vld [vmem:[#allocation42_spill] sm:$0xff] }
 0x1f8   : > { %v1656_v18 = vld [vmem:[#allocation2 + $0x48] sm:$0xff]  ;;  %v1657_v5 = vld [vmem:[#allocation2 + $0x50] sm:$0xff]  ;;  %1359 = vst.msk [vmem:[#allocation2 + $0x80] sm:$0xff] %vm635_vm0, %v1321_v14  ;;  %v7520_v52 = vpack.c.bf16 %v1655_v0, %v1654_v53  ;;  %v1926_v46 = vmul.f32 %v7022_v11, %v1710_v49  ;;  %v1229_v48 = vadd.f32 %v7431_v45, %v7379_v60  ;;  %v1322_v14 = vsel %vm1258_vm4, %v1226_v2, %v1290_v40  ;;  %v7542_v40 = vld [vmem:[#allocation7 + $0x30] sm:$0xff] }
 0x1f9   : > { %v1711_v13 = vld [vmem:[#allocation2 + $0x51] sm:$0xff]  ;;  %5727 = vmatprep.mubr.msk.bf16.mxu0 %vm635_vm0, %v7511_v32  ;;  %v1712_v50 = vld [vmem:[#allocation2 + $0x59] sm:$0xff]  ;;  %vm1260_vm6 = vcmp.ge.f32.partialorder %v7487_v51, 0.0  ;;  %v7531_v0 = vpack.c.bf16 %v1925_v35, %v1924_v24  ;;  %v7537_v60 = vpack.c.bf16 %v1657_v5, %v1656_v18  ;;  %1360 = vst.msk [vmem:[#allocation2 + $0x88] sm:$0xff] %vm635_vm0, %v1322_v14  ;;  %v1291_v2 = vmul.f32 0.2, %v7473_v19 }
 0x1fa   : > { %v1927_v41 = vmul.f32 %v7239_v38, %v1711_v13  ;;  %2186 = vrot.lane.b32.xlu0 %v7520_v52, %s6237_s17  ;;  %1992 = vrot.lane.b32.xlu1 %v7479_v56, %s6236_s13  ;;  %v1713_v53 = vld [vmem:[#allocation2 + $0x61] sm:$0xff]  ;;  %v1928_v8 = vmul.f32 %v7055_v6, %v1712_v50  ;;  %v1658_v13 = vld [vmem:[#allocation2 + $0x58] sm:$0xff]  ;;  %v1292_v5 = vmul.f32 0.2, %v7487_v51  ;;  %v1230_v18 = vadd.f32 %v7431_v45, %v7382_v22  ;;  %v7552_v50 = vpop.permute.xlu1 %1870 }
 0x1fb   : > { %v7544_v49 = vld [vmem:[#allocation7 + $0x38] sm:$0xff]  ;;  %v1929_v35 = vmul.f32 %v7268_v9, %v1713_v53  ;;  %v1659_v21 = vld [vmem:[#allocation2 + $0x60] sm:$0xff]  ;;  %9992 = vst [vmem:[#allocation101_spill] sm:$0xff] %v7552_v50  ;;  %5728 = vmatmul.mubr.msk.bf16.vlgmr.msra.gmra.mrb[16].mxu0 %vm635_vm0, %v7531_v0  ;;  %vm1261_vm7 = vcmp.ge.f32.partialorder %v1229_v48, 0.0  ;;  %v1231_v53 = vadd.f32 %v7431_v45, %v7386_v26 }
 0x1fc   : > { %v7546_v24 = vpack.c.bf16 %v1927_v41, %v1926_v46  ;;  %v1660_v14 = vld [vmem:[#allocation2 + $0x68] sm:$0xff]  ;;  %v1323_v46 = vsel %vm1259_vm5, %v7473_v19, %v1291_v2  ;;  %v1293_v41 = vmul.f32 0.2, %v1229_v48  ;;  %v1324_v6 = vsel %vm1260_vm6, %v7487_v51, %v1292_v5  ;;  %5832 = vmatpush3.bf16.msra.mxu0 %v5831_v20  ;;  %v10025_v11 = vld [vmem:[#allocation23_spill] sm:$0xff] }
 0x1fd   : > { %v1714_v58 = vld [vmem:[#allocation2 + $0x69] sm:$0xff]  ;;  %1361 = vst.msk [vmem:[#allocation2 + $0x90] sm:$0xff] %vm635_vm0, %v1323_v46  ;;  %vm1262_vm8 = vcmp.ge.f32.partialorder %v1230_v18, 0.0  ;;  %v1294_v44 = vmul.f32 0.2, %v1230_v18  ;;  %v7573_v26 = vpack.c.bf16 %v1659_v21, %v1658_v13  ;;  %1362 = vst.msk [vmem:[#allocation2 + $0x98] sm:$0xff] %vm635_vm0, %v1324_v6  ;;  %v7578_v5 = vpack.c.bf16 %v1929_v35, %v1928_v8  ;;  %5833 = vmatprep.subr.bf16.mxu0 %v9948_v27 }
 0x1fe   : > { %5731 = vmatprep.mubr.msk.bf16.mxu0 %vm635_vm0, %v7546_v24  ;;  %v1715_v22 = vld [vmem:[#allocation2 + $0x71] sm:$0xff]  ;;  %2188 = vrot.lane.b32.xlu0 %v7537_v60, %s6237_s17  ;;  %v1930_v2 = vmul.f32 %v7094_v36, %v1714_v58  ;;  %v1325_v20 = vsel %vm1261_vm7, %v1229_v48, %v1293_v41  ;;  %vm1263_vm9 = vcmp.ge.f32.partialorder %v1231_v53, 0.0  ;;  %v1232_v58 = vadd.f32 %v7431_v45, %v7389_v33 }
 0x1ff   : > { %v1661_v9 = vld [vmem:[#allocation2 + $0x70] sm:$0xff]  ;;  %1994 = vrot.lane.b32.xlu1 %v7520_v52, %s6236_s13  ;;  %v1931_v51 = vmul.f32 %v7285_v3, %v1715_v22  ;;  %v1326_v46 = vsel %vm1262_vm8, %v1230_v18, %v1294_v44  ;;  %1363 = vst.msk [vmem:[#allocation2 + $0xa0] sm:$0xff] %vm635_vm0, %v1325_v20  ;;  %v1295_v21 = vmul.f32 0.2, %v1231_v53  ;;  %v1233_v6 = vadd.f32 %v7431_v45, %v7392_v43  ;;  %v1716_v48 = vld [vmem:[#allocation2 + $0x79] sm:$0xff]  ;;  %v7601_v18 = vpop.permute.xlu1 %1561 }
 0x200   : > { %v7582_v19 = vpack.c.bf16 %v1661_v9, %v1660_v14  ;;  %1364 = vst.msk [vmem:[#allocation2 + $0xa8] sm:$0xff] %vm635_vm0, %v1326_v46  ;;  %v1717_v44 = vld [vmem:[#allocation2 + $0x81] sm:$0xff]  ;;  %v1234_v35 = vadd.f32 %v7431_v45, %v7395_v54  ;;  %v1235_v9 = vadd.f32 %v7431_v45, %v7398_v15  ;;  %v1236_v13 = vadd.f32 %v7431_v45, %v7401_v23 }
 0x201   : > { %v7590_v8 = vpack.c.bf16 %v1931_v51, %v1930_v2  ;;  %v9993_v33 = vpack.c.bf16 %v7477_v55, %v7475_v12  ;;  %9994 = vst [vmem:[#allocation102_spill] sm:$0xff] %v7601_v18  ;;  %vm1264_vm10 = vcmp.ge.f32.partialorder %v1232_v58, 0.0  ;;  %v1296_v43 = vmul.f32 0.2, %v1232_v58  ;;  %v1663_v22 = vld [vmem:[#allocation2 + $0x80] sm:$0xff] }
 0x202   : > { %2190 = vrot.lane.b32.xlu0 %v7573_v26, %s6237_s17  ;;  %v1327_v54 = vsel %vm1263_vm9, %v1231_v53, %v1295_v21  ;;  %v1237_v15 = vadd.f32 %v7431_v45, %v7404_v34  ;;  %vm1265_vm11 = vcmp.ge.f32.partialorder %v1233_v6, 0.0  ;;  %vm1266_vm12 = vcmp.ge.f32.partialorder %v1234_v35, 0.0  ;;  %v1662_v34 = vld [vmem:[#allocation2 + $0x78] sm:$0xff] }
 0x203   : > { %5835 = vmatpush3.bf16.msra.mxu0 %v9993_v33  ;;  %1996 = vrot.lane.b32.xlu1 %v7537_v60, %s6236_s13  ;;  %1365 = vst.msk [vmem:[#allocation2 + $0xb0] sm:$0xff] %vm635_vm0, %v1327_v54  ;;  %v1297_v23 = vmul.f32 0.2, %v1233_v6  ;;  %v1298_v12 = vmul.f32 0.2, %v1234_v35  ;;  %v1932_v55 = vmul.f32 %v7145_v63, %v1716_v48  ;;  %v1933_v14 = vmul.f32 %v7294_v42, %v1717_v44  ;;  %v1664_v44 = vld [vmem:[#allocation2 + $0x88] sm:$0xff] }
 0x204   : > { %5836 = vmatprep.subr.bf16.mxu0 %v9948_v27  ;;  %5732 = vmatmul.mubr.msk.bf16.gmra.mrb[20].mxu0 %vm635_vm0, %v7578_v5  ;;  %v1718_v41 = vld [vmem:[#allocation2 + $0x89] sm:$0xff]  ;;  %v1328_v53 = vsel %vm1264_vm10, %v1232_v58, %v1296_v43  ;;  %vm1267_vm13 = vcmp.ge.f32.partialorder %v1235_v9, 0.0  ;;  %v1719_v2 = vld [vmem:[#allocation2 + $0x91] sm:$0xff]  ;;  %vm1268_vm14 = vcmp.ge.f32.partialorder %v1236_v13, 0.0  ;;  %v1299_v21 = vmul.f32 0.2, %v1235_v9 }
 0x205   : > { %5735 = vmatprep.mubr.msk.bf16.mxu0 %vm635_vm0, %v7590_v8  ;;  %v1934_v51 = vmul.f32 %v7194_v17, %v1718_v41  ;;  %1366 = vst.msk [vmem:[#allocation2 + $0xb8] sm:$0xff] %vm635_vm0, %v1328_v53  ;;  %v1329_v20 = vsel %vm1265_vm11, %v1233_v6, %v1297_v23  ;;  %v1330_v46 = vsel %vm1266_vm12, %v1234_v35, %v1298_v12  ;;  %v1300_v48 = vmul.f32 0.2, %v1236_v13  ;;  %v1665_v35 = vld [vmem:[#allocation2 + $0x90] sm:$0xff]  ;;  %v7644_v53 = vpop.permute.xlu1 %1880  ;;  %v6013_v63 = vld [vmem:[#allocation4 + $0x78] sm:$0xff]  }
 0x206   : > { %2192 = vrot.lane.b32.xlu0 %v7582_v19, %s6237_s17  ;;  %v1935_v58 = vmul.f32 %v7302_v29, %v1719_v2  ;;  %1367 = vst.msk [vmem:[#allocation2 + $0xc0] sm:$0xff] %vm635_vm0, %v1329_v20  ;;  %1368 = vst.msk [vmem:[#allocation2 + $0xc8] sm:$0xff] %vm635_vm0, %v1330_v46  ;;  %v1238_v6 = vadd.f32 %v7431_v45, %v7407_v25  ;;  %vm1269_vm15 = vcmp.ge.f32.partialorder %v1237_v15, 0.0  ;;  %v1301_v33 = vmul.f32 0.2, %v1237_v15  ;;  %v6014_v17 = vld [vmem:[#allocation4 + $0x38] sm:$0xff]  }
 0x207   : > { %1998 = vrot.lane.b32.xlu1 %v7573_v26, %s6236_s13  ;;  %v1239_v43 = vadd.f32 %v7431_v45, %v7460_v59  ;;  %v1240_v54 = vadd.f32 %v7431_v45, %v7500_v31  ;;  %v9995_v23 = vpack.c.bf16 %v7491_v16, %v7489_v1  ;;  %v1201_v12 = vmul.f32 %v7354_v30, %v7347_v10 }
 0x208   : > { %v1202_v25 = vmul.f32 %v7354_v30, %v7349_v37  ;;  %v1203_v41 = vmul.f32 %v7354_v30, %v7351_v57  ;;  %9996 = vst [vmem:[#allocation103_spill] sm:$0xff] %v7644_v53  ;;  %v7646_v2 = vpack.c.bf16 %v1663_v22, %v1662_v34  ;;  %v1331_v59 = vsel %vm1267_vm13, %v1235_v9, %v1299_v21  ;;  %v1720_v37 = vld [vmem:[#allocation2 + $0x99] sm:$0xff]  ;;  %v1721_v9 = vld [vmem:[#allocation2 + $0xa1] sm:$0xff] }
 0x209   : > { %5838 = vmatpush3.bf16.msra.mxu0 %v9995_v23  ;;  %v1332_v1 = vsel %vm1268_vm14, %v1236_v13, %v1300_v48  ;;  %vm1270_vm3 = vcmp.ge.f32.partialorder %v1238_v6, 0.0  ;;  %v1302_v16 = vmul.f32 0.2, %v1238_v6  ;;  %v7651_v31 = vpack.c.bf16 %v1933_v14, %v1932_v55  ;;  %v1666_v57 = vld [vmem:[#allocation2 + $0x98] sm:$0xff]  ;;  %1369 = vst.msk [vmem:[#allocation2 + $0xd0] sm:$0xff] %vm635_vm0, %v1331_v59  ;;  %v1667_v13 = vld [vmem:[#allocation2 + $0xa0] sm:$0xff] }
 0x20a   : > { %5839 = vmatprep.subr.bf16.mxu0 %v9948_v27  ;;  %2194 = vrot.lane.b32.xlu0 %v7646_v2, %s6237_s17  ;;  %v7657_v10 = vpack.c.bf16 %v1665_v35, %v1664_v44  ;;  %1370 = vst.msk [vmem:[#allocation2 + $0xd8] sm:$0xff] %vm635_vm0, %v1332_v1  ;;  %v1333_v27 = vsel %vm1269_vm15, %v1237_v15, %v1301_v33  ;;  %vm1271_vm4 = vcmp.ge.f32.partialorder %v1239_v43, 0.0  ;;  %vm1272_vm5 = vcmp.ge.f32.partialorder %v1240_v54, 0.0  ;;  %v5999_v22 = vld [vmem:[#allocation4 + $0x40] sm:$0xff]   ;;  %v1722_v20 = vld [vmem:[#allocation2 + $0xa9] sm:$0xff]  ;;  %v9999_v48 = vld [vmem:[#allocation66_spill] sm:$0xff] }
 0x20b   : > { %2000 = vrot.lane.b32.xlu1 %v7582_v19, %s6236_s13  ;;  %v7662_v30 = vpack.c.bf16 %v1935_v58, %v1934_v51  ;;  %v1334_v55 = vsel %vm1270_vm3, %v1238_v6, %v1302_v16  ;;  %1371 = vst.msk [vmem:[#allocation2 + $0xe0] sm:$0xff] %vm635_vm0, %v1333_v27  ;;  %v1303_v14 = vmul.f32 0.2, %v1239_v43  ;;  %v9997_v34 = vpack.c.bf16 %v7544_v49, %v7542_v40  ;;  %v7677_v49 = vpop.permute.xlu1 %1571  ;;  %v10000_v33 = vld [vmem:[#allocation70_spill] sm:$0xff]  ;;  %v1668_v16 = vld [vmem:[#allocation2 + $0xa8] sm:$0xff] }
 0x20c   : > { %5736 = vmatmul.mubr.msk.bf16.gmra.mrb[24].mxu0 %vm635_vm0, %v7651_v31  ;;  %v1723_v15 = vld [vmem:[#allocation2 + $0xb1] sm:$0xff]  ;;  %1372 = vst.msk [vmem:[#allocation2 + $0xe8] sm:$0xff] %vm635_vm0, %v1334_v55  ;;  %v1304_v51 = vmul.f32 0.2, %v1240_v54  ;;  %v1241_v46 = vadd.f32 %v7431_v45, %v1201_v12  ;;  %v1242_v58 = vadd.f32 %v7431_v45, %v1202_v25  ;;  %v1243_v21 = vadd.f32 %v7431_v45, %v1203_v41  ;;  %v6000_v25 = vld [vmem:[#allocation4] sm:$0xff]   ;;  %v6001_v41 = vld [vmem:[#allocation4 + $0x48] sm:$0xff]  }
 0x20d   : > { %5841 = vmatpush3.bf16.msra.mxu0 %v9997_v34  ;;  %5739 = vmatprep.mubr.msk.bf16.mxu0 %vm635_vm0, %v7662_v30  ;;  %v1335_v40 = vsel %vm1271_vm4, %v1239_v43, %v1303_v14  ;;  %9998 = vst [vmem:[#allocation104_spill] sm:$0xff] %v7677_v49  ;;  %v1936_v6 = vmul.f32 %v9999_v48, %v1720_v37  ;;  %v1669_v37 = vld [vmem:[#allocation2 + $0xb0] sm:$0xff] }
 0x20e   : > { %2196 = vrot.lane.b32.xlu0 %v7657_v10, %s6237_s17  ;;  %v1937_v44 = vmul.f32 %v7314_v47, %v1721_v9  ;;  %v7685_v35 = vpack.c.bf16 %v1667_v13, %v1666_v57  ;;  %1373 = vst.msk [vmem:[#allocation2 + $0xf0] sm:$0xff] %vm635_vm0, %v1335_v40  ;;  %vm1273_vm6 = vcmp.ge.f32.partialorder %v1241_v46, 0.0  ;;  %v1938_v45 = vmul.f32 %v7335_v28, %v1722_v20  ;;  %v1724_v9 = vld [vmem:[#allocation2 + $0xb9] sm:$0xff]  ;;  %v1725_v13 = vld [vmem:[#allocation2 + $0xc1] sm:$0xff]  ;;  %v10002_v40 = vld [vmem:[#allocation97_spill] sm:$0xff] }
 0x20f   : > { %2002 = vrot.lane.b32.xlu1 %v7646_v2, %s6236_s13  ;;  %v1939_v43 = vmul.f32 %v10000_v33, %v1723_v15  ;;  %v1336_v23 = vsel %vm1272_vm5, %v1240_v54, %v1304_v51  ;;  %v1305_v12 = vmul.f32 0.2, %v1241_v46  ;;  %5285 = vmatprep.subr.bf16.mxu1 %v5999_v22  ;;  %vm1274_vm7 = vcmp.ge.f32.partialorder %v1242_v58, 0.0  ;;  %v7701_v34 = vpop.permute.xlu1 %1890  ;;  %v6002_v51 = vld [vmem:[#allocation4 + $0x8] sm:$0xff]   ;;  %v6012_v33 = vld [vmem:[#allocation4 + $0x30] sm:$0xff]  }
 0x210   : > { %1374 = vst.msk [vmem:[#allocation2 + $0xf8] sm:$0xff] %vm635_vm0, %v1336_v23  ;;  %v1306_v59 = vmul.f32 0.2, %v1242_v58  ;;  %vm1275_vm8 = vcmp.ge.f32.partialorder %v1243_v21, 0.0  ;;  %v1307_v1 = vmul.f32 0.2, %v1243_v21  ;;  %5286 = vmatpush3.bf16.msra.mxu1 %v6000_v25  ;;  %v7692_v27 = vpack.c.bf16 %v1937_v44, %v1936_v6 }
 0x211   : > { %v1337_v57 = vsel %vm1273_vm6, %v1241_v46, %v1305_v12  ;;  %v7699_v54 = vpack.c.bf16 %v1939_v43, %v1938_v45  ;;  %5287 = vmatprep.subr.bf16.mxu1 %v6001_v41  ;;  %10001 = vst [vmem:[#allocation105_spill] sm:$0xff] %v7701_v34  ;;  %v7705_v22 = vpack.c.bf16 %v1669_v37, %v1668_v16  ;;  %v1726_v20 = vld [vmem:[#allocation2 + $0xc9] sm:$0xff]  ;;  %v1727_v15 = vld [vmem:[#allocation2 + $0xd1] sm:$0xff] }
 0x212   : > { %2198 = vrot.lane.b32.xlu0 %v7685_v35, %s6237_s17  ;;  %1375 = vst.msk [vmem:[#allocation2 + $0x100] sm:$0xff] %vm635_vm0, %v1337_v57  ;;  %v1338_v55 = vsel %vm1274_vm7, %v1242_v58, %v1306_v59  ;;  %v1339_v14 = vsel %vm1275_vm8, %v1243_v21, %v1307_v1  ;;  %v1670_v46 = vld [vmem:[#allocation2 + $0xb8] sm:$0xff]  ;;  %v1671_v58 = vld [vmem:[#allocation2 + $0xc0] sm:$0xff]  ;;  %v6003_v21 = vld [vmem:[#allocation4 + $0x50] sm:$0xff]   ;;  %v1940_v6 = vmul.f32 %v10002_v40, %v1724_v9 }
 0x213   : > { %2004 = vrot.lane.b32.xlu1 %v7657_v10, %s6236_s13  ;;  %1376 = vst.msk [vmem:[#allocation2 + $0x108] sm:$0xff] %vm635_vm0, %v1338_v55  ;;  %1377 = vst.msk [vmem:[#allocation2 + $0x110] sm:$0xff] %vm635_vm0, %v1339_v14  ;;  %v10003_v44 = vld [vmem:[#allocation74_spill] sm:$0xff]  ;;  %v1942_v43 = vmul.f32 %v7453_v39, %v1726_v20  ;;  %v6004_v25 = vld [vmem:[#allocation4 + $0x10] sm:$0xff]   ;;  %v7719_v41 = vpack.c.bf16 %v1671_v58, %v1670_v46  ;;  %v7721_v16 = vpop.permute.xlu1 %1581 }
 0x214   : > { %5740 = vmatmul.mubr.msk.bf16.gmra.mrb[28].mxu0 %vm635_vm0, %v7692_v27  ;;  %v1941_v45 = vmul.f32 %v10003_v44, %v1725_v13  ;;  %v10004_v23 = vld [vmem:[#allocation78_spill] sm:$0xff]  ;;  %5288 = vmatpush3.bf16.msra.mxu1 %v6002_v51  ;;  %v1672_v59 = vld [vmem:[#allocation2 + $0xc8] sm:$0xff]  ;;  %v1673_v1 = vld [vmem:[#allocation2 + $0xd0] sm:$0xff]  ;;  %10005 = vst [vmem:[#allocation106_spill] sm:$0xff] %v7721_v16 }
 0x215   : > { %5743 = vmatprep.mubr.msk.bf16.mxu0 %vm635_vm0, %v7699_v54  ;;  %v1943_v12 = vmul.f32 %v10004_v23, %v1727_v15  ;;  %5289 = vmatprep.subr.bf16.mxu1 %v6003_v21  ;;  %v1728_v9 = vld [vmem:[#allocation2 + $0xd9] sm:$0xff]  ;;  %v1729_v13 = vld [vmem:[#allocation2 + $0xe1] sm:$0xff]  ;;  %v7733_v14 = vpack.c.bf16 %v1673_v1, %v1672_v59  ;;  %v1730_v20 = vld [vmem:[#allocation2 + $0xe9] sm:$0xff] }
 0x216   : > { %2200 = vrot.lane.b32.xlu0 %v7705_v22, %s6237_s17  ;;  %v7723_v37 = vpack.c.bf16 %v1941_v45, %v1940_v6  ;;  %v6005_v55 = vld [vmem:[#allocation4 + $0x58] sm:$0xff]   ;;  %v1675_v58 = vld [vmem:[#allocation2 + $0xe0] sm:$0xff]  ;;  %v1944_v6 = vmul.f32 %v7552_v50, %v1728_v9  ;;  %v1676_v47 = vld [vmem:[#allocation2 + $0xe8] sm:$0xff] }
 0x217   : > { %2006 = vrot.lane.b32.xlu1 %v7685_v35, %s6236_s13  ;;  %v7729_v57 = vpack.c.bf16 %v1943_v12, %v1942_v43  ;;  %10006 = vst [vmem:[#allocation107_spill] sm:$0xff] %v7733_v14  ;;  %v1731_v15 = vld [vmem:[#allocation2 + $0xf1] sm:$0xff]  ;;  %v6007_v21 = vld [vmem:[#allocation4 + $0x60] sm:$0xff]   ;;  %v1946_v12 = vmul.f32 %v7644_v53, %v1730_v20  ;;  %v7745_v1 = vpop.permute.xlu1 %1900  ;;  %v6009_v23 = vld [vmem:[#allocation4 + $0x68] sm:$0xff]  }
 0x218   : > { %5290 = vmatpush3.bf16.msra.mxu1 %v6004_v25  ;;  %v6006_v51 = vld [vmem:[#allocation4 + $0x18] sm:$0xff]   ;;  %10009 = vst [vmem:[#allocation108_spill] sm:$0xff] %v7745_v1  ;;  %v6008_v40 = vld [vmem:[#allocation4 + $0x20] sm:$0xff]   ;;  %v1677_v48 = vld [vmem:[#allocation2 + $0xf0] sm:$0xff] }
 0x219   : > { %v1674_v46 = vld [vmem:[#allocation2 + $0xd8] sm:$0xff]  ;;  %5291 = vmatprep.subr.bf16.mxu1 %v6005_v55  ;;  %v7759_v20 = vpack.c.bf16 %v1677_v48, %v1676_v47 }
 0x21a   : > { %2202 = vrot.lane.b32.xlu0 %v7719_v41, %s6237_s17  ;;  %v10007_v45 = vld [vmem:[#allocation82_spill] sm:$0xff]  ;;  %v7747_v44 = vpack.c.bf16 %v1675_v58, %v1674_v46  ;;  %v1733_v55 = vld [vmem:[#allocation2 + $0x101] sm:$0xff]  ;;  %v1681_v42 = vld [vmem:[#allocation2 + $0x110] sm:$0xff] }
 0x21b   : > { %2008 = vrot.lane.b32.xlu1 %v7705_v22, %s6236_s13  ;;  %v1945_v43 = vmul.f32 %v10007_v45, %v1729_v13  ;;  %v10008_v25 = vld [vmem:[#allocation86_spill] sm:$0xff]  ;;  %10011 = vst [vmem:[#allocation110_spill] sm:$0xff] %v7759_v20  ;;  %v6010_v46 = vld [vmem:[#allocation4 + $0x28] sm:$0xff]  }
 0x21c   : > { %5744 = vmatmul.mubr.msk.bf16.gmra.mrb[32].mxu0 %vm635_vm0, %v7723_v37  ;;  %v1947_v59 = vmul.f32 %v10008_v25, %v1731_v15  ;;  %10010 = vst [vmem:[#allocation109_spill] sm:$0xff] %v7747_v44  ;;  %5292 = vmatpush3.bf16.msra.mxu1 %v6006_v51  ;;  %v1732_v13 = vld [vmem:[#allocation2 + $0xf9] sm:$0xff]  ;;  %v1734_v15 = vld [vmem:[#allocation2 + $0x109] sm:$0xff]  ;;  %v1735_v51 = vld [vmem:[#allocation2 + $0x111] sm:$0xff] }
 0x21d   : > { %5747 = vmatprep.mubr.msk.bf16.mxu0 %vm635_vm0, %v7729_v57  ;;  %5293 = vmatprep.subr.bf16.mxu1 %v6007_v21  ;;  %v7749_v39 = vpack.c.bf16 %v1945_v43, %v1944_v6  ;;  %v1678_v58 = vld [vmem:[#allocation2 + $0xf8] sm:$0xff]  ;;  %v1679_v21 = vld [vmem:[#allocation2 + $0x100] sm:$0xff]  ;;  %v6011_v6 = vld [vmem:[#allocation4 + $0x70] sm:$0xff]   ;;  %v7763_v43 = vpop.permute.xlu1 %1591  ;;  %v1948_v47 = vmul.f32 %v7701_v34, %v1732_v13 }
 0x21e   : > { %2204 = vrot.lane.b32.xlu0 %v7733_v14, %s6237_s17  ;;  %v7755_v9 = vpack.c.bf16 %v1947_v59, %v1946_v12  ;;  %10012 = vst [vmem:[#allocation111_spill] sm:$0xff] %v7763_v43  ;;  %v10013_v48 = vld [vmem:[#allocation90_spill] sm:$0xff]  ;;  %v1950_v12 = vmul.f32 %v7745_v1, %v1734_v15  ;;  %v7773_v25 = vpack.c.bf16 %v1679_v21, %v1678_v58  ;;  %v1680_v28 = vld [vmem:[#allocation2 + $0x108] sm:$0xff]  ;;  %v7781_v15 = vpop.permute.xlu0 %1915 }
 0x21f   : > { %2010 = vrot.lane.b32.xlu1 %v7719_v41, %s6236_s13  ;;  %v10014_v59 = vld [vmem:[#allocation94_spill] sm:$0xff]  ;;  %v1702_v13 = vld [vmem:[#allocation2 + $0x9] sm:$0xff]  ;;  %10016 = vst [vmem:[#allocation113_spill] sm:$0xff] %v7781_v15 }
 0x220   : > { %5294 = vmatpush3.bf16.msra.mxu1 %v6008_v40  ;;  %v1949_v40 = vmul.f32 %v10013_v48, %v1733_v55  ;;  %v1951_v45 = vmul.f32 %v10014_v59, %v1735_v51  ;;  %v1704_v50 = vld [vmem:[#allocation2 + $0x19] sm:$0xff]  ;;  %10015 = vst [vmem:[#allocation112_spill] sm:$0xff] %v7773_v25  ;;  %v1703_v53 = vld [vmem:[#allocation2 + $0x11] sm:$0xff]  ;;  %v1737_v55 = vld [vmem:[#allocation2 + $0x121] sm:$0xff] }
 0x221   : > { %5295 = vmatprep.subr.bf16.mxu1 %v6009_v23  ;;  %v1705_v23 = vld [vmem:[#allocation2 + $0x21] sm:$0xff]  ;;  %v7787_v1 = vpop.permute.xlu1 %1910  ;;  %v1953_v36 = vmul.f32 %v7781_v15, %v1737_v55  ;;  %v10038_v15 = vld [vmem:[#allocation58_spill] sm:$0xff] }
 0x222   : > { %2206 = vrot.lane.b32.xlu0 %v7747_v44, %s6237_s17  ;;  %v7775_v29 = vpack.c.bf16 %v1949_v40, %v1948_v47  ;;  %v7783_v51 = vpack.c.bf16 %v1951_v45, %v1950_v12  ;;  %v10018_v21 = vld [vmem:[#allocation32_spill] sm:$0xff]  ;;  %10019 = vst [vmem:[#allocation114_spill] sm:$0xff] %v7787_v1  ;;  %v7791_v47 = vpack.c.bf16 %v1681_v42, %v1680_v28  ;;  %v1381_v12 = vld [vmem:[#allocation2 + $0x1f] sm:$0xff] }
 0x223   : > { %2012 = vrot.lane.b32.xlu1 %v7733_v14, %s6236_s13  ;;  %v1921_v59 = vmul.f32 %v10018_v21, %v1705_v23  ;;  %v10021_v40 = vld [vmem:[#allocation48_spill] sm:$0xff]  ;;  %v10022_v23 = vld [vmem:[#allocation22_spill] sm:$0xff] }
 0x224   : > { %5748 = vmatmul.mubr.msk.bf16.gmra.mrb[36].mxu0 %vm635_vm0, %v7749_v39  ;;  %5296 = vmatpush3.bf16.msra.mxu1 %v6010_v46  ;;  %v10017_v46 = vld [vmem:[#allocation21_spill] sm:$0xff]  ;;  %10020 = vst [vmem:[#allocation115_spill] sm:$0xff] %v7791_v47  ;;  %v1919_v48 = vmul.f32 %v10021_v40, %v1703_v53  ;;  %v1382_v34 = vld [vmem:[#allocation2 + $0x27] sm:$0xff]  ;;  %v1918_v3 = vmul.f32 %v10022_v23, %v1702_v13 }
 0x225   : > { %5751 = vmatprep.mubr.msk.bf16.mxu0 %vm635_vm0, %v7755_v9  ;;  %5297 = vmatprep.subr.bf16.mxu1 %v6011_v6  ;;  %v1920_v58 = vmul.f32 %v10017_v46, %v1704_v50  ;;  %v1736_v6 = vld [vmem:[#allocation2 + $0x119] sm:$0xff]  ;;  %v1383_v45 = vld [vmem:[#allocation2 + $0x2f] sm:$0xff] }
 0x226   : > { %2208 = vrot.lane.b32.xlu0 %v7759_v20, %s6237_s17  ;;  %v1380_v50 = vld [vmem:[#allocation2 + $0x17] sm:$0xff]  ;;  %v1952_v28 = vmul.f32 %v7787_v1, %v1736_v6  ;;  %v10023_v53 = vld [vmem:[#allocation36_spill] sm:$0xff]  ;;  %v1954_v40 = vpack.c.bf16 %v1919_v48, %v1918_v3  ;;  %v1599_v38 = vmul.f32 %v10024_v61, %v1383_v45  ;;  %v10027_v3 = vmov 0.0   ;;  %v10029_v6 = vld [vmem:[#allocation59_spill] sm:$0xff] }
 0x227   : > { %2014 = vrot.lane.b32.xlu1 %v7747_v44, %s6236_s13  ;;  %v1955_v42 = vpack.c.bf16 %v1921_v59, %v1920_v58  ;;  %v10026_v21 = vld [vmem:[#allocation52_spill] sm:$0xff]  ;;  %v1384_v48 = vld [vmem:[#allocation2 + $0x37] sm:$0xff]  ;;  %v1385_v58 = vld [vmem:[#allocation2 + $0x3f] sm:$0xff] }
 0x228   : > { %5298 = vmatpush3.bf16.msra.mxu1 %v6012_v33  ;;  %v1598_v33 = vmul.f32 %v10023_v53, %v1382_v34  ;;  %v1597_v13 = vmul.f32 %v10026_v21, %v1381_v12  ;;  %v1971_v55 = vpack.c.bf16 %v1953_v36, %v1952_v28  ;;  %v10028_v36 = vld [vmem:[#allocation25_spill] sm:$0xff]  ;;  %v10030_v28 = vld [vmem:[#allocation27_spill] sm:$0xff] }
 0x229   : > { %5299 = vmatprep.subr.bf16.mxu1 %v6013_v63  ;;  %v1596_v63 = vmul.f32 %v10025_v11, %v1380_v50  ;;  %v1386_v50 = vld [vmem:[#allocation2 + $0x47] sm:$0xff]  ;;  %v1387_v12 = vld [vmem:[#allocation2 + $0x4f] sm:$0xff]  ;;  %v1404_v21 = vld [vmem:[#allocation2 + $0xd7] sm:$0xff] }
 0x22a   : > { %2210 = vrot.lane.b32.xlu0 %v7773_v25, %s6237_s17  ;;  %v7810_v59 = vpack.c.bf16 %v1599_v38, %v1598_v33  ;;  %v6068_v38 = vld [vmem:[%s6679_s30] sm:$0x1]  ;;  %v1602_v33 = vmul.f32 %v10030_v28, %v1386_v50  ;;  %v1391_v50 = vld [vmem:[#allocation2 + $0x6f] sm:$0xff]  ;;  %s6239_s30 = smov [#allocation10]  }
 0x22b   : > { %2016 = vrot.lane.b32.xlu1 %v7759_v20, %s6236_s13  ;;  %v7812_v34 = vpack.c.bf16 %v1597_v13, %v1596_v63  ;;  %v10031_v63 = vld [vmem:[#allocation63_spill] sm:$0xff]  ;;  %v1403_v61 = vld [vmem:[#allocation2 + $0xcf] sm:$0xff] }
 0x22c   : > { %5752 = vmatmul.mubr.msk.bf16.gmra.mrb[40].mxu0 %vm635_vm0, %v7775_v29  ;;  %5300 = vmatpush3.bf16.msra.mxu1 %v6014_v17  ;;  %v1600_v17 = vmul.f32 %v10028_v36, %v1384_v48  ;;  %v1603_v13 = vmul.f32 %v10031_v63, %v1387_v12  ;;  %v10032_v48 = vld [vmem:[#allocation29_spill] sm:$0xff]  ;;  %v10034_v12 = vld [vmem:[#allocation38_spill] sm:$0xff]  ;;  %v10037_v1 = vld [vmem:[#allocation75_spill] sm:$0xff] }
 0x22d   : > { %5755 = vmatprep.mubr.msk.bf16.mxu0 %vm635_vm0, %v7783_v51  ;;  %v10039_v23 = vld [vmem:[#allocation79_spill] sm:$0xff]  ;;  %v1407_v20 = vld [vmem:[#allocation2 + $0xef] sm:$0xff] }
 0x22e   : > { %2212 = vrot.lane.b32.xlu0 %v7791_v47, %s6237_s17  ;;  %v1401_v63 = vld [vmem:[#allocation2 + $0xbf] sm:$0xff]  ;;  %v1402_v36 = vld [vmem:[#allocation2 + $0xc7] sm:$0xff] }
 0x22f   : > { %2018 = vrot.lane.b32.xlu1 %v7773_v25, %s6236_s13  ;;  %v1405_v11 = vld [vmem:[#allocation2 + $0xdf] sm:$0xff]  ;;  %v1406_v25 = vld [vmem:[#allocation2 + $0xe7] sm:$0xff] }
 0x232   : > { %2117 = vrot.lane.b32.xlu0 %v1955_v42, %s6236_s13 }
 0x233   : > { %2036 = vrot.lane.b32.xlu1 %v1954_v40, %s6238_s15  ;;  %v1601_v40 = vmul.f32 %v10029_v6, %v1385_v58 }
 0x234   : > { %5756 = vmatmul.mubr.msk.bf16.gmra.mrb[44].mxu0 %vm635_vm0, %v1971_v55  ;;  %v1388_v55 = vld [vmem:[#allocation2 + $0x57] sm:$0xff] }
 0x235   : > { %5775 = vmatprep.mubr.msk.f32.mxu0 %vm6235_vm2, %v10027_v3  ;;  %v7827_v45 = vpack.c.bf16 %v1601_v40, %v1600_v17  ;;  %v1389_v3 = vld [vmem:[#allocation2 + $0x5f] sm:$0xff]  ;;  %v1604_v58 = vmul.f32 %v10032_v48, %v1388_v55  ;;  %v1400_v48 = vld [vmem:[#allocation2 + $0xb7] sm:$0xff]  ;;  %vm2296_vm2 = vcmask 785408  }
 0x236   : > { %2150 = vrot.lane.b32.xlu0 %v7810_v59, %s6238_s15  ;;  %v10033_v17 = vld [vmem:[#allocation67_spill] sm:$0xff] }
 0x237   : > { %2084 = vrot.lane.b32.xlu1 %v7812_v34, %s6237_s17  ;;  %v1605_v40 = vmul.f32 %v10033_v17, %v1389_v3  ;;  %v1392_v3 = vld [vmem:[#allocation2 + $0x77] sm:$0xff] }
 0x23a   : > { %2119 = vrot.lane.b32.xlu0 %v7511_v32, %s6236_s13 }
 0x23b   : > { %2038 = vrot.lane.b32.xlu1 %v1955_v42, %s6238_s15  ;;  %v7839_v42 = vpack.c.bf16 %v1603_v13, %v1602_v33  ;;  %v10035_v13 = vld [vmem:[#allocation71_spill] sm:$0xff] }
 0x23c   : > { %5776 = vmatmul.mubr.msk.f32.vlgmr.msra.gmra.mrb[48].mxu0 %vm1093_vm1, %v6068_v38  ;;  %v1390_v38 = vld [vmem:[#allocation2 + $0x67] sm:$0xff]  ;;  %v1607_v55 = vmul.f32 %v10035_v13, %v1391_v50  ;;  %v1399_v13 = vld [vmem:[#allocation2 + $0xaf] sm:$0xff] }
 0x23d   : > { %v1606_v33 = vmul.f32 %v10034_v12, %v1390_v38 }
 0x23e   : > { %2152 = vrot.lane.b32.xlu0 %v7827_v45, %s6238_s15 }
 0x23f   : > { %2086 = vrot.lane.b32.xlu1 %v7810_v59, %s6237_s17 }
 0x242   : > { %2121 = vrot.lane.b32.xlu0 %v7531_v0, %s6236_s13 }
 0x243   : > { %2040 = vrot.lane.b32.xlu1 %v7511_v32, %s6238_s15  ;;  %v7851_v32 = vpack.c.bf16 %v1605_v40, %v1604_v58  ;;  %v1393_v58 = vld [vmem:[#allocation2 + $0x7f] sm:$0xff]  ;;  %v10036_v40 = vld [vmem:[#allocation49_spill] sm:$0xff] }
 0x244   : > { %v1608_v38 = vmul.f32 %v10036_v40, %v1392_v3  ;;  %v1609_v50 = vmul.f32 %v10037_v1, %v1393_v58  ;;  %v1398_v40 = vld [vmem:[#allocation2 + $0xa7] sm:$0xff] }
 0x246   : > { %2154 = vrot.lane.b32.xlu0 %v7839_v42, %s6238_s15 }
 0x247   : > { %2088 = vrot.lane.b32.xlu1 %v7827_v45, %s6237_s17 }
 0x24a   : > { %2123 = vrot.lane.b32.xlu0 %v7546_v24, %s6236_s13 }
 0x24b   : > { %2042 = vrot.lane.b32.xlu1 %v7531_v0, %s6238_s15  ;;  %v7863_v0 = vpack.c.bf16 %v1607_v55, %v1606_v33  ;;  %v1394_v33 = vld [vmem:[#allocation2 + $0x87] sm:$0xff]  ;;  %v1395_v55 = vld [vmem:[#allocation2 + $0x8f] sm:$0xff] }
 0x24c   : > { %v1610_v3 = vmul.f32 %v10038_v15, %v1394_v33  ;;  %v1611_v58 = vmul.f32 %v10039_v23, %v1395_v55  ;;  %v10040_v55 = vld [vmem:[#allocation62_spill] sm:$0xff]  ;;  %v10041_v15 = vld [vmem:[#allocation83_spill] sm:$0xff] }
 0x24e   : > { %2156 = vrot.lane.b32.xlu0 %v7851_v32, %s6238_s15 }
 0x24f   : > { %2090 = vrot.lane.b32.xlu1 %v7839_v42, %s6237_s17 }
 0x252   : > { %2125 = vrot.lane.b32.xlu0 %v7578_v5, %s6236_s13 }
 0x253   : > { %2044 = vrot.lane.b32.xlu1 %v7546_v24, %s6238_s15  ;;  %v7875_v24 = vpack.c.bf16 %v1609_v50, %v1608_v38  ;;  %v1396_v38 = vld [vmem:[#allocation2 + $0x97] sm:$0xff]  ;;  %v1397_v50 = vld [vmem:[#allocation2 + $0x9f] sm:$0xff] }
 0x254   : > { %v1612_v23 = vmul.f32 %v10040_v55, %v1396_v38  ;;  %v1613_v1 = vmul.f32 %v10041_v15, %v1397_v50  ;;  %v10042_v15 = vld [vmem:[#allocation68_spill] sm:$0xff]  ;;  %v10043_v55 = vld [vmem:[#allocation89_spill] sm:$0xff] }
 0x255   : > { %v1615_v12 = vmul.f32 %v10043_v55, %v1399_v13  ;;  %v10044_v55 = vld [vmem:[#allocation72_spill] sm:$0xff] }
 0x256   : > { %2158 = vrot.lane.b32.xlu0 %v7863_v0, %s6238_s15 }
 0x257   : > { %2092 = vrot.lane.b32.xlu1 %v7851_v32, %s6237_s17 }
 0x25a   : > { %2127 = vrot.lane.b32.xlu0 %v7590_v8, %s6236_s13 }
 0x25b   : > { %2046 = vrot.lane.b32.xlu1 %v7578_v5, %s6238_s15  ;;  %v7887_v5 = vpack.c.bf16 %v1611_v58, %v1610_v3  ;;  %v7907_v58 = vpack.c.bf16 %v1613_v1, %v1612_v23 }
 0x25e   : > { %2160 = vrot.lane.b32.xlu0 %v7875_v24, %s6238_s15 }
 0x25f   : > { %2094 = vrot.lane.b32.xlu1 %v7863_v0, %s6237_s17 }
 0x262   : > { %2129 = vrot.lane.b32.xlu0 %v7651_v31, %s6236_s13 }
 0x263   : > { %2048 = vrot.lane.b32.xlu1 %v7590_v8, %s6238_s15 }
 0x266   : > { %2162 = vrot.lane.b32.xlu0 %v7887_v5, %s6238_s15 }
 0x267   : > { %2096 = vrot.lane.b32.xlu1 %v7875_v24, %s6237_s17  ;;  %v7893_v46 = vpop.permute.xlu0 %2184 }
 0x268   : > { %v7895_v33 = vpop.permute.xlu1 %1990 }
 0x26a   : > { %2131 = vrot.lane.b32.xlu0 %v7662_v30, %s6236_s13 }
 0x26b   : > { %2050 = vrot.lane.b32.xlu1 %v7651_v31, %s6238_s15  ;;  %v1614_v31 = vmul.f32 %v10042_v15, %v1398_v40  ;;  %v10045_v15 = vld [vmem:[#allocation95_spill] sm:$0xff] }
 0x26c   : > { %v7903_v8 = vpop.permute.xlu0 %2186  ;;  %v7905_v3 = vpop.permute.xlu1 %1992  ;;  %v1617_v28 = vmul.f32 %v10045_v15, %v1401_v63  ;;  %v10047_v15 = vld [vmem:[#allocation76_spill] sm:$0xff] }
 0x26d   : > { %v7927_v17 = vpack.c.bf16 %v1615_v12, %v1614_v31 }
 0x26e   : > { %2164 = vrot.lane.b32.xlu0 %v7907_v58, %s6238_s15 }
 0x26f   : > { %2098 = vrot.lane.b32.xlu1 %v7887_v5, %s6237_s17 }
 0x270   : > { %v7913_v38 = vpop.permute.xlu0 %2188 }
 0x271   : > { %v7915_v50 = vpop.permute.xlu1 %1994 }
 0x272   : > { %2133 = vrot.lane.b32.xlu0 %v7692_v27, %s6236_s13 }
 0x273   : > { %2052 = vrot.lane.b32.xlu1 %v7662_v30, %s6238_s15  ;;  %v1616_v30 = vmul.f32 %v10044_v55, %v1400_v48  ;;  %v1619_v55 = vmul.f32 %v7441_v7, %v1403_v61  ;;  %v10049_v7 = vld [vmem:[#allocation80_spill] sm:$0xff] }
 0x274   : > { %v7923_v1 = vpop.permute.xlu0 %2190 }
 0x275   : > { %v7925_v23 = vpop.permute.xlu1 %1996  ;;  %v7947_v6 = vpack.c.bf16 %v1617_v28, %v1616_v30 }
 0x276   : > { %2166 = vrot.lane.b32.xlu0 %v7927_v17, %s6238_s15 }
 0x277   : > { %2100 = vrot.lane.b32.xlu1 %v7907_v58, %s6237_s17  ;;  %10046 = vst [vmem:[#allocation116_spill] sm:$0xff] %v7947_v6 }
 0x278   : > { %v7933_v13 = vpop.permute.xlu0 %2192 }
 0x279   : > { %v7935_v40 = vpop.permute.xlu1 %1998 }
 0x27a   : > { %2135 = vrot.lane.b32.xlu0 %v7699_v54, %s6236_s13 }
 0x27b   : > { %2054 = vrot.lane.b32.xlu1 %v7692_v27, %s6238_s15  ;;  %v1618_v27 = vmul.f32 %v10047_v15, %v1402_v36  ;;  %v1621_v15 = vmul.f32 %v7502_v4, %v1405_v11  ;;  %v10053_v4 = vld [vmem:[#allocation84_spill] sm:$0xff] }
 0x27c   : > { %v7943_v12 = vpop.permute.xlu0 %2194 }
 0x27d   : > { %v7945_v31 = vpop.permute.xlu1 %2000  ;;  %v7967_v53 = vpack.c.bf16 %v1619_v55, %v1618_v27 }
 0x27e   : > { %2168 = vrot.lane.b32.xlu0 %v7947_v6, %s6238_s15 }
 0x27f   : > { %2102 = vrot.lane.b32.xlu1 %v7927_v17, %s6237_s17  ;;  %10048 = vst [vmem:[#allocation117_spill] sm:$0xff] %v7967_v53 }
 0x280   : > { %v7953_v63 = vpop.permute.xlu0 %2196 }
 0x281   : > { %v7955_v48 = vpop.permute.xlu1 %2002 }
 0x282   : > { %2137 = vrot.lane.b32.xlu0 %v7723_v37, %s6236_s13 }
 0x283   : > { %2056 = vrot.lane.b32.xlu1 %v7699_v54, %s6238_s15  ;;  %v1620_v54 = vmul.f32 %v10049_v7, %v1404_v21  ;;  %v1623_v7 = vmul.f32 %v7601_v18, %v1407_v20  ;;  %v10059_v18 = vld [vmem:[#allocation88_spill] sm:$0xff] }
 0x284   : > { %v7963_v28 = vpop.permute.xlu0 %2198 }
 0x285   : > { %v7965_v30 = vpop.permute.xlu1 %2004  ;;  %v7987_v47 = vpack.c.bf16 %v1621_v15, %v1620_v54 }
 0x286   : > { %2170 = vrot.lane.b32.xlu0 %v7967_v53, %s6238_s15 }
 0x287   : > { %2104 = vrot.lane.b32.xlu1 %v7947_v6, %s6237_s17  ;;  %10050 = vst [vmem:[#allocation118_spill] sm:$0xff] %v7987_v47  ;;  %v1409_v6 = vld [vmem:[#allocation2 + $0xff] sm:$0xff] }
 0x288   : > { %v7973_v61 = vpop.permute.xlu0 %2200 }
 0x289   : > { %v7975_v36 = vpop.permute.xlu1 %2006 }
 0x28a   : > { %2139 = vrot.lane.b32.xlu0 %v7729_v57, %s6236_s13 }
 0x28b   : > { %2058 = vrot.lane.b32.xlu1 %v7723_v37, %s6238_s15  ;;  %v1622_v37 = vmul.f32 %v10053_v4, %v1406_v25  ;;  %v1625_v4 = vmul.f32 %v7677_v49, %v1409_v6 }
 0x28c   : > { %v7983_v55 = vpop.permute.xlu0 %2202 }
 0x28d   : > { %v7985_v27 = vpop.permute.xlu1 %2008  ;;  %v8007_v44 = vpack.c.bf16 %v1623_v7, %v1622_v37 }
 0x28e   : > { %2172 = vrot.lane.b32.xlu0 %v7987_v47, %s6238_s15 }
 0x28f   : > { %2106 = vrot.lane.b32.xlu1 %v7967_v53, %s6237_s17  ;;  %10056 = vst [vmem:[#allocation123_spill] sm:$0xff] %v8007_v44  ;;  %v1408_v53 = vld [vmem:[#allocation2 + $0xf7] sm:$0xff] }
 0x290   : > { %v7993_v11 = vpop.permute.xlu0 %2204 }
 0x291   : > { %10051 = vst [vmem:[#allocation119_spill] sm:$0xff] %v7993_v11  ;;  %v7995_v21 = vpop.permute.xlu1 %2010  ;;  %v1412_v11 = vld [vmem:[#allocation2 + $0x117] sm:$0xff] }
 0x292   : > { %10052 = vst [vmem:[#allocation120_spill] sm:$0xff] %v7995_v21  ;;  %2141 = vrot.lane.b32.xlu0 %v7749_v39, %s6236_s13 }
 0x293   : > { %2060 = vrot.lane.b32.xlu1 %v7729_v57, %s6238_s15  ;;  %v1624_v57 = vmul.f32 %v10059_v18, %v1408_v53 }
 0x294   : > { %v8003_v15 = vpop.permute.xlu0 %2206 }
 0x295   : > { %10054 = vst [vmem:[#allocation121_spill] sm:$0xff] %v8003_v15  ;;  %v8005_v54 = vpop.permute.xlu1 %2012  ;;  %v1378_v15 = vld [vmem:[#allocation2 + $0x7] sm:$0xff] }
 0x296   : > { %10055 = vst [vmem:[#allocation122_spill] sm:$0xff] %v8005_v54  ;;  %2174 = vrot.lane.b32.xlu0 %v8007_v44, %s6238_s15  ;;  %v8027_v54 = vpack.c.bf16 %v1625_v4, %v1624_v57  ;;  %v10064_v4 = vld [vmem:[#allocation64_spill] sm:$0xff] }
 0x297   : > { %2108 = vrot.lane.b32.xlu1 %v7987_v47, %s6237_s17  ;;  %v1410_v47 = vld [vmem:[#allocation2 + $0x107] sm:$0xff]  ;;  %v1594_v57 = vmul.f32 %v10064_v4, %v1378_v15 }
 0x298   : > { %v8013_v25 = vpop.permute.xlu0 %2208 }
 0x299   : > { %10057 = vst [vmem:[#allocation124_spill] sm:$0xff] %v8013_v25  ;;  %v8015_v20 = vpop.permute.xlu1 %2014  ;;  %v1411_v25 = vld [vmem:[#allocation2 + $0x10f] sm:$0xff] }
 0x29a   : > { %10058 = vst [vmem:[#allocation125_spill] sm:$0xff] %v8015_v20  ;;  %2143 = vrot.lane.b32.xlu0 %v7755_v9, %s6236_s13  ;;  %v1379_v20 = vld [vmem:[#allocation2 + $0xf] sm:$0xff]  ;;  %v1627_v18 = vmul.f32 %v7721_v16, %v1411_v25 }
 0x29b   : > { %2062 = vrot.lane.b32.xlu1 %v7749_v39, %s6238_s15  ;;  %v10063_v39 = vld [vmem:[#allocation92_spill] sm:$0xff] }
 0x29c   : > { %v8023_v7 = vpop.permute.xlu0 %2210  ;;  %v1626_v49 = vmul.f32 %v10063_v39, %v1410_v47  ;;  %v1413_v47 = vld [vmem:[#allocation2 + $0x11f] sm:$0xff] }
 0x29d   : > { %10060 = vst [vmem:[#allocation126_spill] sm:$0xff] %v8023_v7  ;;  %v8025_v37 = vpop.permute.xlu1 %2016 }
 0x29e   : > { %10061 = vst [vmem:[#allocation127_spill] sm:$0xff] %v8025_v37  ;;  %2176 = vrot.lane.b32.xlu0 %v8027_v54, %s6238_s15  ;;  %v10065_v37 = vld [vmem:[#allocation85_spill] sm:$0xff]  ;;  %v1646_v14 = vpack.c.bf16 %v1627_v18, %v1626_v49  ;;  %v1629_v49 = vmul.f32 %v7763_v43, %v1413_v47 }
 0x29f   : > { %2110 = vrot.lane.b32.xlu1 %v8007_v44, %s6237_s17  ;;  %v1595_v7 = vmul.f32 %v10065_v37, %v1379_v20  ;;  %v10066_v37 = vld [vmem:[#allocation96_spill] sm:$0xff] }
 0x2a0   : > { %v8033_v53 = vpop.permute.xlu0 %2212  ;;  %v1628_v4 = vmul.f32 %v10066_v37, %v1412_v11 }
 0x2a1   : > { %10062 = vst [vmem:[#allocation128_spill] sm:$0xff] %v8033_v53  ;;  %v8035_v6 = vpop.permute.xlu1 %2018  ;;  %v1630_v53 = vpack.c.bf16 %v1595_v7, %v1594_v57 }
 0x2a2   : > { %2145 = vrot.lane.b32.xlu0 %v7775_v29, %s6236_s13  ;;  %v1647_v47 = vpack.c.bf16 %v1629_v49, %v1628_v4 }
 0x2a3   : > { %2064 = vrot.lane.b32.xlu1 %v7755_v9, %s6238_s15  ;;  %v10067_v9 = vld [vmem:[#allocation91_spill] sm:$0xff] }
 0x2a4   : > { %v2118_v21 = vpop.permute.xlu0 %2117  ;;  %v2218_v16 = vsel %vm635_vm0, %v1630_v53, %v10067_v9  ;;  %v1683_v53 = vld [vmem:[#allocation2 + $0x120] sm:$0xff] }
 0x2a5   : > { %v2037_v44 = vpop.permute.xlu1 %2036  ;;  %v2347_v15 = vsel %vm635_vm0, %v7483_v62, %v2118_v21  ;;  %v1682_v21 = vld [vmem:[#allocation2 + $0x118] sm:$0xff] }
 0x2a6   : > { %2178 = vrot.lane.b32.xlu0 %v1646_v14, %s6238_s15  ;;  %v2265_v7 = vsel %vm1093_vm1, %v2218_v16, %v2037_v44  ;;  %v1701_v44 = vpack.c.bf16 %v1683_v53, %v1682_v21 }
 0x2a7   : > { %2112 = vrot.lane.b32.xlu1 %v8027_v54, %s6237_s17 }
 0x2a8   : > { %v2151_v25 = vpop.permute.xlu0 %2150 }
 0x2a9   : > { %v2085_v20 = vpop.permute.xlu1 %2084  ;;  %v2394_v18 = vsel %vm1093_vm1, %v2347_v15, %v2151_v25 }
 0x2aa   : > { %2147 = vrot.lane.b32.xlu0 %v7783_v51, %s6236_s13  ;;  %v2426_v62 = vsel %vm2296_vm2, %v2394_v18, %v7893_v46  ;;  %v2298_v11 = vsel %vm2296_vm2, %v2265_v7, %v2085_v20  ;;  %v2221_v46 = vsel %vm635_vm0, %v7812_v34, %v7895_v33  ;;  %v2224_v33 = vsel %vm635_vm0, %v7810_v59, %v7905_v3  ;;  %s6157_s13 = sshll.u32 %s6239_s30, 4  ;;  %s6158_s13 = int_to_ptr.vmem [resolvable:$false] %s6157_s13 }
 0x2ab   : > { %2066 = vrot.lane.b32.xlu1 %v7775_v29, %s6238_s15  ;;  %2704 = vmatprep.mubr.bf16.mxu1 %v2426_v62  ;;  %v2227_v59 = vsel %vm635_vm0, %v7827_v45, %v7915_v50  ;;  %v2230_v45 = vsel %vm635_vm0, %v7839_v42, %v7925_v23  ;;  %v2233_v23 = vsel %vm635_vm0, %v7851_v32, %v7935_v40  ;;  %s6159_s22 = scalar_lea.vmem %s6158_s13, 8192  ;;  %p6160_p4 = scmp.lt.s32.totalorder %s9722_s27, %s6158_s13 }
 0x2ac   : > { %v2120_v57 = vpop.permute.xlu0 %2119  ;;  %2705 = vmatmul.mubr.bf16.vlgmr.msra.gmra.mrb[20].mxu1 %v2298_v11 }
 0x2ad   : > { %v2039_v15 = vpop.permute.xlu1 %2038  ;;  %v2350_v29 = vsel %vm635_vm0, %v7479_v56, %v2120_v57 }
 0x2ae   : > { %2180 = vrot.lane.b32.xlu0 %v1647_v47, %s6238_s15  ;;  %v2267_v20 = vsel %vm1093_vm1, %v2221_v46, %v2039_v15 }
 0x2af   : > { %2114 = vrot.lane.b32.xlu1 %v1646_v14, %s6237_s17 }
 0x2b0   : > { %v2153_v16 = vpop.permute.xlu0 %2152 }
 0x2b1   : > { %v2087_v51 = vpop.permute.xlu1 %2086  ;;  %v2396_v25 = vsel %vm1093_vm1, %v2350_v29, %v2153_v16 }
 0x2b2   : > { %2214 = vrot.lane.b32.xlu0 %v1701_v44, %s6237_s17  ;;  %v2429_v4 = vsel %vm2296_vm2, %v2396_v25, %v7903_v8  ;;  %v2301_v14 = vsel %vm2296_vm2, %v2267_v20, %v2087_v51 }
 0x2b3   : > { %2712 = vmatprep.mubr.bf16.mxu1 %v2429_v4 }
 0x2b4   : > { %v2122_v9 = vpop.permute.xlu0 %2121  ;;  %2713 = vmatmul.mubr.bf16.gmra.mrb[24].mxu1 %v2301_v14 }
 0x2b5   : > { %v2041_v56 = vpop.permute.xlu1 %2040  ;;  %v2353_v18 = vsel %vm635_vm0, %v7520_v52, %v2122_v9 }
 0x2b6   : > { %v2269_v62 = vsel %vm1093_vm1, %v2224_v33, %v2041_v56 }
 0x2b8   : > { %v2155_v49 = vpop.permute.xlu0 %2154 }
 0x2b9   : > { %v2089_v34 = vpop.permute.xlu1 %2088  ;;  %v2398_v7 = vsel %vm1093_vm1, %v2353_v18, %v2155_v49 }
 0x2ba   : > { %v2432_v8 = vsel %vm2296_vm2, %v2398_v7, %v7913_v38  ;;  %v2304_v11 = vsel %vm2296_vm2, %v2269_v62, %v2089_v34 }
 0x2bb   : > { %2720 = vmatprep.mubr.bf16.mxu1 %v2432_v8 }
 0x2bc   : > { %v2124_v21 = vpop.permute.xlu0 %2123  ;;  %2721 = vmatmul.mubr.bf16.gmra.mrb[28].mxu1 %v2304_v11 }
 0x2bd   : > { %v2043_v53 = vpop.permute.xlu1 %2042  ;;  %v2356_v52 = vsel %vm635_vm0, %v7537_v60, %v2124_v21 }
 0x2be   : > { %v2271_v47 = vsel %vm1093_vm1, %v2227_v59, %v2043_v53  ;;  %v2236_v53 = vsel %vm635_vm0, %v7863_v0, %v7945_v31 }
 0x2c0   : > { %v2157_v57 = vpop.permute.xlu0 %2156 }
 0x2c1   : > { %v2091_v15 = vpop.permute.xlu1 %2090  ;;  %v2400_v3 = vsel %vm1093_vm1, %v2356_v52, %v2157_v57 }
 0x2c2   : > { %v2435_v38 = vsel %vm2296_vm2, %v2400_v3, %v7923_v1  ;;  %v2307_v44 = vsel %vm2296_vm2, %v2271_v47, %v2091_v15 }
 0x2c3   : > { %2728 = vmatprep.mubr.bf16.mxu1 %v2435_v38 }
 0x2c4   : > { %v2126_v29 = vpop.permute.xlu0 %2125  ;;  %2729 = vmatmul.mubr.bf16.gmra.mrb[32].mxu1 %v2307_v44 }
 0x2c5   : > { %v2045_v16 = vpop.permute.xlu1 %2044  ;;  %v2359_v60 = vsel %vm635_vm0, %v7573_v26, %v2126_v29 }
 0x2c6   : > { %v2273_v25 = vsel %vm1093_vm1, %v2230_v45, %v2045_v16  ;;  %v2239_v16 = vsel %vm635_vm0, %v7875_v24, %v7955_v48 }
 0x2c8   : > { %v2159_v51 = vpop.permute.xlu0 %2158 }
 0x2c9   : > { %v2093_v46 = vpop.permute.xlu1 %2092  ;;  %v2402_v50 = vsel %vm1093_vm1, %v2359_v60, %v2159_v51 }
 0x2ca   : > { %v2438_v1 = vsel %vm2296_vm2, %v2402_v50, %v7933_v13  ;;  %v2310_v20 = vsel %vm2296_vm2, %v2273_v25, %v2093_v46 }
 0x2cb   : > { %2736 = vmatprep.mubr.bf16.mxu1 %v2438_v1 }
 0x2cc   : > { %v2128_v4 = vpop.permute.xlu0 %2127  ;;  %2737 = vmatmul.mubr.bf16.gmra.mrb[36].mxu1 %v2310_v20 }
 0x2cd   : > { %v2047_v14 = vpop.permute.xlu1 %2046  ;;  %v2362_v9 = vsel %vm635_vm0, %v7582_v19, %v2128_v4 }
 0x2ce   : > { %v8106_v26 = vpop.f32.mrb[16].mxu0  ;;  %v2275_v34 = vsel %vm1093_vm1, %v2233_v23, %v2047_v14  ;;  %v2242_v14 = vsel %vm635_vm0, %v7887_v5, %v7965_v30 }
 0x2cf   : > { %v8110_v56 = vpop.f32.mrb[17].mxu0 }
 0x2d0   : > { %v2161_v42 = vpop.permute.xlu0 %2160  ;;  %v8115_v18 = vpop.f32.mrb[18].mxu0 }
 0x2d1   : > { %v2404_v13 = vsel %vm1093_vm1, %v2362_v9, %v2161_v42  ;;  %v2095_v49 = vpop.permute.xlu1 %2094  ;;  %v8119_v33 = vpop.f32.mrb[19].mxu0 }
 0x2d2   : > { %v2441_v7 = vsel %vm2296_vm2, %v2404_v13, %v7943_v12  ;;  %v2313_v19 = vsel %vm2296_vm2, %v2275_v34, %v2095_v49 }
 0x2d3   : > { %2744 = vmatprep.mubr.bf16.mxu1 %v2441_v7 }
 0x2d4   : > { %v2130_v62 = vpop.permute.xlu0 %2129  ;;  %2745 = vmatmul.mubr.bf16.gmra.mrb[40].mxu1 %v2313_v19 }
 0x2d5   : > { %v2049_v8 = vpop.permute.xlu1 %2048  ;;  %v2365_v32 = vsel %vm635_vm0, %v7646_v2, %v2130_v62 }
 0x2d6   : > { %v2277_v15 = vsel %vm1093_vm1, %v2236_v53, %v2049_v8  ;;  %v2245_v8 = vsel %vm635_vm0, %v7907_v58, %v7975_v36 }
 0x2d7   : > { %v8124_v11 = vpop.f32.mrb[20].mxu0 }
 0x2d8   : > { %v8128_v40 = vpop.f32.mrb[21].mxu0  ;;  %v2163_v21 = vpop.permute.xlu0 %2162 }
 0x2d9   : > { %v8133_v52 = vpop.f32.mrb[22].mxu0  ;;  %v2406_v12 = vsel %vm1093_vm1, %v2365_v32, %v2163_v21  ;;  %v2097_v57 = vpop.permute.xlu1 %2096 }
 0x2da   : > { %v8137_v59 = vpop.f32.mrb[23].mxu0  ;;  %v2444_v3 = vsel %vm2296_vm2, %v2406_v12, %v7953_v63  ;;  %v2316_v2 = vsel %vm2296_vm2, %v2277_v15, %v2097_v57 }
 0x2db   : > { %2752 = vmatprep.mubr.bf16.mxu1 %v2444_v3 }
 0x2dc   : > { %v2132_v47 = vpop.permute.xlu0 %2131  ;;  %2753 = vmatmul.mubr.bf16.gmra.mrb[44].mxu1 %v2316_v2 }
 0x2dd   : > { %v2051_v38 = vpop.permute.xlu1 %2050  ;;  %v2368_v0 = vsel %vm635_vm0, %v7657_v10, %v2132_v47 }
 0x2de   : > { %v2279_v46 = vsel %vm1093_vm1, %v2239_v16, %v2051_v38  ;;  %v2248_v38 = vsel %vm635_vm0, %v7927_v17, %v7985_v27  ;;  %v10069_v17 = vld [vmem:[#allocation107_spill] sm:$0xff] }
 0x2df   : > { %v8142_v44 = vpop.f32.mrb[24].mxu0 }
 0x2e0   : > { %v8146_v31 = vpop.f32.mrb[25].mxu0  ;;  %v2165_v29 = vpop.permute.xlu0 %2164 }
 0x2e1   : > { %v8151_v60 = vpop.f32.mrb[26].mxu0  ;;  %v2408_v63 = vsel %vm1093_vm1, %v2368_v0, %v2165_v29  ;;  %v2099_v51 = vpop.permute.xlu1 %2098 }
 0x2e2   : > { %v8155_v45 = vpop.f32.mrb[27].mxu0  ;;  %v2447_v50 = vsel %vm2296_vm2, %v2408_v63, %v7963_v28  ;;  %v2319_v10 = vsel %vm2296_vm2, %v2279_v46, %v2099_v51  ;;  %v10068_v51 = vld [vmem:[#allocation119_spill] sm:$0xff] }
 0x2e3   : > { %2760 = vmatprep.mubr.bf16.mxu1 %v2447_v50 }
 0x2e4   : > { %v2134_v25 = vpop.permute.xlu0 %2133  ;;  %2761 = vmatmul.mubr.bf16.gmra.mrb[48].mxu1 %v2319_v10 }
 0x2e5   : > { %v2053_v1 = vpop.permute.xlu1 %2052  ;;  %v2371_v24 = vsel %vm635_vm0, %v7685_v35, %v2134_v25 }
 0x2e6   : > { %v2281_v23 = vsel %vm1093_vm1, %v2242_v14, %v2053_v1  ;;  %v10071_v14 = vld [vmem:[#allocation116_spill] sm:$0xff] }
 0x2e7   : > { %v8160_v20 = vpop.f32.mrb[28].mxu0 }
 0x2e8   : > { %v8164_v48 = vpop.f32.mrb[29].mxu0  ;;  %v2167_v4 = vpop.permute.xlu0 %2166 }
 0x2e9   : > { %v8169_v9 = vpop.f32.mrb[30].mxu0  ;;  %v2410_v28 = vsel %vm1093_vm1, %v2371_v24, %v2167_v4  ;;  %v2101_v42 = vpop.permute.xlu1 %2100  ;;  %v10070_v4 = vld [vmem:[#allocation120_spill] sm:$0xff] }
 0x2ea   : > { %v8173_v13 = vpop.f32.mrb[31].mxu0  ;;  %v2450_v49 = vsel %vm2296_vm2, %v2410_v28, %v7973_v61  ;;  %v2322_v35 = vsel %vm2296_vm2, %v2281_v23, %v2101_v42  ;;  %v2251_v28 = vsel %vm635_vm0, %v10071_v14, %v10070_v4  ;;  %v10077_v4 = vld [vmem:[#allocation110_spill] sm:$0xff] }
 0x2eb   : > { %2768 = vmatprep.mubr.bf16.mxu1 %v2450_v49 }
 0x2ec   : > { %v2136_v34 = vpop.permute.xlu0 %2135  ;;  %2769 = vmatmul.mubr.bf16.gmra.mrb[52].mxu1 %v2322_v35 }
 0x2ed   : > { %v2055_v7 = vpop.permute.xlu1 %2054  ;;  %v2374_v5 = vsel %vm635_vm0, %v7705_v22, %v2136_v34 }
 0x2ee   : > { %v2283_v53 = vsel %vm1093_vm1, %v2245_v8, %v2055_v7  ;;  %v10072_v7 = vld [vmem:[#allocation121_spill] sm:$0xff] }
 0x2ef   : > { %v8178_v19 = vpop.f32.mrb[32].mxu0 }
 0x2f0   : > { %v8182_v30 = vpop.f32.mrb[33].mxu0  ;;  %v2169_v62 = vpop.permute.xlu0 %2168 }
 0x2f1   : > { %v8187_v32 = vpop.f32.mrb[34].mxu0  ;;  %v2412_v61 = vsel %vm1093_vm1, %v2374_v5, %v2169_v62  ;;  %v2103_v21 = vpop.permute.xlu1 %2102 }
 0x2f2   : > { %v8191_v12 = vpop.f32.mrb[35].mxu0  ;;  %v2453_v57 = vsel %vm2296_vm2, %v2412_v61, %v7983_v55  ;;  %v2325_v22 = vsel %vm2296_vm2, %v2283_v53, %v2103_v21  ;;  %v10073_v53 = vld [vmem:[#allocation109_spill] sm:$0xff] }
 0x2f3   : > { %2776 = vmatprep.mubr.bf16.mxu1 %v2453_v57 }
 0x2f4   : > { %v2138_v15 = vpop.permute.xlu0 %2137  ;;  %2777 = vmatmul.mubr.bf16.gmra.mrb[56].mxu1 %v2325_v22 }
 0x2f5   : > { %v2057_v3 = vpop.permute.xlu1 %2056  ;;  %v2377_v58 = vsel %vm635_vm0, %v7719_v41, %v2138_v15 }
 0x2f6   : > { %v2285_v16 = vsel %vm1093_vm1, %v2248_v38, %v2057_v3  ;;  %v10074_v3 = vld [vmem:[#allocation122_spill] sm:$0xff] }
 0x2f7   : > { %v8196_v2 = vpop.f32.mrb[36].mxu0 }
 0x2f8   : > { %v8200_v36 = vpop.f32.mrb[37].mxu0  ;;  %v2171_v47 = vpop.permute.xlu0 %2170 }
 0x2f9   : > { %v8205_v0 = vpop.f32.mrb[38].mxu0  ;;  %v2414_v55 = vsel %vm1093_vm1, %v2377_v58, %v2171_v47  ;;  %v2105_v29 = vpop.permute.xlu1 %2104  ;;  %v10075_v58 = vld [vmem:[#allocation117_spill] sm:$0xff] }
 0x2fa   : > { %v8209_v63 = vpop.f32.mrb[39].mxu0  ;;  %v2456_v46 = vsel %vm2296_vm2, %v2414_v55, %v10068_v51  ;;  %v2328_v41 = vsel %vm2296_vm2, %v2285_v16, %v2105_v29  ;;  %v2254_v47 = vsel %vm635_vm0, %v10075_v58, %v10074_v3  ;;  %v10081_v58 = vld [vmem:[#allocation126_spill] sm:$0xff] }
 0x2fb   : > { %2784 = vmatprep.mubr.bf16.mxu1 %v2456_v46  ;;  %v10076_v46 = vld [vmem:[#allocation124_spill] sm:$0xff] }
 0x2fc   : > { %v2140_v50 = vpop.permute.xlu0 %2139  ;;  %2785 = vmatmul.mubr.bf16.gmra.mrb[60].mxu1 %v2328_v41 }
 0x2fd   : > { %v2059_v10 = vpop.permute.xlu1 %2058  ;;  %v2380_v27 = vsel %vm635_vm0, %v10069_v17, %v2140_v50 }
 0x2fe   : > { %v2287_v35 = vsel %vm1093_vm1, %v2251_v28, %v2059_v10 }
 0x2ff   : > { %v8214_v25 = vpop.f32.mrb[40].mxu0 }
 0x300   : > { %v8218_v1 = vpop.f32.mrb[41].mxu0  ;;  %v2173_v24 = vpop.permute.xlu0 %2172 }
 0x301   : > { %v8223_v42 = vpop.f32.mrb[42].mxu0  ;;  %v2416_v23 = vsel %vm1093_vm1, %v2380_v27, %v2173_v24  ;;  %v2107_v49 = vpop.permute.xlu1 %2106  ;;  %v3240_v27 = vld [vmem:[%s9782_s9] sm:$0x1] }
 0x302   : > { %v8227_v34 = vpop.f32.mrb[43].mxu0  ;;  %v2459_v5 = vsel %vm2296_vm2, %v2416_v23, %v10072_v7  ;;  %v2331_v62 = vsel %vm2296_vm2, %v2287_v35, %v2107_v49  ;;  %v10078_v35 = vld [vmem:[#allocation125_spill] sm:$0xff]  ;;  %v10079_v7 = vld [vmem:[#allocation118_spill] sm:$0xff] }
 0x303   : > { %2792 = vmatprep.mubr.bf16.mxu1 %v2459_v5  ;;  %v2257_v5 = vsel %vm635_vm0, %v10079_v7, %v10078_v35 }
 0x304   : > { %v2142_v8 = vpop.permute.xlu0 %2141  ;;  %2793 = vmatmul.mubr.bf16.gmra.mrb[64].mxu1 %v2331_v62 }
 0x305   : > { %v2061_v61 = vpop.permute.xlu1 %2060  ;;  %v2383_v57 = vsel %vm635_vm0, %v10073_v53, %v2142_v8  ;;  %v3613_v53 = vld [vmem:[#allocation3 + $0x10] sm:$0xff] }
 0x306   : > { %v2289_v16 = vsel %vm1093_vm1, %v2254_v47, %v2061_v61  ;;  %v3612_v61 = vld [vmem:[#allocation3 + $0x8] sm:$0xff] }
 0x307   : > { %v8232_v21 = vpop.f32.mrb[44].mxu0 }
 0x308   : > { %v8236_v22 = vpop.f32.mrb[45].mxu0  ;;  %v2175_v15 = vpop.permute.xlu0 %2174 }
 0x309   : > { %v8241_v38 = vpop.f32.mrb[46].mxu0  ;;  %v2418_v55 = vsel %vm1093_vm1, %v2383_v57, %v2175_v15  ;;  %v2109_v29 = vpop.permute.xlu1 %2108  ;;  %v10080_v15 = vld [vmem:[#allocation56_spill] sm:$0xff] }
 0x30a   : > { %v8245_v51 = vpop.f32.mrb[47].mxu0  ;;  %v2462_v41 = vsel %vm2296_vm2, %v2418_v55, %v10076_v46  ;;  %v2334_v50 = vsel %vm2296_vm2, %v2289_v16, %v2109_v29  ;;  %v3648_v16 = vpack.c.bf16 %v3613_v53, %v3612_v61  ;;  %v10086_v61 = vld [vmem:[#allocation115_spill] sm:$0xff] }
 0x30b   : > { %2800 = vmatprep.mubr.bf16.mxu1 %v2462_v41  ;;  %v10082_v41 = vld [vmem:[#allocation112_spill] sm:$0xff] }
 0x30c   : > { %v2144_v10 = vpop.permute.xlu0 %2143  ;;  %2801 = vmatmul.mubr.bf16.gmra.mrb[68].mxu1 %v2334_v50 }
 0x30d   : > { %v2063_v17 = vpop.permute.xlu1 %2062  ;;  %v2386_v14 = vsel %vm635_vm0, %v10077_v4, %v2144_v10 }
 0x30e   : > { %v2291_v57 = vsel %vm1093_vm1, %v2257_v5, %v2063_v17  ;;  %v10083_v17 = vld [vmem:[#allocation127_spill] sm:$0xff] }
 0x30f   : > { %v3307_v24 = vpop.f32.mrb[48].mxu0 }
 0x310   : > { %v8255_v28 = vadd.f32 %v3307_v24, %v3240_v27  ;;  %v2177_v23 = vpop.permute.xlu0 %2176  ;;  %v5777_v49 = vpop.f32.mrb[49].mxu0  ;;  %v10084_v27 = vld [vmem:[#allocation123_spill] sm:$0xff] }
 0x311   : > { %v2420_v62 = vsel %vm1093_vm1, %v2386_v14, %v2177_v23  ;;  %v2111_v8 = vpop.permute.xlu1 %2110  ;;  %v2260_v24 = vsel %vm635_vm0, %v10084_v27, %v10083_v17  ;;  %v10085_v49 = vld [vmem:[#allocation128_spill] sm:$0xff] }
 0x312   : > { %v3351_v3 = vrot.slane %v8255_v28, %v10080_v15  ;;  %v2465_v47 = vsel %vm2296_vm2, %v2420_v62, %v10081_v58  ;;  %v2337_v55 = vsel %vm2296_vm2, %v2291_v57, %v2111_v8 }
 0x313   : > { %2808 = vmatprep.mubr.bf16.mxu1 %v2465_v47 }
 0x314   : > { %3353 = vrot.lane.b32.xlu0 %v3351_v3, %s6238_s15  ;;  %v2146_v29 = vpop.permute.xlu0 %2145  ;;  %2809 = vmatmul.mubr.bf16.gmra.mrb[72].mxu1 %v2337_v55  ;;  %v2263_v3 = vsel %vm635_vm0, %v8027_v54, %v8035_v6 }
 0x315   : > { %v2065_v46 = vpop.permute.xlu1 %2064  ;;  %v2389_v50 = vsel %vm635_vm0, %v10082_v41, %v2146_v29  ;;  %v8291_v41 = vld [vmem:[%s9780_s7] ss:$0 sm:$0xff] }
 0x316   : > { %v2293_v23 = vsel %vm1093_vm1, %v2260_v24, %v2065_v46 }
 0x318   : > { %3772 = vrot.lane.b32.xlu0 %v3648_v16, %s6238_s15  ;;  %v2179_v10 = vpop.permute.xlu0 %2178 }
 0x319   : > { %v2422_v4 = vsel %vm1093_vm1, %v2389_v50, %v2179_v10  ;;  %v2113_v14 = vpop.permute.xlu1 %2112 }
 0x31a   : > { %v2468_v35 = vsel %vm2296_vm2, %v2422_v4, %v10085_v49  ;;  %v2340_v7 = vsel %vm2296_vm2, %v2293_v23, %v2113_v14 }
 0x31b   : > { %2816 = vmatprep.mubr.bf16.mxu1 %v2468_v35 }
 0x31c   : > { %v2148_v5 = vpop.permute.xlu0 %2147  ;;  %2817 = vmatmul.mubr.bf16.gmra.mrb[76].mxu1 %v2340_v7 }
 0x31d   : > { %v2067_v62 = vpop.permute.xlu1 %2066  ;;  %v2392_v53 = vsel %vm635_vm0, %v10086_v61, %v2148_v5 }
 0x31e   : > { %v2295_v55 = vsel %vm1093_vm1, %v2263_v3, %v2067_v62 }
 0x320   : > { %v2181_v8 = vpop.permute.xlu0 %2180 }
 0x321   : > { %v2115_v57 = vpop.permute.xlu1 %2114  ;;  %v2424_v58 = vsel %vm1093_vm1, %v2392_v53, %v2181_v8 }
 0x322   : > { %v2343_v16 = vsel %vm2296_vm2, %v2295_v55, %v2115_v57 }
 0x324   : > { %v2215_v47 = vpop.permute.xlu0 %2214 }
 0x325   : > { %v2471_v29 = vsel %vm2296_vm2, %v2424_v58, %v2215_v47 }
 0x326   : > { %2824 = vmatprep.mubr.bf16.mxu1 %v2471_v29 }
 0x327   : > { %2825 = vmatmul.mubr.bf16.gmra.mrb[80].mxu1 %v2343_v16 }
 0x37f   : > { %v5301_v46 = vpop.f32.mrb[20].mxu1 }
 0x380   : > { %v5302_v50 = vpop.f32.mrb[21].mxu1 }
 0x381   : > { %v5303_v10 = vadd.f32 %v5302_v50, %v5301_v46  ;;  %v5304_v54 = vpop.f32.mrb[22].mxu1 }
 0x382   : > { %v5305_v6 = vpop.f32.mrb[23].mxu1 }
 0x383   : > { %v2707_v17 = vadd.f32 %v5303_v10, %v8291_v41  ;;  %v5306_v27 = vadd.f32 %v5305_v6, %v5304_v54 }
 0x385   : > { %v8295_v24 = vadd.f32 %v8110_v56, %v2707_v17  ;;  %v2710_v4 = vadd.f32 %v5306_v27, %v8291_v41 }
 0x387   : > { %v8299_v14 = vadd.f32 %v8119_v33, %v2710_v4  ;;  %v5307_v23 = vpop.f32.mrb[24].mxu1 }
 0x388   : > { %v5308_v49 = vpop.f32.mrb[25].mxu1 }
 0x389   : > { %v5309_v35 = vadd.f32 %v5308_v49, %v5307_v23  ;;  %v5310_v7 = vpop.f32.mrb[26].mxu1 }
 0x38a   : > { %v5311_v5 = vpop.f32.mrb[27].mxu1 }
 0x38b   : > { %v2715_v62 = vadd.f32 %v5309_v35, %v8291_v41  ;;  %v5312_v8 = vadd.f32 %v5311_v5, %v5310_v7  ;;  %v2994_v7 = vsel %vm1093_vm1, %v8295_v24, 0.0 }
 0x38d   : > { %v8303_v61 = vadd.f32 %v8106_v26, %v2715_v62  ;;  %v2718_v53 = vadd.f32 %v5312_v8, %v8291_v41 }
 0x38f   : > { %v8307_v56 = vadd.f32 %v8115_v18, %v2718_v53  ;;  %v5313_v57 = vpop.f32.mrb[28].mxu1  ;;  %v2997_v5 = vsel %vm1093_vm1, %v8303_v61, 0.0 }
 0x390   : > { %v5314_v3 = vpop.f32.mrb[29].mxu1 }
 0x391   : > { %v5315_v33 = vadd.f32 %v5314_v3, %v5313_v57  ;;  %v5316_v58 = vpop.f32.mrb[30].mxu1 }
 0x392   : > { %v5317_v47 = vpop.f32.mrb[31].mxu1 }
 0x393   : > { %v2723_v55 = vadd.f32 %v5315_v33, %v8291_v41  ;;  %v5318_v29 = vadd.f32 %v5317_v47, %v5316_v58 }
 0x395   : > { %v8311_v16 = vadd.f32 %v8128_v40, %v2723_v55  ;;  %v2726_v46 = vadd.f32 %v5318_v29, %v8291_v41  ;;  %v2995_v40 = vsel %vm1093_vm1, %v8299_v14, 0.0 }
 0x397   : > { %v8315_v26 = vadd.f32 %v8137_v59, %v2726_v46  ;;  %v5319_v50 = vpop.f32.mrb[32].mxu1  ;;  %v3001_v55 = vsel %vm1093_vm1, %v8311_v16, 0.0 }
 0x398   : > { %v5320_v10 = vpop.f32.mrb[33].mxu1 }
 0x399   : > { %v5321_v18 = vadd.f32 %v5320_v10, %v5319_v50  ;;  %v5322_v54 = vpop.f32.mrb[34].mxu1 }
 0x39a   : > { %v5323_v6 = vpop.f32.mrb[35].mxu1 }
 0x39b   : > { %v2731_v17 = vadd.f32 %v5321_v18, %v8291_v41  ;;  %v5324_v27 = vadd.f32 %v5323_v6, %v5322_v54 }
 0x39d   : > { %v8319_v4 = vadd.f32 %v8124_v11, %v2731_v17  ;;  %v2734_v23 = vadd.f32 %v5324_v27, %v8291_v41  ;;  %v2996_v11 = vadd.f32 %v2995_v40, %v2994_v7  ;;  %v3003_v27 = vsel %vm1093_vm1, %v8315_v26, 0.0 }
 0x39f   : > { %v8325_v49 = vadd.f32 %v8133_v52, %v2734_v23  ;;  %v5325_v59 = vpop.f32.mrb[36].mxu1  ;;  %v2998_v33 = vadd.f32 %v2997_v5, %v2996_v11  ;;  %v2999_v52 = vsel %vm1093_vm1, %v8307_v56, 0.0  ;;  %v3005_v40 = vsel %vm1093_vm1, %v8319_v4, 0.0 }
 0x3a0   : > { %v5326_v35 = vpop.f32.mrb[37].mxu1 }
 0x3a1   : > { %v5327_v62 = vadd.f32 %v5326_v35, %v5325_v59  ;;  %v5328_v8 = vpop.f32.mrb[38].mxu1  ;;  %v3000_v50 = vadd.f32 %v2999_v52, %v2998_v33  ;;  %v3007_v11 = vsel %vm1093_vm1, %v8325_v49, 0.0 }
 0x3a2   : > { %v5329_v53 = vpop.f32.mrb[39].mxu1 }
 0x3a3   : > { %v2739_v57 = vadd.f32 %v5327_v62, %v8291_v41  ;;  %v5330_v3 = vadd.f32 %v5329_v53, %v5328_v8  ;;  %v3002_v6 = vadd.f32 %v3001_v55, %v3000_v50 }
 0x3a5   : > { %v8335_v58 = vadd.f32 %v8146_v31, %v2739_v57  ;;  %v2742_v47 = vadd.f32 %v5330_v3, %v8291_v41  ;;  %v3004_v35 = vadd.f32 %v3003_v27, %v3002_v6 }
 0x3a7   : > { %v8341_v29 = vadd.f32 %v8155_v45, %v2742_v47  ;;  %v5331_v46 = vpop.f32.mrb[40].mxu1  ;;  %v3006_v62 = vadd.f32 %v3005_v40, %v3004_v35  ;;  %v3009_v33 = vsel %vm1093_vm1, %v8335_v58, 0.0 }
 0x3a8   : > { %v5332_v10 = vpop.f32.mrb[41].mxu1 }
 0x3a9   : > { %v5333_v18 = vadd.f32 %v5332_v10, %v5331_v46  ;;  %v5334_v54 = vpop.f32.mrb[42].mxu1  ;;  %v3008_v47 = vadd.f32 %v3007_v11, %v3006_v62  ;;  %v3011_v50 = vsel %vm1093_vm1, %v8341_v29, 0.0 }
 0x3aa   : > { %v5335_v17 = vpop.f32.mrb[43].mxu1 }
 0x3ab   : > { %v2747_v31 = vadd.f32 %v5333_v18, %v8291_v41  ;;  %v5336_v23 = vadd.f32 %v5335_v17, %v5334_v54  ;;  %v3010_v46 = vadd.f32 %v3009_v33, %v3008_v47 }
 0x3ad   : > { %v8349_v59 = vadd.f32 %v8142_v44, %v2747_v31  ;;  %v2750_v45 = vadd.f32 %v5336_v23, %v8291_v41  ;;  %v3012_v31 = vadd.f32 %v3011_v50, %v3010_v46 }
 0x3af   : > { %v8353_v7 = vadd.f32 %v8151_v60, %v2750_v45  ;;  %v5337_v5 = vpop.f32.mrb[44].mxu1  ;;  %v3013_v6 = vsel %vm1093_vm1, %v8349_v59, 0.0 }
 0x3b0   : > { %v5338_v8 = vpop.f32.mrb[45].mxu1  ;;  %v3014_v45 = vadd.f32 %v3013_v6, %v3012_v31 }
 0x3b1   : > { %v5339_v53 = vadd.f32 %v5338_v8, %v5337_v5  ;;  %v5340_v57 = vpop.f32.mrb[46].mxu1  ;;  %v3015_v35 = vsel %vm1093_vm1, %v8353_v7, 0.0 }
 0x3b2   : > { %v5341_v3 = vpop.f32.mrb[47].mxu1 }
 0x3b3   : > { %v2755_v44 = vadd.f32 %v5339_v53, %v8291_v41  ;;  %v5342_v52 = vadd.f32 %v5341_v3, %v5340_v57  ;;  %v3016_v53 = vadd.f32 %v3015_v35, %v3014_v45 }
 0x3b5   : > { %v8361_v55 = vadd.f32 %v8164_v48, %v2755_v44  ;;  %v2758_v60 = vadd.f32 %v5342_v52, %v8291_v41 }
 0x3b7   : > { %v8367_v10 = vadd.f32 %v8173_v13, %v2758_v60  ;;  %v5343_v18 = vpop.f32.mrb[48].mxu1  ;;  %v3017_v62 = vsel %vm1093_vm1, %v8361_v55, 0.0 }
 0x3b8   : > { %v5344_v54 = vpop.f32.mrb[49].mxu1  ;;  %v3018_v44 = vadd.f32 %v3017_v62, %v3016_v53 }
 0x3b9   : > { %v5345_v17 = vadd.f32 %v5344_v54, %v5343_v18  ;;  %v5346_v27 = vpop.f32.mrb[50].mxu1  ;;  %v3019_v47 = vsel %vm1093_vm1, %v8367_v10, 0.0 }
 0x3ba   : > { %v5347_v23 = vpop.f32.mrb[51].mxu1  ;;  %v3020_v18 = vadd.f32 %v3019_v47, %v3018_v44 }
 0x3bb   : > { %v2763_v48 = vadd.f32 %v5345_v17, %v8291_v41  ;;  %v5348_v40 = vadd.f32 %v5347_v23, %v5346_v27 }
 0x3bd   : > { %v8375_v5 = vadd.f32 %v8160_v20, %v2763_v48  ;;  %v2766_v13 = vadd.f32 %v5348_v40, %v8291_v41 }
 0x3bf   : > { %v8381_v8 = vadd.f32 %v8169_v9, %v2766_v13  ;;  %v5349_v11 = vpop.f32.mrb[52].mxu1  ;;  %v3021_v46 = vsel %vm1093_vm1, %v8375_v5, 0.0 }
 0x3c0   : > { %v5350_v57 = vpop.f32.mrb[53].mxu1  ;;  %v3022_v17 = vadd.f32 %v3021_v46, %v3020_v18 }
 0x3c1   : > { %v5351_v3 = vadd.f32 %v5350_v57, %v5349_v11  ;;  %v5352_v33 = vpop.f32.mrb[54].mxu1  ;;  %v3023_v31 = vsel %vm1093_vm1, %v8381_v8, 0.0 }
 0x3c2   : > { %v5353_v52 = vpop.f32.mrb[55].mxu1  ;;  %v3024_v13 = vadd.f32 %v3023_v31, %v3022_v17 }
 0x3c3   : > { %v2771_v20 = vadd.f32 %v5351_v3, %v8291_v41  ;;  %v5354_v60 = vadd.f32 %v5353_v52, %v5352_v33 }
 0x3c5   : > { %v8389_v50 = vadd.f32 %v8182_v30, %v2771_v20  ;;  %v2774_v9 = vadd.f32 %v5354_v60, %v8291_v41 }
 0x3c7   : > { %v8393_v54 = vadd.f32 %v8191_v12, %v2774_v9  ;;  %v5355_v6 = vpop.f32.mrb[56].mxu1  ;;  %v3025_v45 = vsel %vm1093_vm1, %v8389_v50, 0.0 }
 0x3c8   : > { %v5356_v27 = vpop.f32.mrb[57].mxu1  ;;  %v3026_v11 = vadd.f32 %v3025_v45, %v3024_v13 }
 0x3c9   : > { %v5357_v23 = vadd.f32 %v5356_v27, %v5355_v6  ;;  %v5358_v48 = vpop.f32.mrb[58].mxu1  ;;  %v3027_v53 = vsel %vm1093_vm1, %v8393_v54, 0.0 }
 0x3ca   : > { %v5359_v40 = vpop.f32.mrb[59].mxu1  ;;  %v3028_v20 = vadd.f32 %v3027_v53, %v3026_v11 }
 0x3cb   : > { %v2779_v30 = vadd.f32 %v5357_v23, %v8291_v41  ;;  %v5360_v35 = vadd.f32 %v5359_v40, %v5358_v48 }
 0x3cd   : > { %v8401_v62 = vadd.f32 %v8178_v19, %v2779_v30  ;;  %v2782_v12 = vadd.f32 %v5360_v35, %v8291_v41 }
 0x3cf   : > { %v8407_v57 = vadd.f32 %v8187_v32, %v2782_v12  ;;  %v5361_v3 = vpop.f32.mrb[60].mxu1  ;;  %v3029_v44 = vsel %vm1093_vm1, %v8401_v62, 0.0 }
 0x3d0   : > { %v5362_v33 = vpop.f32.mrb[61].mxu1  ;;  %v3030_v9 = vadd.f32 %v3029_v44, %v3028_v20 }
 0x3d1   : > { %v5363_v52 = vadd.f32 %v5362_v33, %v5361_v3  ;;  %v5364_v47 = vpop.f32.mrb[62].mxu1  ;;  %v3031_v18 = vsel %vm1093_vm1, %v8407_v57, 0.0 }
 0x3d2   : > { %v5365_v60 = vpop.f32.mrb[63].mxu1  ;;  %v3032_v23 = vadd.f32 %v3031_v18, %v3030_v9 }
 0x3d3   : > { %v2787_v19 = vadd.f32 %v5363_v52, %v8291_v41  ;;  %v5366_v46 = vadd.f32 %v5365_v60, %v5364_v47 }
 0x3d5   : > { %v8415_v6 = vadd.f32 %v8200_v36, %v2787_v19  ;;  %v2790_v32 = vadd.f32 %v5366_v46, %v8291_v41 }
 0x3d7   : > { %v3033_v17 = vsel %vm1093_vm1, %v8415_v6, 0.0  ;;  %v8421_v27 = vadd.f32 %v8209_v63, %v2790_v32  ;;  %v5367_v31 = vpop.f32.mrb[64].mxu1 }
 0x3d8   : > { %v5368_v48 = vpop.f32.mrb[65].mxu1  ;;  %v3034_v30 = vadd.f32 %v3033_v17, %v3032_v23 }
 0x3d9   : > { %v5369_v40 = vadd.f32 %v5368_v48, %v5367_v31  ;;  %v5370_v45 = vpop.f32.mrb[66].mxu1  ;;  %v3035_v13 = vsel %vm1093_vm1, %v8421_v27, 0.0 }
 0x3da   : > { %v5371_v35 = vpop.f32.mrb[67].mxu1  ;;  %v3036_v63 = vadd.f32 %v3035_v13, %v3034_v30 }
 0x3db   : > { %v2795_v36 = vadd.f32 %v5369_v40, %v8291_v41  ;;  %v5372_v12 = vadd.f32 %v5371_v35, %v5370_v45 }
 0x3dd   : > { %v8427_v11 = vadd.f32 %v8196_v2, %v2795_v36  ;;  %v2798_v53 = vadd.f32 %v5372_v12, %v8291_v41 }
 0x3df   : > { %v3037_v3 = vsel %vm1093_vm1, %v8427_v11, 0.0  ;;  %v8433_v33 = vadd.f32 %v8205_v0, %v2798_v53  ;;  %v5373_v44 = vpop.f32.mrb[68].mxu1 }
 0x3e0   : > { %v3038_v52 = vadd.f32 %v3037_v3, %v3036_v63  ;;  %v5374_v47 = vpop.f32.mrb[69].mxu1 }
 0x3e1   : > { %v3039_v20 = vsel %vm1093_vm1, %v8433_v33, 0.0  ;;  %v5375_v60 = vadd.f32 %v5374_v47, %v5373_v44  ;;  %v5376_v19 = vpop.f32.mrb[70].mxu1 }
 0x3e2   : > { %v3040_v46 = vadd.f32 %v3039_v20, %v3038_v52  ;;  %v5377_v2 = vpop.f32.mrb[71].mxu1 }
 0x3e3   : > { %v2803_v9 = vadd.f32 %v5375_v60, %v8291_v41  ;;  %v5378_v18 = vadd.f32 %v5377_v2, %v5376_v19 }
 0x3e5   : > { %v2964_v32 = vadd.f32 %v8218_v1, %v2803_v9  ;;  %v2806_v17 = vadd.f32 %v5378_v18, %v8291_v41 }
 0x3e7   : > { %v3041_v0 = vsel %vm1093_vm1, %v2964_v32, 0.0  ;;  %v2967_v31 = vadd.f32 %v8227_v34, %v2806_v17  ;;  %v5379_v23 = vpop.f32.mrb[72].mxu1 }
 0x3e8   : > { %v3042_v48 = vadd.f32 %v3041_v0, %v3040_v46  ;;  %v5380_v40 = vpop.f32.mrb[73].mxu1 }
 0x3e9   : > { %v3043_v45 = vsel %vm1093_vm1, %v2967_v31, 0.0  ;;  %v5381_v30 = vadd.f32 %v5380_v40, %v5379_v23  ;;  %v5382_v35 = vpop.f32.mrb[74].mxu1 }
 0x3ea   : > { %v3044_v13 = vadd.f32 %v3043_v45, %v3042_v48  ;;  %v5383_v36 = vpop.f32.mrb[75].mxu1 }
 0x3eb   : > { %v2811_v12 = vadd.f32 %v5381_v30, %v8291_v41  ;;  %v5384_v53 = vadd.f32 %v5383_v36, %v5382_v35 }
 0x3ed   : > { %v2972_v1 = vadd.f32 %v8214_v25, %v2811_v12  ;;  %v2814_v63 = vadd.f32 %v5384_v53, %v8291_v41 }
 0x3ef   : > { %v3045_v3 = vsel %vm1093_vm1, %v2972_v1, 0.0  ;;  %v2975_v34 = vadd.f32 %v8223_v42, %v2814_v63  ;;  %v5385_v44 = vpop.f32.mrb[76].mxu1 }
 0x3f0   : > { %v3046_v52 = vadd.f32 %v3045_v3, %v3044_v13  ;;  %v5386_v47 = vpop.f32.mrb[77].mxu1 }
 0x3f1   : > { %v3047_v20 = vsel %vm1093_vm1, %v2975_v34, 0.0  ;;  %v5387_v60 = vadd.f32 %v5386_v47, %v5385_v44  ;;  %v5388_v19 = vpop.f32.mrb[78].mxu1 }
 0x3f2   : > { %v3048_v46 = vadd.f32 %v3047_v20, %v3046_v52  ;;  %v5389_v2 = vpop.f32.mrb[79].mxu1 }
 0x3f3   : > { %v2819_v9 = vadd.f32 %v5387_v60, %v8291_v41  ;;  %v5390_v18 = vadd.f32 %v5389_v2, %v5388_v19 }
 0x3f5   : > { %v2980_v25 = vadd.f32 %v8236_v22, %v2819_v9  ;;  %v2822_v17 = vadd.f32 %v5390_v18, %v8291_v41 }
 0x3f7   : > { %v3049_v0 = vsel %vm1093_vm1, %v2980_v25, 0.0  ;;  %v2983_v42 = vadd.f32 %v8245_v51, %v2822_v17 }
 0x3f8   : > { %v3050_v23 = vadd.f32 %v3049_v0, %v3048_v46 }
 0x3f9   : > { %v3051_v48 = vsel %vm1093_vm1, %v2983_v42, 0.0 }
 0x3fa   : > { %v3052_v40 = vadd.f32 %v3051_v48, %v3050_v23  ;;  %v5391_v45 = vpop.f32.mrb[80].mxu1 }
 0x3fb   : > { %v5392_v30 = vpop.f32.mrb[81].mxu1 }
 0x3fc   : > { %v5393_v35 = vadd.f32 %v5392_v30, %v5391_v45  ;;  %v5394_v13 = vpop.f32.mrb[82].mxu1 }
 0x3fd   : > { %v5395_v36 = vpop.f32.mrb[83].mxu1 }
 0x3fe   : > { %v2827_v12 = vadd.f32 %v5393_v35, %v8291_v41  ;;  %v5396_v53 = vadd.f32 %v5395_v36, %v5394_v13 }
 0x400   : > { %v2988_v22 = vadd.f32 %v8232_v21, %v2827_v12  ;;  %v2830_v63 = vadd.f32 %v5396_v53, %v8291_v41 }
 0x402   : > { %v3053_v3 = vsel %vm1093_vm1, %v2988_v22, 0.0  ;;  %v2991_v51 = vadd.f32 %v8241_v38, %v2830_v63 }
 0x403   : > { %v3054_v44 = vadd.f32 %v3053_v3, %v3052_v40 }
 0x404   : > { %v3055_v52 = vsel %vm1093_vm1, %v2991_v51, 0.0 }
 0x405   : > { %v3056_v47 = vadd.f32 %v3055_v52, %v3054_v44 }
 0x407   : > { %v3057_v20 = vrot.slane %v3056_v47, 4 }
 0x409   : > { %v3058_v60 = vadd.f32 %v3057_v20, %v3056_v47 }
 0x40b   : > { %v3059_v19 = vrot.slane %v3058_v60, 2 }
 0x40d   : > { %v3060_v46 = vadd.f32 %v3059_v19, %v3058_v60 }
 0x40f   : > { %v3061_v2 = vrot.slane %v3060_v46, 1 }
 0x411   : > { %v3062_v9 = vadd.f32 %v3061_v2, %v3060_v46 }
 0x413   : > { %v8461_v18 = vmul.f32 0.00390625, %v3062_v9 }
 0x415   : > { %v8465_v21 = vsub.f32 %v8427_v11, %v8461_v18  ;;  %v8469_v41 = vsub.f32 %v8433_v33, %v8461_v18  ;;  %v8472_v38 = vsub.f32 %v2964_v32, %v8461_v18  ;;  %v8475_v17 = vsub.f32 %v2967_v31, %v8461_v18 }
 0x416   : > { %v8478_v0 = vsub.f32 %v2972_v1, %v8461_v18  ;;  %v8481_v23 = vsub.f32 %v2975_v34, %v8461_v18  ;;  %v8484_v48 = vsub.f32 %v2980_v25, %v8461_v18  ;;  %v8487_v11 = vsub.f32 %v2983_v42, %v8461_v18 }
 0x417   : > { %v8490_v33 = vsub.f32 %v2988_v22, %v8461_v18  ;;  %v8493_v32 = vsub.f32 %v2991_v51, %v8461_v18  ;;  %v8497_v31 = vsub.f32 %v8295_v24, %v8461_v18  ;;  %v8501_v1 = vsub.f32 %v8299_v14, %v8461_v18 }
 0x418   : > { %v8505_v34 = vsub.f32 %v8303_v61, %v8461_v18  ;;  %v8509_v25 = vsub.f32 %v8307_v56, %v8461_v18  ;;  %v8517_v24 = vsub.f32 %v8311_v16, %v8461_v18  ;;  %v8523_v61 = vsub.f32 %v8315_v26, %v8461_v18 }
 0x419   : > { %v3096_v42 = vmul.f32 %v8497_v31, %v8497_v31  ;;  %v3097_v40 = vmul.f32 %v8501_v1, %v8501_v1  ;;  %v8531_v13 = vsub.f32 %v8319_v4, %v8461_v18  ;;  %v8538_v26 = vsub.f32 %v8325_v49, %v8461_v18 }
 0x41a   : > { %v3098_v14 = vmul.f32 %v8505_v34, %v8505_v34  ;;  %v3099_v56 = vmul.f32 %v8509_v25, %v8509_v25  ;;  %v3100_v16 = vmul.f32 %v8517_v24, %v8517_v24  ;;  %v3101_v53 = vmul.f32 %v8523_v61, %v8523_v61 }
 0x41b   : > { %v3128_v45 = vsel %vm1093_vm1, %v3096_v42, 0.0  ;;  %v3129_v30 = vsel %vm1093_vm1, %v3097_v40, 0.0  ;;  %v8545_v4 = vsub.f32 %v8335_v58, %v8461_v18  ;;  %v3102_v3 = vmul.f32 %v8531_v13, %v8531_v13 }
 0x41c   : > { %v3130_v35 = vadd.f32 %v3129_v30, %v3128_v45  ;;  %v3131_v36 = vsel %vm1093_vm1, %v3098_v14, 0.0  ;;  %v3133_v22 = vsel %vm1093_vm1, %v3099_v56, 0.0  ;;  %v3135_v51 = vsel %vm1093_vm1, %v3100_v16, 0.0 }
 0x41d   : > { %v8552_v49 = vsub.f32 %v8341_v29, %v8461_v18  ;;  %v3103_v52 = vmul.f32 %v8538_v26, %v8538_v26  ;;  %v3137_v47 = vsel %vm1093_vm1, %v3101_v53, 0.0  ;;  %v8559_v58 = vsub.f32 %v8349_v59, %v8461_v18 }
 0x41e   : > { %v3132_v12 = vadd.f32 %v3131_v36, %v3130_v35  ;;  %v3104_v60 = vmul.f32 %v8545_v4, %v8545_v4  ;;  %v3139_v19 = vsel %vm1093_vm1, %v3102_v3, 0.0  ;;  %v8566_v29 = vsub.f32 %v8353_v7, %v8461_v18 }
 0x41f   : > { %v3105_v2 = vmul.f32 %v8552_v49, %v8552_v49  ;;  %v3141_v9 = vsel %vm1093_vm1, %v3103_v52, 0.0  ;;  %v8573_v59 = vsub.f32 %v8361_v55, %v8461_v18  ;;  %v3106_v40 = vmul.f32 %v8559_v58, %v8559_v58 }
 0x420   : > { %v3134_v63 = vadd.f32 %v3133_v22, %v3132_v12  ;;  %v3143_v14 = vsel %vm1093_vm1, %v3104_v60, 0.0  ;;  %v8580_v7 = vsub.f32 %v8367_v10, %v8461_v18  ;;  %v3107_v45 = vmul.f32 %v8566_v29, %v8566_v29 }
 0x421   : > { %v3145_v30 = vsel %vm1093_vm1, %v3105_v2, 0.0  ;;  %v8587_v55 = vsub.f32 %v8375_v5, %v8461_v18  ;;  %v3108_v16 = vmul.f32 %v8573_v59, %v8573_v59  ;;  %v3147_v36 = vsel %vm1093_vm1, %v3106_v40, 0.0 }
 0x422   : > { %v3136_v44 = vadd.f32 %v3135_v51, %v3134_v63  ;;  %v8594_v10 = vsub.f32 %v8381_v8, %v8461_v18  ;;  %v3109_v53 = vmul.f32 %v8580_v7, %v8580_v7  ;;  %v3149_v22 = vsel %vm1093_vm1, %v3107_v45, 0.0 }
 0x423   : > { %v8601_v5 = vsub.f32 %v8389_v50, %v8461_v18  ;;  %v3110_v3 = vmul.f32 %v8587_v55, %v8587_v55  ;;  %v3151_v51 = vsel %vm1093_vm1, %v3108_v16, 0.0  ;;  %v8608_v8 = vsub.f32 %v8393_v54, %v8461_v18 }
 0x424   : > { %v3138_v20 = vadd.f32 %v3137_v47, %v3136_v44  ;;  %v3111_v52 = vmul.f32 %v8594_v10, %v8594_v10  ;;  %v3153_v47 = vsel %vm1093_vm1, %v3109_v53, 0.0  ;;  %v8615_v50 = vsub.f32 %v8401_v62, %v8461_v18 }
 0x425   : > { %v3112_v60 = vmul.f32 %v8601_v5, %v8601_v5  ;;  %v8622_v54 = vsub.f32 %v8407_v57, %v8461_v18  ;;  %v3113_v2 = vmul.f32 %v8608_v8, %v8608_v8  ;;  %v8629_v62 = vsub.f32 %v8415_v6, %v8461_v18 }
 0x426   : > { %v3140_v46 = vadd.f32 %v3139_v19, %v3138_v20  ;;  %v3155_v19 = vsel %vm1093_vm1, %v3110_v3, 0.0  ;;  %v3114_v40 = vmul.f32 %v8615_v50, %v8615_v50  ;;  %v8636_v57 = vsub.f32 %v8421_v27, %v8461_v18 }
 0x427   : > { %v3115_v45 = vmul.f32 %v8622_v54, %v8622_v54  ;;  %v3116_v6 = vmul.f32 %v8629_v62, %v8629_v62  ;;  %v3118_v27 = vmul.f32 %v8465_v21, %v8465_v21  ;;  %v3119_v3 = vmul.f32 %v8469_v41, %v8469_v41 }
 0x428   : > { %v3142_v42 = vadd.f32 %v3141_v9, %v3140_v46  ;;  %v3157_v9 = vsel %vm1093_vm1, %v3111_v52, 0.0  ;;  %v3163_v16 = vsel %vm1093_vm1, %v3114_v40, 0.0  ;;  %v3120_v52 = vmul.f32 %v8472_v38, %v8472_v38 }
 0x429   : > { %v3165_v53 = vsel %vm1093_vm1, %v3115_v45, 0.0  ;;  %v3167_v18 = vsel %vm1093_vm1, %v3116_v6, 0.0  ;;  %v3123_v40 = vmul.f32 %v8481_v23, %v8481_v23  ;;  %v3124_v45 = vmul.f32 %v8484_v48, %v8484_v48 }
 0x42a   : > { %v3144_v56 = vadd.f32 %v3143_v14, %v3142_v42  ;;  %v3159_v14 = vsel %vm1093_vm1, %v3112_v60, 0.0  ;;  %v3121_v60 = vmul.f32 %v8475_v17, %v8475_v17  ;;  %v3125_v6 = vmul.f32 %v8487_v11, %v8487_v11 }
 0x42c   : > { %v3146_v35 = vadd.f32 %v3145_v30, %v3144_v56  ;;  %v3161_v30 = vsel %vm1093_vm1, %v3113_v2, 0.0  ;;  %v3122_v2 = vmul.f32 %v8478_v0, %v8478_v0 }
 0x42e   : > { %v3148_v12 = vadd.f32 %v3147_v36, %v3146_v35 }
 0x430   : > { %v3150_v63 = vadd.f32 %v3149_v22, %v3148_v12  ;;  %v3117_v12 = vmul.f32 %v8636_v57, %v8636_v57 }
 0x432   : > { %v3152_v44 = vadd.f32 %v3151_v51, %v3150_v63  ;;  %v3169_v51 = vsel %vm1093_vm1, %v3117_v12, 0.0  ;;  %v3126_v12 = vmul.f32 %v8490_v33, %v8490_v33 }
 0x434   : > { %v3154_v20 = vadd.f32 %v3153_v47, %v3152_v44  ;;  %v3171_v47 = vsel %vm1093_vm1, %v3118_v27, 0.0  ;;  %v3127_v27 = vmul.f32 %v8493_v32, %v8493_v32 }
 0x436   : > { %v3156_v46 = vadd.f32 %v3155_v19, %v3154_v20  ;;  %v3173_v19 = vsel %vm1093_vm1, %v3119_v3, 0.0  ;;  %v6016_v3 = vld [vmem:[#allocation9 + $0x80] sm:$0xff]  }
 0x438   : > { %v3158_v42 = vadd.f32 %v3157_v9, %v3156_v46  ;;  %v3175_v9 = vsel %vm1093_vm1, %v3120_v52, 0.0 }
 0x43a   : > { %v3160_v56 = vadd.f32 %v3159_v14, %v3158_v42  ;;  %v3177_v14 = vsel %vm1093_vm1, %v3121_v60, 0.0 }
 0x43c   : > { %v3162_v35 = vadd.f32 %v3161_v30, %v3160_v56  ;;  %v3179_v30 = vsel %vm1093_vm1, %v3122_v2, 0.0 }
 0x43e   : > { %v3164_v36 = vadd.f32 %v3163_v16, %v3162_v35  ;;  %v3181_v16 = vsel %vm1093_vm1, %v3123_v40, 0.0  ;;  %v6018_v40 = vld [vmem:[#allocation9 + $0x88] sm:$0xff]  }
 0x440   : > { %v3166_v22 = vadd.f32 %v3165_v53, %v3164_v36  ;;  %v3183_v53 = vsel %vm1093_vm1, %v3124_v45, 0.0 }
 0x442   : > { %v3168_v63 = vadd.f32 %v3167_v18, %v3166_v22  ;;  %v3185_v18 = vsel %vm1093_vm1, %v3125_v6, 0.0  ;;  %v6020_v6 = vld [vmem:[#allocation9 + $0x90] sm:$0xff]  }
 0x444   : > { %v3170_v44 = vadd.f32 %v3169_v51, %v3168_v63  ;;  %v6015_v63 = vld [vmem:[#allocation9 + $0xc0] sm:$0xff]  }
 0x445   : > { %5536 = vmatprep.subr.bf16.mxu1 %v6015_v63 }
 0x446   : > { %v3172_v20 = vadd.f32 %v3171_v47, %v3170_v44  ;;  %v3187_v44 = vsel %vm1093_vm1, %v3126_v12, 0.0  ;;  %5537 = vmatpush3.bf16.msra.mxu1 %v6016_v3  ;;  %v3189_v47 = vsel %vm1093_vm1, %v3127_v27, 0.0 }
 0x448   : > { %v3174_v46 = vadd.f32 %v3173_v19, %v3172_v20 }
 0x44a   : > { %v3176_v42 = vadd.f32 %v3175_v9, %v3174_v46 }
 0x44c   : > { %v3178_v56 = vadd.f32 %v3177_v14, %v3176_v42  ;;  %v6017_v42 = vld [vmem:[#allocation9 + $0xc8] sm:$0xff]  }
 0x44d   : > { %5538 = vmatprep.subr.bf16.mxu1 %v6017_v42 }
 0x44e   : > { %v3180_v35 = vadd.f32 %v3179_v30, %v3178_v56  ;;  %5539 = vmatpush3.bf16.msra.mxu1 %v6018_v40  ;;  %v3311_v30 = vadd.f32 1.0, %v8255_v28 }
 0x450   : > { %v3182_v36 = vadd.f32 %v3181_v16, %v3180_v35  ;;  %v6019_v35 = vld [vmem:[#allocation9 + $0xd0] sm:$0xff]  }
 0x451   : > { %5540 = vmatprep.subr.bf16.mxu1 %v6019_v35 }
 0x452   : > { %v3184_v22 = vadd.f32 %v3183_v53, %v3182_v36  ;;  %v8681_v36 = vrot.slane %v3311_v30, %v10080_v15  ;;  %5541 = vmatpush3.bf16.msra.mxu1 %v6020_v6 }
 0x454   : > { %v3186_v51 = vadd.f32 %v3185_v18, %v3184_v22 }
 0x456   : > { %v3188_v52 = vadd.f32 %v3187_v44, %v3186_v51  ;;  %v8695_v51 = vpop.permute.xlu0 %3353 }
 0x458   : > { %v3190_v20 = vadd.f32 %v3189_v47, %v3188_v52 }
 0x45a   : > { %v3191_v60 = vrot.slane %v3190_v20, 4 }
 0x45c   : > { %v3192_v19 = vadd.f32 %v3191_v60, %v3190_v20  ;;  %v6021_v20 = vld [vmem:[#allocation9 + $0x40] sm:$0xff]  }
 0x45d   : > { %5424 = vmatprep.subr.bf16.mxu0 %v6021_v20  ;;  %v6038_v20 = vld [vmem:[#allocation9 + $0xa0] sm:$0xff]  }
 0x45e   : > { %v3193_v46 = vrot.slane %v3192_v19, 2 }
 0x460   : > { %v3194_v2 = vadd.f32 %v3193_v46, %v3192_v19  ;;  %v6024_v46 = vld [vmem:[#allocation9 + $0x8] sm:$0xff]  }
 0x462   : > { %v3195_v9 = vrot.slane %v3194_v2, 1 }
 0x464   : > { %v3196_v14 = vadd.f32 %v3195_v9, %v3194_v2 }
 0x466   : > { %v3197_v56 = vmul.f32 0.00390625, %v3196_v14 }
 0x468   : > { %v3198_v45 = vadd.f32 1e-05, %v3197_v56 }
 0x46a   : > { %6053 = vrsqrt.f32 %v3198_v45 }
 0x474   : > { %v6054_v16 = vpop.eup %6053 }
 0x475   : > { %v3231_v12 = vmul.f32 %v6054_v16, %v8493_v32  ;;  %v3200_v53 = vmul.f32 %v6054_v16, %v8497_v31  ;;  %v3201_v22 = vmul.f32 %v6054_v16, %v8501_v1  ;;  %v3202_v27 = vmul.f32 %v6054_v16, %v8505_v34 }
 0x476   : > { %v3203_v18 = vmul.f32 %v6054_v16, %v8509_v25  ;;  %v3204_v63 = vmul.f32 %v6054_v16, %v8517_v24  ;;  %v3205_v28 = vmul.f32 %v6054_v16, %v8523_v61  ;;  %v3206_v3 = vmul.f32 %v6054_v16, %v8531_v13 }
 0x477   : > { %v3347_v15 = vmul.f32 %v8681_v36, %v3231_v12  ;;  %v3207_v32 = vmul.f32 %v6054_v16, %v8538_v26  ;;  %v3208_v31 = vmul.f32 %v6054_v16, %v8545_v4  ;;  %v3209_v1 = vmul.f32 %v6054_v16, %v8552_v49 }
 0x478   : > { %v3210_v34 = vmul.f32 %v6054_v16, %v8559_v58  ;;  %v3211_v25 = vmul.f32 %v6054_v16, %v8566_v29  ;;  %v3212_v24 = vmul.f32 %v6054_v16, %v8573_v59  ;;  %v3213_v61 = vmul.f32 %v6054_v16, %v8580_v7 }
 0x479   : > { %v3387_v13 = vadd.f32 %v8695_v51, %v3347_v15  ;;  %v3214_v44 = vmul.f32 %v6054_v16, %v8587_v55  ;;  %v3215_v26 = vmul.f32 %v6054_v16, %v8594_v10  ;;  %v3216_v4 = vmul.f32 %v6054_v16, %v8601_v5  ;;  %v6022_v55 = vld [vmem:[#allocation9] sm:$0xff]  }
 0x47a   : > { %v3217_v49 = vmul.f32 %v6054_v16, %v8608_v8  ;;  %v3218_v52 = vmul.f32 %v6054_v16, %v8615_v50  ;;  %v3219_v58 = vmul.f32 %v6054_v16, %v8622_v54  ;;  %v3220_v29 = vmul.f32 %v6054_v16, %v8629_v62  ;;  %5425 = vmatpush3.bf16.msra.mxu0 %v6022_v55 }
 0x47b   : > { %vm3419_vm0 = vcmp.ge.f32.partialorder %v3387_v13, 0.0  ;;  %v3451_v59 = vmul.f32 0.2, %v3387_v13  ;;  %v3221_v7 = vmul.f32 %v6054_v16, %v8636_v57  ;;  %v3222_v47 = vmul.f32 %v6054_v16, %v8465_v21  ;;  %v6023_v57 = vld [vmem:[#allocation9 + $0x48] sm:$0xff]  }
 0x47c   : > { %v3223_v10 = vmul.f32 %v6054_v16, %v8469_v41  ;;  %v3224_v5 = vmul.f32 %v6054_v16, %v8472_v38  ;;  %v3225_v8 = vmul.f32 %v6054_v16, %v8475_v17  ;;  %v3226_v50 = vmul.f32 %v6054_v16, %v8478_v0  ;;  %5426 = vmatprep.subr.bf16.mxu0 %v6023_v57  ;;  %v6035_v57 = vld [vmem:[#allocation9 + $0x70] sm:$0xff]  }
 0x47d   : > { %v3483_v60 = vsel %vm3419_vm0, %v3387_v13, %v3451_v59  ;;  %v3227_v54 = vmul.f32 %v6054_v16, %v8481_v23  ;;  %v3228_v62 = vmul.f32 %v6054_v16, %v8484_v48  ;;  %v3229_v19 = vmul.f32 %v6054_v16, %v8487_v11 }
 0x47e   : > { %3521 = vst.msk [vmem:[#allocation3 + $0x110] sm:$0xff] %vm1093_vm1, %v3483_v60  ;;  %v3230_v21 = vmul.f32 %v6054_v16, %v8490_v33  ;;  %v3316_v41 = vmul.f32 %v8681_v36, %v3200_v53  ;;  %v3317_v38 = vmul.f32 %v8681_v36, %v3201_v22  ;;  %v3318_v17 = vmul.f32 %v8681_v36, %v3202_v27 }
 0x47f   : > { %v3319_v0 = vmul.f32 %v8681_v36, %v3203_v18  ;;  %v3320_v23 = vmul.f32 %v8681_v36, %v3204_v63  ;;  %v3321_v48 = vmul.f32 %v8681_v36, %v3205_v28  ;;  %v3322_v11 = vmul.f32 %v8681_v36, %v3206_v3  ;;  %5427 = vmatpush3.bf16.msra.mxu0 %v6024_v46  ;;  %v6025_v18 = vld [vmem:[#allocation9 + $0x50] sm:$0xff]   ;;  %v6027_v28 = vld [vmem:[#allocation9 + $0xd8] sm:$0xff]  }
 0x480   : > { %v3323_v2 = vmul.f32 %v8681_v36, %v3207_v32  ;;  %v3324_v33 = vmul.f32 %v8681_v36, %v3208_v31  ;;  %v3325_v9 = vmul.f32 %v8681_v36, %v3209_v1  ;;  %v3326_v42 = vmul.f32 %v8681_v36, %v3210_v34  ;;  %v6026_v63 = vld [vmem:[#allocation9 + $0x10] sm:$0xff]   ;;  %v6028_v1 = vld [vmem:[#allocation9 + $0x98] sm:$0xff]   ;;  %5428 = vmatprep.subr.bf16.mxu0 %v6025_v18 }
 0x481   : > { %v3327_v40 = vmul.f32 %v8681_v36, %v3211_v25  ;;  %v3328_v14 = vmul.f32 %v8681_v36, %v3212_v24  ;;  %v3329_v56 = vmul.f32 %v8681_v36, %v3213_v61  ;;  %v8735_v45 = vmul.f32 %v8681_v36, %v3214_v44  ;;  %5542 = vmatprep.subr.bf16.mxu1 %v6027_v28  ;;  %v10087_v28 = vld [vmem:[#allocation23_spill] sm:$0xff] }
 0x482   : > { %v3331_v30 = vmul.f32 %v8681_v36, %v3215_v26  ;;  %v3332_v35 = vmul.f32 %v8681_v36, %v3216_v4  ;;  %v3333_v6 = vmul.f32 %v8681_v36, %v3217_v49  ;;  %v8741_v16 = vmul.f32 %v8681_v36, %v3218_v52  ;;  %v6029_v26 = vld [vmem:[#allocation9 + $0x58] sm:$0xff]   ;;  %v6031_v49 = vld [vmem:[#allocation9 + $0x60] sm:$0xff]   ;;  %5543 = vmatpush3.bf16.msra.mxu1 %v6028_v1 }
 0x483   : > { %v8744_v12 = vmul.f32 %v8681_v36, %v3219_v58  ;;  %v8747_v53 = vmul.f32 %v8681_v36, %v3220_v29  ;;  %v8750_v22 = vmul.f32 %v8681_v36, %v3221_v7  ;;  %v8753_v27 = vmul.f32 %v8681_v36, %v3222_v47  ;;  %5429 = vmatpush3.bf16.msra.mxu0 %v6026_v63  ;;  %v6030_v4 = vld [vmem:[#allocation9 + $0x18] sm:$0xff]   ;;  %v6037_v7 = vld [vmem:[#allocation9 + $0xe0] sm:$0xff]   ;;  %v6033_v47 = vld [vmem:[#allocation9 + $0x68] sm:$0xff]  }
 0x484   : > { %v3339_v3 = vmul.f32 %v8681_v36, %v3223_v10  ;;  %v3340_v15 = vmul.f32 %v8681_v36, %v3224_v5  ;;  %v3341_v32 = vmul.f32 %v8681_v36, %v3225_v8  ;;  %v8759_v31 = vmul.f32 %v8681_v36, %v3226_v50  ;;  %5430 = vmatprep.subr.bf16.mxu0 %v6029_v26  ;;  %v6040_v1 = vld [vmem:[#allocation9 + $0x38] sm:$0xff]  }
 0x485   : > { %v3343_v34 = vmul.f32 %v8681_v36, %v3227_v54  ;;  %v3344_v25 = vmul.f32 %v8681_v36, %v3228_v62  ;;  %v3345_v24 = vmul.f32 %v8681_v36, %v3229_v19  ;;  %v8765_v61 = vmul.f32 %v8681_v36, %v3230_v21  ;;  %v6032_v36 = vld [vmem:[#allocation9 + $0x20] sm:$0xff]   ;;  %5544 = vmatprep.subr.bf16.mxu1 %v6037_v7 }
 0x486   : > { %v3356_v13 = vadd.f32 %v8695_v51, %v3316_v41  ;;  %v3357_v44 = vadd.f32 %v8695_v51, %v3317_v38  ;;  %v8772_v55 = vadd.f32 %v8695_v51, %v3318_v17  ;;  %v8775_v10 = vadd.f32 %v8695_v51, %v3319_v0  ;;  %5545 = vmatpush3.bf16.msra.mxu1 %v6038_v20  ;;  %v6034_v17 = vld [vmem:[#allocation9 + $0x28] sm:$0xff]  }
 0x487   : > { %5431 = vmatpush3.bf16.msra.mxu0 %v6030_v4  ;;  %v8778_v5 = vadd.f32 %v8695_v51, %v3320_v23  ;;  %v8781_v8 = vadd.f32 %v8695_v51, %v3321_v48  ;;  %v8784_v50 = vadd.f32 %v8695_v51, %v3322_v11  ;;  %v8787_v60 = vadd.f32 %v8695_v51, %v3323_v2 }
 0x488   : > { %vm3388_vm9 = vcmp.ge.f32.partialorder %v3356_v13, 0.0  ;;  %vm3389_vm10 = vcmp.ge.f32.partialorder %v3357_v44, 0.0  ;;  %v3420_v52 = vmul.f32 0.2, %v3356_v13  ;;  %v3421_v58 = vmul.f32 0.2, %v3357_v44  ;;  %5432 = vmatprep.subr.bf16.mxu0 %v6031_v49 }
 0x489   : > { %v8790_v54 = vadd.f32 %v8695_v51, %v3324_v33  ;;  %v8793_v62 = vadd.f32 %v8695_v51, %v3325_v9  ;;  %v8796_v19 = vadd.f32 %v8695_v51, %v3326_v42  ;;  %v8799_v21 = vadd.f32 %v8695_v51, %v3327_v40 }
 0x48a   : > { %v3452_v29 = vsel %vm3388_vm9, %v3356_v13, %v3420_v52  ;;  %v3453_v59 = vsel %vm3389_vm10, %v3357_v44, %v3421_v58  ;;  %v8802_v41 = vadd.f32 %v8695_v51, %v3328_v14  ;;  %v8805_v38 = vadd.f32 %v8695_v51, %v3329_v56 }
 0x48b   : > { %3490 = vst.msk [vmem:[#allocation3 + $0x18] sm:$0xff] %vm1093_vm1, %v3452_v29  ;;  %3491 = vst.msk [vmem:[#allocation3 + $0x20] sm:$0xff] %vm1093_vm1, %v3453_v59  ;;  %5433 = vmatpush3.bf16.msra.mxu0 %v6032_v36  ;;  %v8809_v0 = vadd.f32 %v8695_v51, %v8735_v45  ;;  %v8812_v23 = vadd.f32 %v8695_v51, %v3331_v30  ;;  %v8815_v48 = vadd.f32 %v8695_v51, %v3332_v35  ;;  %v6036_v45 = vld [vmem:[#allocation9 + $0x30] sm:$0xff]  }
 0x48c   : > { %v8818_v11 = vadd.f32 %v8695_v51, %v3333_v6  ;;  %5434 = vmatprep.subr.bf16.mxu0 %v6033_v47  ;;  %v8822_v46 = vadd.f32 %v8695_v51, %v8741_v16  ;;  %v8826_v2 = vadd.f32 %v8695_v51, %v8744_v12  ;;  %v8830_v33 = vadd.f32 %v8695_v51, %v8747_v53 }
 0x48d   : > { %v8834_v9 = vadd.f32 %v8695_v51, %v8750_v22  ;;  %v8838_v42 = vadd.f32 %v8695_v51, %v8753_v27  ;;  %v8841_v40 = vadd.f32 %v8695_v51, %v3339_v3  ;;  %v8844_v14 = vadd.f32 %v8695_v51, %v3340_v15  ;;  %v6039_v15 = vld [vmem:[#allocation9 + $0x78] sm:$0xff]  }
 0x48e   : > { %v8847_v56 = vadd.f32 %v8695_v51, %v3341_v32  ;;  %v8851_v6 = vadd.f32 %v8695_v51, %v8759_v31  ;;  %v8854_v16 = vadd.f32 %v8695_v51, %v3343_v34  ;;  %v8857_v12 = vadd.f32 %v8695_v51, %v3344_v25  ;;  %v10088_v32 = vld [vmem:[#allocation52_spill] sm:$0xff]  ;;  %v8890_v25 = vld [vmem:[#allocation9 + $0x100] sm:$0xff]  }
 0x48f   : > { %v8860_v53 = vadd.f32 %v8695_v51, %v3345_v24  ;;  %5435 = vmatpush3.bf16.msra.mxu0 %v6034_v17  ;;  %v8866_v18 = vadd.f32 %v8695_v51, %v8765_v61  ;;  %vm3390_vm11 = vcmp.ge.f32.partialorder %v8772_v55, 0.0  ;;  %vm3391_vm12 = vcmp.ge.f32.partialorder %v8775_v10, 0.0 }
 0x490   : > { %5436 = vmatprep.subr.bf16.mxu0 %v6035_v57  ;;  %vm3392_vm13 = vcmp.ge.f32.partialorder %v8778_v5, 0.0  ;;  %vm3393_vm14 = vcmp.ge.f32.partialorder %v8781_v8, 0.0  ;;  %vm3394_vm15 = vcmp.ge.f32.partialorder %v8784_v50, 0.0  ;;  %vm3395_vm3 = vcmp.ge.f32.partialorder %v8787_v60, 0.0 }
 0x491   : > { %vm3396_vm4 = vcmp.ge.f32.partialorder %v8790_v54, 0.0  ;;  %vm3397_vm5 = vcmp.ge.f32.partialorder %v8793_v62, 0.0  ;;  %v3422_v34 = vmul.f32 0.2, %v8772_v55  ;;  %vm3405_vm8 = vcmp.ge.f32.partialorder %v8818_v11, 0.0 }
 0x492   : > { %v3614_v30 = vld [vmem:[#allocation3 + $0x18] sm:$0xff]  ;;  %v3615_v35 = vld [vmem:[#allocation3 + $0x20] sm:$0xff]  ;;  %vm3406_vm7 = vcmp.ge.f32.partialorder %v8822_v46, 0.0  ;;  %v3423_v24 = vmul.f32 0.2, %v8775_v10  ;;  %vm3411_vm6 = vcmp.ge.f32.partialorder %v8841_v40, 0.0 }
 0x493   : > { %v3524_v22 = vld [vmem:[#allocation3 + $0x17] sm:$0xff]  ;;  %v8862_v27 = vpack.c.bf16 %v3615_v35, %v3614_v30  ;;  %v3525_v63 = vld [vmem:[#allocation3 + $0x1f] sm:$0xff]  ;;  %5437 = vmatpush3.bf16.msra.mxu0 %v6036_v45  ;;  %v3424_v61 = vmul.f32 0.2, %v8778_v5  ;;  %v3425_v13 = vmul.f32 0.2, %v8781_v8  ;;  %v3454_v49 = vsel %vm3390_vm11, %v8772_v55, %v3422_v34 }
 0x494   : > { %v3560_v3 = vmul.f32 %v3524_v22, %v10087_v28  ;;  %v3561_v31 = vmul.f32 %v3525_v63, %v10088_v32  ;;  %5438 = vmatprep.subr.bf16.mxu0 %v6039_v15  ;;  %v3426_v44 = vmul.f32 0.2, %v8784_v50  ;;  %v3427_v26 = vmul.f32 0.2, %v8787_v60  ;;  %3492 = vst.msk [vmem:[#allocation3 + $0x28] sm:$0xff] %vm1093_vm1, %v3454_v49 }
 0x495   : > { %3774 = vrot.lane.b32.xlu0 %v8862_v27, %s6238_s15  ;;  %v3428_v4 = vmul.f32 0.2, %v8790_v54  ;;  %vm3412_vm2 = vcmp.ge.f32.partialorder %v8844_v14, 0.0  ;;  %vm3415_vm0 = vcmp.ge.f32.partialorder %v8854_v16, 0.0  ;;  %v3429_v52 = vmul.f32 0.2, %v8793_v62 }
 0x496   : > { %v8880_v51 = vpack.c.bf16 %v3561_v31, %v3560_v3  ;;  %v3430_v58 = vmul.f32 0.2, %v8796_v19  ;;  %v3431_v29 = vmul.f32 0.2, %v8799_v21  ;;  %v3455_v59 = vsel %vm3391_vm12, %v8775_v10, %v3423_v24 }
 0x497   : > { %5439 = vmatpush3.bf16.msra.mxu0 %v6040_v1  ;;  %vm3416_vm11 = vcmp.ge.f32.partialorder %v8857_v12, 0.0  ;;  %vm3417_vm10 = vcmp.ge.f32.partialorder %v8860_v53, 0.0  ;;  %vm3418_vm9 = vcmp.ge.f32.partialorder %v8866_v18, 0.0  ;;  %v3432_v36 = vmul.f32 0.2, %v8802_v41  ;;  %3493 = vst.msk [vmem:[#allocation3 + $0x30] sm:$0xff] %vm1093_vm1, %v3455_v59 }
 0x498   : > { %3820 = vrot.lane.b32.xlu1 %v8880_v51, %s6238_s15  ;;  %v3433_v7 = vmul.f32 0.2, %v8805_v38  ;;  %v3434_v47 = vmul.f32 0.2, %v8809_v0  ;;  %v3456_v20 = vsel %vm3392_vm13, %v8778_v5, %v3424_v61  ;;  %5778 = vmatprep.subr.bf16.mxu0 %v8890_v25  ;;  %v3435_v55 = vmul.f32 0.2, %v8812_v23 }
 0x499   : > { %v3436_v10 = vmul.f32 0.2, %v8815_v48  ;;  %v3437_v17 = vmul.f32 0.2, %v8818_v11  ;;  %v3457_v57 = vsel %vm3393_vm14, %v8781_v8, %v3425_v13  ;;  %3494 = vst.msk [vmem:[#allocation3 + $0x38] sm:$0xff] %vm1093_vm1, %v3456_v20  ;;  %v3458_v35 = vsel %vm3394_vm15, %v8784_v50, %v3426_v44 }
 0x49a   : > { %v3438_v45 = vmul.f32 0.2, %v8822_v46  ;;  %v3439_v30 = vmul.f32 0.2, %v8826_v2  ;;  %v3440_v5 = vmul.f32 0.2, %v8830_v33  ;;  %v3459_v28 = vsel %vm3395_vm3, %v8787_v60, %v3427_v26 }
 0x49b   : > { %3495 = vst.msk [vmem:[#allocation3 + $0x40] sm:$0xff] %vm1093_vm1, %v3457_v57  ;;  %v3441_v22 = vmul.f32 0.2, %v8834_v9  ;;  %v3442_v63 = vmul.f32 0.2, %v8838_v42  ;;  %3496 = vst.msk [vmem:[#allocation3 + $0x48] sm:$0xff] %vm1093_vm1, %v3458_v35  ;;  %v3460_v32 = vsel %vm3396_vm4, %v8790_v54, %v3428_v4  ;;  %v3461_v34 = vsel %vm3397_vm5, %v8793_v62, %v3429_v52 }
 0x49c   : > { %v3443_v8 = vmul.f32 0.2, %v8841_v40  ;;  %v3444_v3 = vmul.f32 0.2, %v8844_v14  ;;  %v3445_v15 = vmul.f32 0.2, %v8847_v56 }
 0x49d   : > { %v3446_v50 = vmul.f32 0.2, %v8851_v6  ;;  %3497 = vst.msk [vmem:[#allocation3 + $0x50] sm:$0xff] %vm1093_vm1, %v3459_v28  ;;  %v3447_v31 = vmul.f32 0.2, %v8854_v16  ;;  %3498 = vst.msk [vmem:[#allocation3 + $0x58] sm:$0xff] %vm1093_vm1, %v3460_v32 }
 0x49e   : > { %v3448_v1 = vmul.f32 0.2, %v8857_v12  ;;  %v3449_v60 = vmul.f32 0.2, %v8860_v53  ;;  %v3450_v24 = vmul.f32 0.2, %v8866_v18  ;;  %v3475_v49 = vsel %vm3411_vm6, %v8841_v40, %v3443_v8 }
 0x49f   : > { %v3616_v61 = vld [vmem:[#allocation3 + $0x28] sm:$0xff]  ;;  %vm10089_vm12 = vcmp.ge.f32.partialorder %v8796_v19, 0.0  ;;  %vm10090_vm13 = vcmp.ge.f32.partialorder %v8799_v21, 0.0  ;;  %vm10091_vm14 = vcmp.ge.f32.partialorder %v8802_v41, 0.0  ;;  %3499 = vst.msk [vmem:[#allocation3 + $0x60] sm:$0xff] %vm1093_vm1, %v3461_v34  ;;  %v3617_v62 = vld [vmem:[#allocation3 + $0x30] sm:$0xff] }
 0x4a0   : > { %v3462_v54 = vsel %vm10089_vm12, %v8796_v19, %v3430_v58  ;;  %v3463_v13 = vsel %vm10090_vm13, %v8799_v21, %v3431_v29  ;;  %v3464_v44 = vsel %vm10091_vm14, %v8802_v41, %v3432_v36  ;;  %vm10092_vm15 = vcmp.ge.f32.partialorder %v8805_v38, 0.0  ;;  %v3527_v52 = vld [vmem:[#allocation3 + $0x2f] sm:$0xff]  ;;  %3513 = vst.msk [vmem:[#allocation3 + $0xd0] sm:$0xff] %vm1093_vm1, %v3475_v49  ;;  %v3528_v36 = vld [vmem:[#allocation3 + $0x37] sm:$0xff] }
 0x4a1   : > { %v3465_v26 = vsel %vm10092_vm15, %v8805_v38, %v3433_v7  ;;  %vm10093_vm3 = vcmp.ge.f32.partialorder %v8809_v0, 0.0  ;;  %vm10094_vm4 = vcmp.ge.f32.partialorder %v8812_v23, 0.0  ;;  %vm10095_vm5 = vcmp.ge.f32.partialorder %v8815_v48, 0.0  ;;  %3500 = vst.msk [vmem:[#allocation3 + $0x68] sm:$0xff] %vm1093_vm1, %v3462_v54  ;;  %3501 = vst.msk [vmem:[#allocation3 + $0x70] sm:$0xff] %vm1093_vm1, %v3463_v13  ;;  %v10103_v7 = vld [vmem:[#allocation42_spill] sm:$0xff] }
 0x4a2   : > { %v3466_v4 = vsel %vm10093_vm3, %v8809_v0, %v3434_v47  ;;  %v3467_v19 = vsel %vm10094_vm4, %v8812_v23, %v3435_v55  ;;  %v3468_v21 = vsel %vm10095_vm5, %v8815_v48, %v3436_v10  ;;  %3502 = vst.msk [vmem:[#allocation3 + $0x78] sm:$0xff] %vm1093_vm1, %v3464_v44  ;;  %v8993_v41 = vpack.c.bf16 %v3617_v62, %v3616_v61  ;;  %v3526_v48 = vld [vmem:[#allocation3 + $0x27] sm:$0xff]  ;;  %v10105_v57 = vld [vmem:[#allocation59_spill] sm:$0xff] }
 0x4a3   : > { %v3469_v38 = vsel %vm3405_vm8, %v8818_v11, %v3437_v17  ;;  %v3470_v0 = vsel %vm3406_vm7, %v8822_v46, %v3438_v45  ;;  %vm10096_vm12 = vcmp.ge.f32.partialorder %v8826_v2, 0.0  ;;  %3503 = vst.msk [vmem:[#allocation3 + $0x80] sm:$0xff] %vm1093_vm1, %v3465_v26  ;;  %3504 = vst.msk [vmem:[#allocation3 + $0x88] sm:$0xff] %vm1093_vm1, %v3466_v4  ;;  %vm10097_vm8 = vcmp.ge.f32.partialorder %v8830_v33, 0.0  ;;  %v3619_v58 = vld [vmem:[#allocation3 + $0x40] sm:$0xff]  ;;  %v10106_v28 = vld [vmem:[#allocation27_spill] sm:$0xff] }
 0x4a4   : > { %v3471_v23 = vsel %vm10096_vm12, %v8826_v2, %v3439_v30  ;;  %3505 = vst.msk [vmem:[#allocation3 + $0x90] sm:$0xff] %vm1093_vm1, %v3467_v19  ;;  %3506 = vst.msk [vmem:[#allocation3 + $0x98] sm:$0xff] %vm1093_vm1, %v3468_v21  ;;  %v3472_v11 = vsel %vm10097_vm8, %v8830_v33, %v3440_v5  ;;  %vm10098_vm7 = vcmp.ge.f32.partialorder %v8834_v9, 0.0  ;;  %vm10099_vm13 = vcmp.ge.f32.partialorder %v8838_v42, 0.0  ;;  %v3618_v33 = vld [vmem:[#allocation3 + $0x38] sm:$0xff]  ;;  %3776 = vrot.lane.b32.xlu0 %v8993_v41, %s6238_s15  ;;  %v3621_v20 = vld [vmem:[#allocation3 + $0x50] sm:$0xff] }
 0x4a5   : > { %v3473_v46 = vsel %vm10098_vm7, %v8834_v9, %v3441_v22  ;;  %v3474_v2 = vsel %vm10099_vm13, %v8838_v42, %v3442_v63  ;;  %3507 = vst.msk [vmem:[#allocation3 + $0xa0] sm:$0xff] %vm1093_vm1, %v3469_v38  ;;  %3508 = vst.msk [vmem:[#allocation3 + $0xa8] sm:$0xff] %vm1093_vm1, %v3470_v0  ;;  %v3476_v9 = vsel %vm3412_vm2, %v8844_v14, %v3444_v3  ;;  %vm10100_vm14 = vcmp.ge.f32.partialorder %v8847_v56, 0.0  ;;  %v10104_v10 = vld [vmem:[#allocation25_spill] sm:$0xff]  ;;  %v3531_v5 = vld [vmem:[#allocation3 + $0x4f] sm:$0xff] }
 0x4a6   : > { %3509 = vst.msk [vmem:[#allocation3 + $0xb0] sm:$0xff] %vm1093_vm1, %v3471_v23  ;;  %v3477_v42 = vsel %vm10100_vm14, %v8847_v56, %v3445_v15  ;;  %vm10101_vm6 = vcmp.ge.f32.partialorder %v8851_v6, 0.0  ;;  %v3479_v29 = vsel %vm3415_vm0, %v8854_v16, %v3447_v31  ;;  %3510 = vst.msk [vmem:[#allocation3 + $0xb8] sm:$0xff] %vm1093_vm1, %v3472_v11  ;;  %v3480_v14 = vsel %vm3416_vm11, %v8857_v12, %v3448_v1  ;;  %v10102_v16 = vld [vmem:[#allocation36_spill] sm:$0xff]  ;;  %v3530_v30 = vld [vmem:[#allocation3 + $0x47] sm:$0xff] }
 0x4a7   : > { %v3478_v40 = vsel %vm10101_vm6, %v8851_v6, %v3446_v50  ;;  %3511 = vst.msk [vmem:[#allocation3 + $0xc0] sm:$0xff] %vm1093_vm1, %v3473_v46  ;;  %3512 = vst.msk [vmem:[#allocation3 + $0xc8] sm:$0xff] %vm1093_vm1, %v3474_v2  ;;  %v3481_v56 = vsel %vm3417_vm10, %v8860_v53, %v3449_v60  ;;  %v3482_v6 = vsel %vm3418_vm9, %v8866_v18, %v3450_v24  ;;  %v3529_v12 = vld [vmem:[#allocation3 + $0x3f] sm:$0xff]  ;;  %v3620_v18 = vld [vmem:[#allocation3 + $0x48] sm:$0xff] }
 0x4a8   : > { %v3562_v59 = vmul.f32 %v3526_v48, %v10102_v16  ;;  %3514 = vst.msk [vmem:[#allocation3 + $0xd8] sm:$0xff] %vm1093_vm1, %v3476_v9  ;;  %3515 = vst.msk [vmem:[#allocation3 + $0xe0] sm:$0xff] %vm1093_vm1, %v3477_v42  ;;  %v3563_v47 = vmul.f32 %v3527_v52, %v10103_v7  ;;  %v9059_v53 = vpack.c.bf16 %v3619_v58, %v3618_v33  ;;  %v3622_v22 = vld [vmem:[#allocation3 + $0x58] sm:$0xff]  ;;  %v3623_v63 = vld [vmem:[#allocation3 + $0x60] sm:$0xff] }
 0x4a9   : > { %3516 = vst.msk [vmem:[#allocation3 + $0xe8] sm:$0xff] %vm1093_vm1, %v3478_v40  ;;  %3517 = vst.msk [vmem:[#allocation3 + $0xf0] sm:$0xff] %vm1093_vm1, %v3479_v29  ;;  %v3564_v17 = vmul.f32 %v3528_v36, %v10104_v10  ;;  %v3565_v45 = vmul.f32 %v3529_v12, %v10105_v57  ;;  %v9069_v35 = vpack.c.bf16 %v3621_v20, %v3620_v18  ;;  %v10107_v15 = vld [vmem:[#allocation63_spill] sm:$0xff]  ;;  %v3533_v31 = vld [vmem:[#allocation3 + $0x5f] sm:$0xff] }
 0x4aa   : > { %3518 = vst.msk [vmem:[#allocation3 + $0xf8] sm:$0xff] %vm1093_vm1, %v3480_v14  ;;  %3519 = vst.msk [vmem:[#allocation3 + $0x100] sm:$0xff] %vm1093_vm1, %v3481_v56  ;;  %v9061_v55 = vpack.c.bf16 %v3563_v47, %v3562_v59  ;;  %3778 = vrot.lane.b32.xlu0 %v9059_v53, %s6238_s15  ;;  %v3566_v3 = vmul.f32 %v3530_v30, %v10106_v28  ;;  %v3567_v50 = vmul.f32 %v3531_v5, %v10107_v15  ;;  %v3532_v32 = vld [vmem:[#allocation3 + $0x57] sm:$0xff]  ;;  %v3624_v60 = vld [vmem:[#allocation3 + $0x68] sm:$0xff] }
 0x4ab   : > { %3520 = vst.msk [vmem:[#allocation3 + $0x108] sm:$0xff] %vm1093_vm1, %v3482_v6  ;;  %v9071_v8 = vpack.c.bf16 %v3565_v45, %v3564_v17  ;;  %v9079_v1 = vpack.c.bf16 %v3623_v63, %v3622_v22  ;;  %v3625_v34 = vld [vmem:[#allocation3 + $0x70] sm:$0xff]  ;;  %v10108_v61 = vld [vmem:[#allocation29_spill] sm:$0xff]  ;;  %v3626_v19 = vld [vmem:[#allocation3 + $0x78] sm:$0xff] }
 0x4ac   : > { %3822 = vrot.lane.b32.xlu1 %v9061_v55, %s6238_s15  ;;  %v9081_v24 = vpack.c.bf16 %v3567_v50, %v3566_v3  ;;  %v3568_v54 = vmul.f32 %v3532_v32, %v10108_v61  ;;  %v10109_v13 = vld [vmem:[#allocation67_spill] sm:$0xff]  ;;  %v3534_v62 = vld [vmem:[#allocation3 + $0x67] sm:$0xff]  ;;  %v9089_v4 = vpack.c.bf16 %v3625_v34, %v3624_v60  ;;  %v3541_v0 = vld [vmem:[#allocation3 + $0x9f] sm:$0xff] }
 0x4ad   : > { %v3569_v44 = vmul.f32 %v3533_v31, %v10109_v13  ;;  %v3535_v26 = vld [vmem:[#allocation3 + $0x6f] sm:$0xff]  ;;  %v3627_v21 = vld [vmem:[#allocation3 + $0x80] sm:$0xff]  ;;  %v3540_v38 = vld [vmem:[#allocation3 + $0x97] sm:$0xff] }
 0x4ae   : > { %3780 = vrot.lane.b32.xlu0 %v9069_v35, %s6238_s15  ;;  %v10110_v48 = vld [vmem:[#allocation38_spill] sm:$0xff]  ;;  %v10111_v46 = vld [vmem:[#allocation71_spill] sm:$0xff]  ;;  %v3537_v52 = vld [vmem:[#allocation3 + $0x7f] sm:$0xff]  ;;  %v9099_v33 = vpack.c.bf16 %v3627_v21, %v3626_v19 }
 0x4af   : > { %v9091_v23 = vpack.c.bf16 %v3569_v44, %v3568_v54  ;;  %v3570_v11 = vmul.f32 %v3534_v62, %v10110_v48  ;;  %v3571_v2 = vmul.f32 %v3535_v26, %v10111_v46  ;;  %v3536_v49 = vld [vmem:[#allocation3 + $0x77] sm:$0xff]  ;;  %v10112_v58 = vld [vmem:[#allocation62_spill] sm:$0xff]  ;;  %v10114_v6 = vld [vmem:[#allocation49_spill] sm:$0xff] }
 0x4b0   : > { %3824 = vrot.lane.b32.xlu1 %v9071_v8, %s6238_s15  ;;  %v3576_v9 = vmul.f32 %v3540_v38, %v10112_v58  ;;  %v10113_v42 = vld [vmem:[#allocation83_spill] sm:$0xff]  ;;  %v3572_v16 = vmul.f32 %v3536_v49, %v10114_v6  ;;  %v3538_v12 = vld [vmem:[#allocation3 + $0x87] sm:$0xff]  ;;  %v10116_v18 = vld [vmem:[#allocation24_spill] sm:$0xff] }
 0x4b1   : > { %v3577_v40 = vmul.f32 %v3541_v0, %v10113_v42  ;;  %v3670_v29 = vld [vmem:[#allocation3 + $0x29] sm:$0xff]  ;;  %v3671_v14 = vld [vmem:[#allocation3 + $0x31] sm:$0xff]  ;;  %v9103_v56 = vpack.c.bf16 %v3571_v2, %v3570_v11  ;;  %v10117_v10 = vld [vmem:[#allocation57_spill] sm:$0xff] }
 0x4b2   : > { %3782 = vrot.lane.b32.xlu0 %v9079_v1, %s6238_s15  ;;  %v10115_v59 = vld [vmem:[#allocation75_spill] sm:$0xff]  ;;  %v3706_v20 = vmul.f32 %v3670_v29, %v10116_v18  ;;  %v3707_v17 = vmul.f32 %v3671_v14, %v10117_v10  ;;  %v10118_v45 = vld [vmem:[#allocation58_spill] sm:$0xff]  ;;  %v3668_v63 = vld [vmem:[#allocation3 + $0x19] sm:$0xff] }
 0x4b3   : > { %v3573_v36 = vmul.f32 %v3537_v52, %v10115_v59  ;;  %v3539_v7 = vld [vmem:[#allocation3 + $0x8f] sm:$0xff]  ;;  %v9111_v47 = vpack.c.bf16 %v3577_v40, %v3576_v9  ;;  %v3574_v30 = vmul.f32 %v3538_v12, %v10118_v45  ;;  %v3669_v28 = vld [vmem:[#allocation3 + $0x21] sm:$0xff]  ;;  %v3630_v50 = vld [vmem:[#allocation3 + $0x98] sm:$0xff] }
 0x4b4   : > { %3826 = vrot.lane.b32.xlu1 %v9081_v24, %s6238_s15  ;;  %v10119_v5 = vld [vmem:[#allocation79_spill] sm:$0xff]  ;;  %v6042_v3 = vld [vmem:[#allocation9 + $0xe8] sm:$0xff]   ;;  %v9123_v15 = vpack.c.bf16 %v3707_v17, %v3706_v20  ;;  %v3631_v60 = vld [vmem:[#allocation3 + $0xa0] sm:$0xff] }
 0x4b5   : > { %v9115_v57 = vpack.c.bf16 %v3573_v36, %v3572_v16  ;;  %v3575_v22 = vmul.f32 %v3539_v7, %v10119_v5  ;;  %v6043_v32 = vld [vmem:[#allocation9 + $0xa8] sm:$0xff]   ;;  %v6044_v31 = vld [vmem:[#allocation9 + $0xf0] sm:$0xff]   ;;  %v3545_v61 = vld [vmem:[#allocation3 + $0xbf] sm:$0xff]  ;;  %5546 = vmatprep.subr.bf16.mxu1 %v6042_v3  ;;  %v9133_v38 = vpack.c.bf16 %v3631_v60, %v3630_v50 }
 0x4b6   : > { %3784 = vrot.lane.b32.xlu0 %v9089_v4, %s6238_s15  ;;  %v3544_v34 = vld [vmem:[#allocation3 + $0xb7] sm:$0xff]  ;;  %v10120_v13 = vld [vmem:[#allocation21_spill] sm:$0xff]  ;;  %5547 = vmatpush3.bf16.msra.mxu1 %v6043_v32  ;;  %v3674_v2 = vld [vmem:[#allocation3 + $0x49] sm:$0xff] }
 0x4b7   : > { %v9125_v54 = vpack.c.bf16 %v3575_v22, %v3574_v30  ;;  %v3704_v44 = vmul.f32 %v3668_v63, %v10120_v13  ;;  %v10121_v62 = vld [vmem:[#allocation32_spill] sm:$0xff]  ;;  %v6045_v19 = vld [vmem:[#allocation9 + $0xb0] sm:$0xff]   ;;  %5548 = vmatprep.subr.bf16.mxu1 %v6044_v31  ;;  %v3628_v58 = vld [vmem:[#allocation3 + $0x88] sm:$0xff] }
 0x4b8   : > { %3828 = vrot.lane.b32.xlu1 %v9091_v23, %s6238_s15  ;;  %v3705_v26 = vmul.f32 %v3669_v28, %v10121_v62  ;;  %v6046_v21 = vld [vmem:[#allocation9 + $0xf8] sm:$0xff]   ;;  %v10123_v11 = vld [vmem:[#allocation95_spill] sm:$0xff]  ;;  %v3542_v40 = vld [vmem:[#allocation3 + $0xa7] sm:$0xff] }
 0x4b9   : > { %v10122_v0 = vld [vmem:[#allocation72_spill] sm:$0xff]  ;;  %v3581_v46 = vmul.f32 %v3545_v61, %v10123_v11  ;;  %v3629_v42 = vld [vmem:[#allocation3 + $0x90] sm:$0xff]  ;;  %v10125_v59 = vld [vmem:[#allocation65_spill] sm:$0xff] }
 0x4ba   : > { %3786 = vrot.lane.b32.xlu0 %v9099_v33, %s6238_s15  ;;  %v3580_v48 = vmul.f32 %v3544_v34, %v10122_v0  ;;  %v3675_v49 = vld [vmem:[#allocation3 + $0x51] sm:$0xff]  ;;  %v9137_v52 = vpack.c.bf16 %v3705_v26, %v3704_v44  ;;  %5549 = vmatpush3.bf16.msra.mxu1 %v6045_v19  ;;  %v9147_v12 = vpack.c.bf16 %v3629_v42, %v3628_v58  ;;  %v10127_v20 = vld [vmem:[#allocation89_spill] sm:$0xff]  ;;  %v10128_v50 = vld [vmem:[#allocation26_spill] sm:$0xff] }
 0x4bb   : > { %v6047_v9 = vld [vmem:[#allocation9 + $0xb8] sm:$0xff]   ;;  %v3543_v29 = vld [vmem:[#allocation3 + $0xaf] sm:$0xff]  ;;  %5550 = vmatprep.subr.bf16.mxu1 %v6046_v21  ;;  %v3711_v36 = vmul.f32 %v3675_v49, %v10125_v59  ;;  %v3673_v45 = vld [vmem:[#allocation3 + $0x41] sm:$0xff] }
 0x4bc   : > { %3830 = vrot.lane.b32.xlu1 %v9103_v56, %s6238_s15  ;;  %v9143_v14 = vpack.c.bf16 %v3581_v46, %v3580_v48  ;;  %v10124_v6 = vld [vmem:[#allocation28_spill] sm:$0xff]  ;;  %v3579_v10 = vmul.f32 %v3543_v29, %v10127_v20  ;;  %v3635_v22 = vld [vmem:[#allocation3 + $0xc0] sm:$0xff]  ;;  %v3678_v26 = vld [vmem:[#allocation3 + $0x69] sm:$0xff] }
 0x4bd   : > { %v3710_v16 = vmul.f32 %v3674_v2, %v10124_v6  ;;  %v10126_v7 = vld [vmem:[#allocation68_spill] sm:$0xff]  ;;  %v10129_v31 = vld [vmem:[#allocation61_spill] sm:$0xff]  ;;  %v3632_v0 = vld [vmem:[#allocation3 + $0xa8] sm:$0xff] }
 0x4be   : > { %3836 = vrot.lane.b32.xlu0 %v9111_v47, %s6238_s15  ;;  %v3578_v18 = vmul.f32 %v3542_v40, %v10126_v7  ;;  %5551 = vmatpush3.bf16.msra.mxu1 %v6047_v9  ;;  %v3672_v17 = vld [vmem:[#allocation3 + $0x39] sm:$0xff]  ;;  %v3709_v60 = vmul.f32 %v3673_v45, %v10129_v31  ;;  %v3679_v19 = vld [vmem:[#allocation3 + $0x71] sm:$0xff]  ;;  %v3546_v11 = vld [vmem:[#allocation3 + $0xc7] sm:$0xff] }
 0x4bf   : > { %v9155_v30 = vpack.c.bf16 %v3711_v36, %v3710_v16  ;;  %v3634_v5 = vld [vmem:[#allocation3 + $0xb8] sm:$0xff]  ;;  %v3708_v32 = vmul.f32 %v3672_v17, %v10128_v50  ;;  %v3633_v48 = vld [vmem:[#allocation3 + $0xb0] sm:$0xff]  ;;  %v10133_v9 = vld [vmem:[#allocation73_spill] sm:$0xff] }
 0x4c0   : > { %3832 = vrot.lane.b32.xlu1 %v9115_v57, %s6238_s15  ;;  %v3548_v63 = vld [vmem:[#allocation3 + $0xd7] sm:$0xff]  ;;  %v3549_v28 = vld [vmem:[#allocation3 + $0xdf] sm:$0xff]  ;;  %v9157_v3 = vpack.c.bf16 %v3579_v10, %v3578_v18  ;;  %v9165_v34 = vpack.c.bf16 %v3635_v22, %v3634_v5  ;;  %v3547_v46 = vld [vmem:[#allocation3 + $0xcf] sm:$0xff]  ;;  %v3715_v42 = vmul.f32 %v3679_v19, %v10133_v9  ;;  %v9179_v40 = vpack.c.bf16 %v3633_v48, %v3632_v0 }
 0x4c1   : > { %v10130_v61 = vld [vmem:[#allocation80_spill] sm:$0xff]  ;;  %v9169_v21 = vpack.c.bf16 %v3709_v60, %v3708_v32  ;;  %v10132_v49 = vld [vmem:[#allocation43_spill] sm:$0xff]  ;;  %v10135_v16 = vld [vmem:[#allocation98_spill] sm:$0xff] }
 0x4c2   : > { %3870 = vrot.lane.b32.xlu0 %v9123_v15, %s6238_s15  ;;  %v3584_v13 = vmul.f32 %v3548_v63, %v10130_v61  ;;  %v10131_v44 = vld [vmem:[#allocation100_spill] sm:$0xff]  ;;  %v3714_v58 = vmul.f32 %v3678_v26, %v10132_v49  ;;  %v3583_v59 = vmul.f32 %v3547_v46, %v10135_v16  ;;  %v3677_v7 = vld [vmem:[#allocation3 + $0x61] sm:$0xff]  ;;  %v3637_v0 = vld [vmem:[#allocation3 + $0xd0] sm:$0xff] }
 0x4c3   : > { %v3585_v62 = vmul.f32 %v3549_v28, %v10131_v44  ;;  %v10134_v29 = vld [vmem:[#allocation76_spill] sm:$0xff]  ;;  %v3639_v10 = vld [vmem:[#allocation3 + $0xe0] sm:$0xff]  ;;  %v10136_v22 = vld [vmem:[#allocation34_spill] sm:$0xff] }
 0x4c4   : > { %3834 = vrot.lane.b32.xlu1 %v9125_v54, %s6238_s15  ;;  %v3582_v6 = vmul.f32 %v3546_v11, %v10134_v29  ;;  %v3676_v36 = vld [vmem:[#allocation3 + $0x59] sm:$0xff]  ;;  %v9187_v18 = vpack.c.bf16 %v3715_v42, %v3714_v58  ;;  %v3682_v44 = vld [vmem:[#allocation3 + $0x89] sm:$0xff]  ;;  %v3693_v43 = vld [vmem:[#allocation3 + $0xe1] sm:$0xff] }
 0x4c5   : > { %v9175_v2 = vpack.c.bf16 %v3585_v62, %v3584_v13  ;;  %v3638_v20 = vld [vmem:[#allocation3 + $0xd8] sm:$0xff]  ;;  %v3712_v63 = vmul.f32 %v3676_v36, %v10136_v22  ;;  %v10137_v28 = vld [vmem:[#allocation69_spill] sm:$0xff]  ;;  %v3636_v19 = vld [vmem:[#allocation3 + $0xc8] sm:$0xff] }
 0x4c6   : > { %3790 = vrot.lane.b32.xlu0 %v9133_v38, %s6238_s15  ;;  %v3552_v17 = vld [vmem:[#allocation3 + $0xf7] sm:$0xff]  ;;  %v3553_v45 = vld [vmem:[#allocation3 + $0xff] sm:$0xff]  ;;  %v9189_v5 = vpack.c.bf16 %v3583_v59, %v3582_v6  ;;  %v3713_v50 = vmul.f32 %v3677_v7, %v10137_v28  ;;  %v9197_v32 = vpack.c.bf16 %v3639_v10, %v3638_v20  ;;  %v3550_v48 = vld [vmem:[#allocation3 + $0xe7] sm:$0xff]  ;;  %v9211_v29 = vpack.c.bf16 %v3637_v0, %v3636_v19 }
 0x4c7   : > { %v10139_v31 = vld [vmem:[#allocation88_spill] sm:$0xff]  ;;  %v3551_v11 = vld [vmem:[#allocation3 + $0xef] sm:$0xff]  ;;  %v10142_v9 = vld [vmem:[#allocation81_spill] sm:$0xff] }
 0x4c8   : > { %3868 = vrot.lane.b32.xlu1 %v9137_v52, %s6238_s15  ;;  %10138 = vst [vmem:[#allocation92_spill] sm:$0xff] %v9197_v32  ;;  %v3588_v60 = vmul.f32 %v3552_v17, %v10139_v31  ;;  %v10140_v61 = vld [vmem:[#allocation104_spill] sm:$0xff]  ;;  %v9201_v26 = vpack.c.bf16 %v3713_v50, %v3712_v63  ;;  %10143 = vst [vmem:[#allocation91_spill] sm:$0xff] %v9211_v29  ;;  %v10145_v59 = vld [vmem:[#allocation102_spill] sm:$0xff] }
 0x4c9   : > { %v3589_v13 = vmul.f32 %v3553_v45, %v10140_v61  ;;  %v3683_v62 = vld [vmem:[#allocation3 + $0x91] sm:$0xff]  ;;  %v3587_v36 = vmul.f32 %v3551_v11, %v10145_v59  ;;  %v3680_v7 = vld [vmem:[#allocation3 + $0x79] sm:$0xff]  ;;  %v3681_v20 = vld [vmem:[#allocation3 + $0x81] sm:$0xff] }
 0x4ca   : > { %3840 = vrot.lane.b32.xlu0 %v9143_v14, %s6238_s15  ;;  %v10141_v49 = vld [vmem:[#allocation60_spill] sm:$0xff]  ;;  %v3719_v42 = vmul.f32 %v3683_v62, %v10142_v9  ;;  %v3643_v45 = vld [vmem:[#allocation3 + $0x100] sm:$0xff]  ;;  %v3686_v22 = vld [vmem:[#allocation3 + $0xa9] sm:$0xff] }
 0x4cb   : > { %v9207_v46 = vpack.c.bf16 %v3589_v13, %v3588_v60  ;;  %v3718_v58 = vmul.f32 %v3682_v44, %v10141_v49  ;;  %v10144_v6 = vld [vmem:[#allocation84_spill] sm:$0xff]  ;;  %v10146_v50 = vld [vmem:[#allocation54_spill] sm:$0xff]  ;;  %v10147_v60 = vld [vmem:[#allocation77_spill] sm:$0xff] }
 0x4cc   : > { %3788 = vrot.lane.b32.xlu1 %v9147_v12, %s6238_s15  ;;  %v3586_v16 = vmul.f32 %v3550_v48, %v10144_v6  ;;  %v3642_v17 = vld [vmem:[#allocation3 + $0xf8] sm:$0xff]  ;;  %v3716_v31 = vmul.f32 %v3680_v7, %v10146_v50  ;;  %v3717_v61 = vmul.f32 %v3681_v20, %v10147_v60  ;;  %v10149_v44 = vld [vmem:[#allocation93_spill] sm:$0xff]  ;;  %v10150_v19 = vld [vmem:[#allocation70_spill] sm:$0xff] }
 0x4cd   : > { %v9219_v10 = vpack.c.bf16 %v3719_v42, %v3718_v58  ;;  %v3687_v63 = vld [vmem:[#allocation3 + $0xb1] sm:$0xff]  ;;  %v9229_v13 = vpack.c.bf16 %v3643_v45, %v3642_v17  ;;  %v3722_v62 = vmul.f32 %v3686_v22, %v10149_v44  ;;  %v3690_v48 = vld [vmem:[#allocation3 + $0xc9] sm:$0xff]  ;;  %v3684_v60 = vld [vmem:[#allocation3 + $0x99] sm:$0xff] }
 0x4ce   : > { %3874 = vrot.lane.b32.xlu0 %v9155_v30, %s6238_s15  ;;  %v9221_v28 = vpack.c.bf16 %v3587_v36, %v3586_v16  ;;  %v3723_v0 = vmul.f32 %v3687_v63, %v10150_v19  ;;  %v3691_v11 = vld [vmem:[#allocation3 + $0xd1] sm:$0xff]  ;;  %v9233_v49 = vpack.c.bf16 %v3717_v61, %v3716_v31  ;;  %v3640_v58 = vld [vmem:[#allocation3 + $0xe8] sm:$0xff] }
 0x4cf   : > { %10148 = vst [vmem:[#allocation119_spill] sm:$0xff] %v9229_v13  ;;  %v3641_v9 = vld [vmem:[#allocation3 + $0xf0] sm:$0xff]  ;;  %v3554_v42 = vld [vmem:[#allocation3 + $0x107] sm:$0xff] }
 0x4d0   : > { %3838 = vrot.lane.b32.xlu1 %v9157_v3, %s6238_s15  ;;  %v3555_v6 = vld [vmem:[#allocation3 + $0x10f] sm:$0xff]  ;;  %v9239_v16 = vpack.c.bf16 %v3723_v0, %v3722_v62  ;;  %v9243_v22 = vpack.c.bf16 %v3641_v9, %v3640_v58  ;;  %v3590_v63 = vmul.f32 %v3554_v42, %v10063_v39  ;;  %v3685_v61 = vld [vmem:[#allocation3 + $0xa1] sm:$0xff] }
 0x4d1   : > { %v10151_v59 = vld [vmem:[#allocation99_spill] sm:$0xff]  ;;  %v10152_v7 = vld [vmem:[#allocation78_spill] sm:$0xff] }
 0x4d2   : > { %3794 = vrot.lane.b32.xlu0 %v9165_v34, %s6238_s15  ;;  %v3726_v36 = vmul.f32 %v3690_v48, %v10151_v59  ;;  %v3727_v20 = vmul.f32 %v3691_v11, %v10152_v7  ;;  %v3694_v17 = vld [vmem:[#allocation3 + $0xe9] sm:$0xff]  ;;  %v3695_v45 = vld [vmem:[#allocation3 + $0xf1] sm:$0xff]  ;;  %10153 = vst [vmem:[#allocation107_spill] sm:$0xff] %v9243_v22  ;;  %v3696_v11 = vld [vmem:[#allocation3 + $0xf9] sm:$0xff] }
 0x4d3   : > { %v10154_v50 = vld [vmem:[#allocation106_spill] sm:$0xff]  ;;  %v10155_v62 = vld [vmem:[#allocation103_spill] sm:$0xff]  ;;  %v3688_v7 = vld [vmem:[#allocation3 + $0xb9] sm:$0xff] }
 0x4d4   : > { %3872 = vrot.lane.b32.xlu1 %v9169_v21, %s6238_s15  ;;  %v3591_v31 = vmul.f32 %v3555_v6, %v10154_v50  ;;  %v9251_v44 = vpack.c.bf16 %v3727_v20, %v3726_v36  ;;  %v3730_v19 = vmul.f32 %v3694_v17, %v10155_v62  ;;  %v10156_v0 = vld [vmem:[#allocation86_spill] sm:$0xff]  ;;  %v10159_v6 = vld [vmem:[#allocation87_spill] sm:$0xff]  ;;  %v10160_v20 = vld [vmem:[#allocation105_spill] sm:$0xff] }
 0x4d5   : > { %v3731_v48 = vmul.f32 %v3695_v45, %v10156_v0  ;;  %v3697_v58 = vld [vmem:[#allocation3 + $0x101] sm:$0xff]  ;;  %v3721_v59 = vmul.f32 %v3685_v61, %v10159_v6  ;;  %v3732_v17 = vmul.f32 %v3696_v11, %v10160_v20 }
 0x4d6   : > { %3844 = vrot.lane.b32.xlu0 %v9175_v2, %s6238_s15  ;;  %v9255_v9 = vpack.c.bf16 %v3591_v31, %v3590_v63  ;;  %v10158_v39 = vld [vmem:[#allocation66_spill] sm:$0xff]  ;;  %v3699_v31 = vld [vmem:[#allocation3 + $0x111] sm:$0xff] }
 0x4d7   : > { %v3720_v42 = vmul.f32 %v3684_v60, %v10158_v39  ;;  %v3689_v50 = vld [vmem:[#allocation3 + $0xc1] sm:$0xff]  ;;  %v9263_v36 = vpack.c.bf16 %v3731_v48, %v3730_v19  ;;  %v3698_v63 = vld [vmem:[#allocation3 + $0x109] sm:$0xff]  ;;  %v10164_v48 = vld [vmem:[#allocation108_spill] sm:$0xff] }
 0x4d8   : > { %3792 = vrot.lane.b32.xlu1 %v9179_v40, %s6238_s15  ;;  %10157 = vst [vmem:[#allocation120_spill] sm:$0xff] %v9255_v9  ;;  %v10161_v45 = vld [vmem:[#allocation90_spill] sm:$0xff]  ;;  %v10162_v60 = vld [vmem:[#allocation97_spill] sm:$0xff]  ;;  %v3734_v11 = vmul.f32 %v3698_v63, %v10164_v48  ;;  %v3645_v63 = vld [vmem:[#allocation3 + $0x110] sm:$0xff] }
 0x4d9   : > { %v3733_v62 = vmul.f32 %v3697_v58, %v10161_v45  ;;  %v9267_v0 = vpack.c.bf16 %v3721_v59, %v3720_v42  ;;  %v3724_v61 = vmul.f32 %v3688_v7, %v10162_v60  ;;  %v10163_v39 = vld [vmem:[#allocation74_spill] sm:$0xff]  ;;  %v10166_v59 = vld [vmem:[#allocation101_spill] sm:$0xff] }
 0x4da   : > { %3878 = vrot.lane.b32.xlu0 %v9187_v18, %s6238_s15  ;;  %v3725_v6 = vmul.f32 %v3689_v50, %v10163_v39  ;;  %v10165_v58 = vld [vmem:[#allocation94_spill] sm:$0xff] }
 0x4db   : > { %v9275_v19 = vpack.c.bf16 %v3733_v62, %v3732_v17  ;;  %v3735_v20 = vmul.f32 %v3699_v31, %v10165_v58  ;;  %v10167_v45 = vld [vmem:[#allocation82_spill] sm:$0xff]  ;;  %v3646_v31 = vld [vmem:[#allocation3 + $0x118] sm:$0xff] }
 0x4dc   : > { %3842 = vrot.lane.b32.xlu1 %v9189_v5, %s6238_s15  ;;  %v9279_v42 = vpack.c.bf16 %v3725_v6, %v3724_v61  ;;  %v3729_v50 = vmul.f32 %v3693_v43, %v10167_v45  ;;  %v3644_v62 = vld [vmem:[#allocation3 + $0x108] sm:$0xff]  ;;  %v3647_v61 = vld [vmem:[#allocation3 + $0x120] sm:$0xff]  ;;  %v3667_v43 = vld [vmem:[#allocation3 + $0x11] sm:$0xff] }
 0x4dd   : > { %v9287_v60 = vpack.c.bf16 %v3735_v20, %v3734_v11  ;;  %v3522_v39 = vld [vmem:[#allocation3 + $0x7] sm:$0xff]  ;;  %v3523_v6 = vld [vmem:[#allocation3 + $0xf] sm:$0xff]  ;;  %v3665_v48 = vpack.c.bf16 %v3647_v61, %v3646_v31  ;;  %v10169_v58 = vld [vmem:[#allocation48_spill] sm:$0xff] }
 0x4de   : > { %3798 = vrot.lane.b32.xlu0 %v9197_v32, %s6238_s15  ;;  %v3666_v11 = vld [vmem:[#allocation3 + $0x9] sm:$0xff]  ;;  %v3703_v20 = vmul.f32 %v3667_v43, %v10169_v58  ;;  %v10171_v45 = vld [vmem:[#allocation85_spill] sm:$0xff] }
 0x4df   : > { %10168 = vst [vmem:[#allocation116_spill] sm:$0xff] %v9287_v60  ;;  %v6049_v61 = vld [vmem:[#allocation9 + $0x110] sm:$0xff]  }
 0x4e0   : > { %3876 = vrot.lane.b32.xlu1 %v9201_v26, %s6238_s15 }
 0x4e2   : > { %3848 = vrot.lane.b32.xlu0 %v9207_v46, %s6238_s15 }
 0x4e4   : > { %3796 = vrot.lane.b32.xlu1 %v9211_v29, %s6238_s15  ;;  %v6048_v29 = vld [vmem:[#allocation9 + $0x108] sm:$0xff]  }
 0x4e6   : > { %3882 = vrot.lane.b32.xlu0 %v9219_v10, %s6238_s15 }
 0x4e8   : > { %3846 = vrot.lane.b32.xlu1 %v9221_v28, %s6238_s15 }
 0x4ea   : > { %3802 = vrot.lane.b32.xlu0 %v9229_v13, %s6238_s15  ;;  %v3692_v13 = vld [vmem:[#allocation3 + $0xd9] sm:$0xff] }
 0x4eb   : > { %v3728_v7 = vmul.f32 %v3692_v13, %v10166_v59  ;;  %v9295_v13 = vpack.c.bf16 %v3645_v63, %v3644_v62  ;;  %v10170_v59 = vld [vmem:[#allocation64_spill] sm:$0xff]  ;;  %v3773_v62 = vpop.permute.xlu0 %3772 }
 0x4ec   : > { %3880 = vrot.lane.b32.xlu1 %v9233_v49, %s6238_s15 }
 0x4ed   : > { %v9289_v17 = vpack.c.bf16 %v3729_v50, %v3728_v7  ;;  %v3558_v7 = vmul.f32 %v3522_v39, %v10170_v59  ;;  %v3559_v50 = vmul.f32 %v3523_v6, %v10171_v45 }
 0x4ee   : > { %3886 = vrot.lane.b32.xlu0 %v9239_v16, %s6238_s15 }
 0x4f0   : > { %3800 = vrot.lane.b32.xlu1 %v9243_v22, %s6238_s15 }
 0x4f2   : > { %3890 = vrot.lane.b32.xlu0 %v9251_v44, %s6238_s15 }
 0x4f4   : > { %3850 = vrot.lane.b32.xlu1 %v9255_v9, %s6238_s15  ;;  %v3594_v9 = vpack.c.bf16 %v3559_v50, %v3558_v7 }
 0x4f6   : > { %3894 = vrot.lane.b32.xlu0 %v9263_v36, %s6238_s15  ;;  %v3908_v31 = vsel %vm1093_vm1, %v3594_v9, %v3773_v62 }
 0x4f8   : > { %3884 = vrot.lane.b32.xlu1 %v9267_v0, %s6238_s15 }
 0x4fa   : > { %3896 = vrot.lane.b32.xlu0 %v9275_v19, %s6238_s15 }
 0x4fc   : > { %3888 = vrot.lane.b32.xlu1 %v9279_v42, %s6238_s15 }
 0x4fe   : > { %3898 = vrot.lane.b32.xlu0 %v9287_v60, %s6238_s15  ;;  %v10172_v60 = vld [vmem:[#allocation22_spill] sm:$0xff] }
 0x4ff   : > { %v3702_v37 = vmul.f32 %v3666_v11, %v10172_v60  ;;  %v6050_v60 = vld [vmem:[#allocation9 + $0x118] sm:$0xff]  }
 0x500   : > { %3892 = vrot.lane.b32.xlu1 %v9289_v17, %s6238_s15 }
 0x501   : > { %v3738_v63 = vpack.c.bf16 %v3703_v20, %v3702_v37 }
 0x504   : > { %3902 = vrot.lane.b32.xlu1 %v9295_v13, %s6238_s15 }
 0x507   : > { %v3775_v43 = vpop.permute.xlu0 %3774 }
 0x508   : > { %3904 = vrot.lane.b32.xlu1 %v3665_v48, %s6238_s15  ;;  %s6153_s15 = scalar_lea.vmem %s9722_s27, 4096 }
 0x509   : > { %p6154_p12 = scmp.ne.s32.totalorder %s9722_s27, %s6153_s15  ;;  %p6161_p7 = scmp.lt.s32.totalorder %s6159_s22, %s6153_s15 }
 0x50a   : > { %v3821_v22 = vpop.permute.xlu1 %3820 }
 0x50b   : > { %v3972_v32 = vsel %vm1093_vm1, %v3738_v63, %v3821_v22  ;;  %p6155_p2 = pnand %p6154_p12, %p10201_p1  ;;  %p6162_p8 = por %p6161_p7, %p6160_p4 }
 0x50c   : > { %4467 = vmatprep.mubr.bf16.mxu0 %v3972_v32 }
 0x50d   : > { %4468 = vmatmul.mubr.bf16.vlgmr.msra.gmra.mrb[52].mxu0 %v3908_v31  ;;  %p6156_p3 = pneg %p6155_p2 }
 0x50e   : > { %5779 = vmatpush3.bf16.msra.mxu0 %v8890_v25 }
 0x50f   : > { %5780 = vmatprep.subr.bf16.mxu0 %v6048_v29  ;;  %p6163_p11 = pnand %p6162_p8, %p6156_p3 }
 0x512   : > { %5781 = vmatpush3.bf16.msra.mxu0 %v6048_v29  ;;  %v3912_v29 = vsel %vm1093_vm1, %v8880_v51, %v3775_v43 }
 0x513   : > { %5782 = vmatprep.subr.bf16.mxu0 %v6049_v61 }
 0x516   : > { %5783 = vmatpush3.bf16.msra.mxu0 %v6049_v61  ;;  %v3777_v39 = vpop.permute.xlu0 %3776 }
 0x517   : > { %5784 = vmatprep.subr.bf16.mxu0 %v6050_v60  ;;  %v3916_v37 = vsel %vm1093_vm1, %v9061_v55, %v3777_v39 }
 0x518   : > { %4628 = vmatprep.mubr.bf16.mxu1 %v3916_v37 }
 0x51a   : > { %5785 = vmatpush3.bf16.msra.mxu0 %v6050_v60 }
 0x51c   : > { %v3779_v22 = vpop.permute.xlu0 %3778 }
 0x51d   : > { %v3920_v51 = vsel %vm1093_vm1, %v9071_v8, %v3779_v22 }
 0x51e   : > { %v3823_v9 = vpop.permute.xlu1 %3822 }
 0x51f   : > { %v3976_v32 = vsel %vm1093_vm1, %v9137_v52, %v3823_v9 }
 0x520   : > { %4475 = vmatprep.mubr.bf16.mxu0 %v3976_v32  ;;  %v3781_v25 = vpop.permute.xlu0 %3780 }
 0x521   : > { %4476 = vmatmul.mubr.bf16.gmra.mrb[56].mxu0 %v3912_v29  ;;  %v3924_v31 = vsel %vm1093_vm1, %v9081_v24, %v3781_v25 }
 0x522   : > { %v3825_v6 = vpop.permute.xlu1 %3824 }
 0x523   : > { %v3980_v48 = vsel %vm1093_vm1, %v9123_v15, %v3825_v6 }
 0x524   : > { %4483 = vmatprep.mubr.bf16.mxu0 %v3980_v48  ;;  %v3783_v11 = vpop.permute.xlu0 %3782 }
 0x525   : > { %v3928_v22 = vsel %vm1093_vm1, %v9091_v23, %v3783_v11 }
 0x526   : > { %v3827_v55 = vpop.permute.xlu1 %3826 }
 0x527   : > { %v3984_v20 = vsel %vm1093_vm1, %v9169_v21, %v3827_v55 }
 0x528   : > { %v3785_v58 = vpop.permute.xlu0 %3784 }
 0x529   : > { %4484 = vmatmul.mubr.bf16.gmra.mrb[60].mxu0 %v3916_v37  ;;  %v3932_v29 = vsel %vm1093_vm1, %v9103_v56, %v3785_v58 }
 0x52a   : > { %v3829_v59 = vpop.permute.xlu1 %3828  ;;  %4491 = vmatprep.mubr.bf16.mxu0 %v3984_v20 }
 0x52b   : > { %v3988_v45 = vsel %vm1093_vm1, %v9155_v30, %v3829_v59 }
 0x52c   : > { %v3787_v7 = vpop.permute.xlu0 %3786 }
 0x52d   : > { %v3936_v55 = vsel %vm1093_vm1, %v9115_v57, %v3787_v7 }
 0x52e   : > { %v3831_v52 = vpop.permute.xlu1 %3830 }
 0x52f   : > { %v3992_v61 = vsel %vm1093_vm1, %v9201_v26, %v3831_v52 }
 0x530   : > { %v3837_v62 = vpop.permute.xlu0 %3836 }
 0x531   : > { %4492 = vmatmul.mubr.bf16.gmra.mrb[64].mxu0 %v3920_v51  ;;  %v4004_v56 = vsel %vm1093_vm1, %v9219_v10, %v3837_v62 }
 0x532   : > { %v3833_v50 = vpop.permute.xlu1 %3832  ;;  %4499 = vmatprep.mubr.bf16.mxu0 %v3988_v45 }
 0x533   : > { %v3996_v24 = vsel %vm1093_vm1, %v9187_v18, %v3833_v50 }
 0x534   : > { %v3871_v43 = vpop.permute.xlu0 %3870 }
 0x535   : > { %v4040_v32 = vsel %vm1093_vm1, %v8993_v41, %v3871_v43 }
 0x536   : > { %v3835_v63 = vpop.permute.xlu1 %3834 }
 0x537   : > { %v4000_v23 = vsel %vm1093_vm1, %v9233_v49, %v3835_v63 }
 0x538   : > { %v3791_v37 = vpop.permute.xlu0 %3790 }
 0x539   : > { %4500 = vmatmul.mubr.bf16.gmra.mrb[68].mxu0 %v3924_v31  ;;  %v3944_v50 = vsel %vm1093_vm1, %v9111_v47, %v3791_v37 }
 0x53a   : > { %v3869_v60 = vpop.permute.xlu1 %3868  ;;  %4507 = vmatprep.mubr.bf16.mxu0 %v3992_v61 }
 0x53b   : > { %v4036_v8 = vsel %vm1093_vm1, %v8862_v27, %v3869_v60 }
 0x53c   : > { %4629 = vmatmul.mubr.bf16.vlgmr.msra.gmra.mrb[84].mxu1 %v4036_v8  ;;  %v3841_v25 = vpop.permute.xlu0 %3840 }
 0x53d   : > { %4636 = vmatprep.mubr.bf16.mxu1 %v3920_v51 }
 0x53e   : > { %v3789_v39 = vpop.permute.xlu1 %3788 }
 0x53f   : > { %v3940_v52 = vsel %vm1093_vm1, %v9125_v54, %v3789_v39  ;;  %v4012_v54 = vsel %vm1093_vm1, %v9239_v16, %v3841_v25 }
 0x540   : > { %v3875_v11 = vpop.permute.xlu0 %3874 }
 0x541   : > { %4508 = vmatmul.mubr.bf16.gmra.mrb[72].mxu0 %v3928_v22  ;;  %v4048_v20 = vsel %vm1093_vm1, %v9069_v35, %v3875_v11 }
 0x542   : > { %v3839_v9 = vpop.permute.xlu1 %3838  ;;  %4515 = vmatprep.mubr.bf16.mxu0 %v3996_v24 }
 0x543   : > { %v4008_v57 = vsel %vm1093_vm1, %v9267_v0, %v3839_v9 }
 0x544   : > { %4637 = vmatmul.mubr.bf16.gmra.mrb[88].mxu1 %v4040_v32  ;;  %v3795_v58 = vpop.permute.xlu0 %3794 }
 0x545   : > { %4644 = vmatprep.mubr.bf16.mxu1 %v3924_v31  ;;  %v3952_v8 = vsel %vm1093_vm1, %v9143_v14, %v3795_v58  ;;  %v3557_v58 = vld [vmem:[#allocation3 + $0x11f] sm:$0xff] }
 0x546   : > { %v3873_v27 = vpop.permute.xlu1 %3872 }
 0x547   : > { %v4044_v48 = vsel %vm1093_vm1, %v9059_v53, %v3873_v27 }
 0x548   : > { %v3845_v53 = vpop.permute.xlu0 %3844 }
 0x549   : > { %4516 = vmatmul.mubr.bf16.gmra.mrb[76].mxu0 %v3932_v29 }
 0x54a   : > { %v3793_v6 = vpop.permute.xlu1 %3792  ;;  %4523 = vmatprep.mubr.bf16.mxu0 %v4000_v23 }
 0x54c   : > { %4645 = vmatmul.mubr.bf16.gmra.mrb[92].mxu1 %v4044_v48  ;;  %v3879_v45 = vpop.permute.xlu0 %3878 }
 0x54d   : > { %4652 = vmatprep.mubr.bf16.mxu1 %v3928_v22  ;;  %v4056_v62 = vsel %vm1093_vm1, %v9089_v4, %v3879_v45 }
 0x54e   : > { %v3843_v41 = vpop.permute.xlu1 %3842 }
 0x54f   : > { %v4016_v61 = vsel %vm1093_vm1, %v9279_v42, %v3843_v41 }
 0x550   : > { %v3799_v63 = vpop.permute.xlu0 %3798 }
 0x551   : > { %4524 = vmatmul.mubr.bf16.gmra.mrb[80].mxu0 %v3936_v55 }
 0x552   : > { %4531 = vmatprep.mubr.bf16.mxu0 %v4004_v56  ;;  %v3877_v59 = vpop.permute.xlu1 %3876  ;;  %v10176_v56 = vld [vmem:[#allocation120_spill] sm:$0xff] }
 0x553   : > { %v4052_v51 = vsel %vm1093_vm1, %v9079_v1, %v3877_v59  ;;  %v3948_v1 = vsel %vm1093_vm1, %v9157_v3, %v3793_v6  ;;  %v4020_v3 = vsel %vm1093_vm1, %v9251_v44, %v3845_v53  ;;  %v10173_v6 = vld [vmem:[#allocation91_spill] sm:$0xff] }
 0x554   : > { %4653 = vmatmul.mubr.bf16.gmra.mrb[96].mxu1 %v4048_v20  ;;  %v3849_v47 = vpop.permute.xlu0 %3848  ;;  %v10177_v20 = vld [vmem:[#allocation96_spill] sm:$0xff]  ;;  %v10178_v53 = vld [vmem:[#allocation111_spill] sm:$0xff] }
 0x555   : > { %4660 = vmatprep.mubr.bf16.mxu1 %v3932_v29  ;;  %v4028_v25 = vsel %vm1093_vm1, %v9263_v36, %v3849_v47 }
 0x556   : > { %v3797_v7 = vpop.permute.xlu1 %3796 }
 0x558   : > { %v3883_v4 = vpop.permute.xlu0 %3882 }
 0x559   : > { %4532 = vmatmul.mubr.bf16.gmra.mrb[84].mxu0 %v3940_v52  ;;  %v4064_v37 = vsel %vm1093_vm1, %v9147_v12, %v3883_v4  ;;  %v3960_v12 = vsel %vm1093_vm1, %v9175_v2, %v3799_v63 }
 0x55a   : > { %4539 = vmatprep.mubr.bf16.mxu0 %v4008_v57  ;;  %v3847_v35 = vpop.permute.xlu1 %3846 }
 0x55b   : > { %v4024_v24 = vsel %vm1093_vm1, %v9289_v17, %v3847_v35 }
 0x55c   : > { %4661 = vmatmul.mubr.bf16.gmra.mrb[100].mxu1 %v4052_v51  ;;  %v3803_v14 = vpop.permute.xlu0 %3802 }
 0x55d   : > { %4668 = vmatprep.mubr.bf16.mxu1 %v3936_v55 }
 0x55e   : > { %v3881_v31 = vpop.permute.xlu1 %3880 }
 0x55f   : > { %v4060_v43 = vsel %vm1093_vm1, %v9099_v33, %v3881_v31  ;;  %v3956_v33 = vsel %vm1093_vm1, %v9189_v5, %v3797_v7 }
 0x560   : > { %v3887_v32 = vpop.permute.xlu0 %3886 }
 0x561   : > { %4540 = vmatmul.mubr.bf16.gmra.mrb[88].mxu0 %v3944_v50  ;;  %v4072_v5 = vsel %vm1093_vm1, %v9179_v40, %v3887_v32  ;;  %v3968_v40 = vsel %vm1093_vm1, %v9207_v46, %v3803_v14 }
 0x562   : > { %4547 = vmatprep.mubr.bf16.mxu0 %v4012_v54  ;;  %v3801_v60 = vpop.permute.xlu1 %3800 }
 0x564   : > { %4669 = vmatmul.mubr.bf16.gmra.mrb[104].mxu1 %v4056_v62  ;;  %v3891_v23 = vpop.permute.xlu0 %3890 }
 0x565   : > { %4676 = vmatprep.mubr.bf16.mxu1 %v3940_v52  ;;  %v3593_v52 = vmul.f32 %v3557_v58, %v10178_v53 }
 0x566   : > { %v3851_v39 = vpop.permute.xlu1 %3850 }
 0x567   : > { %v4032_v29 = vsel %vm1093_vm1, %v9275_v19, %v3851_v39 }
 0x568   : > { %v3895_v46 = vpop.permute.xlu0 %3894 }
 0x569   : > { %4548 = vmatmul.mubr.bf16.gmra.mrb[92].mxu0 %v3948_v1 }
 0x56a   : > { %4555 = vmatprep.mubr.bf16.mxu0 %v4016_v61  ;;  %v3885_v22 = vpop.permute.xlu1 %3884 }
 0x56b   : > { %v4068_v9 = vsel %vm1093_vm1, %v9133_v38, %v3885_v22  ;;  %v3964_v38 = vsel %vm1093_vm1, %v9221_v28, %v3801_v60  ;;  %v4080_v28 = vsel %vm1093_vm1, %v10173_v6, %v3891_v23 }
 0x56c   : > { %4677 = vmatmul.mubr.bf16.gmra.mrb[108].mxu1 %v4060_v43  ;;  %v3897_v57 = vpop.permute.xlu0 %3896 }
 0x56d   : > { %4684 = vmatprep.mubr.bf16.mxu1 %v3944_v50 }
 0x56e   : > { %v3889_v27 = vpop.permute.xlu1 %3888 }
 0x56f   : > { %v4076_v2 = vsel %vm1093_vm1, %v9165_v34, %v3889_v27  ;;  %v10174_v34 = vld [vmem:[#allocation92_spill] sm:$0xff] }
 0x570   : > { %v3899_v35 = vpop.permute.xlu0 %3898 }
 0x571   : > { %4556 = vmatmul.mubr.bf16.gmra.mrb[96].mxu0 %v3952_v8 }
 0x572   : > { %4563 = vmatprep.mubr.bf16.mxu0 %v4020_v3  ;;  %v3893_v48 = vpop.permute.xlu1 %3892 }
 0x573   : > { %v4084_v11 = vsel %vm1093_vm1, %v10174_v34, %v3893_v48 }
 0x574   : > { %4685 = vmatmul.mubr.bf16.gmra.mrb[112].mxu1 %v4064_v37 }
 0x575   : > { %4692 = vmatprep.mubr.bf16.mxu1 %v3948_v1 }
 0x576   : > { %v3903_v41 = vpop.permute.xlu1 %3902 }
 0x579   : > { %4564 = vmatmul.mubr.bf16.gmra.mrb[100].mxu0 %v3956_v33 }
 0x57a   : > { %4571 = vmatprep.mubr.bf16.mxu0 %v4024_v24  ;;  %v3905_v7 = vpop.permute.xlu1 %3904 }
 0x57c   : > { %4693 = vmatmul.mubr.bf16.gmra.mrb[116].mxu1 %v4068_v9 }
 0x57d   : > { %4700 = vmatprep.mubr.bf16.mxu1 %v3952_v8 }
 0x581   : > { %4572 = vmatmul.mubr.bf16.gmra.mrb[104].mxu0 %v3960_v12 }
 0x582   : > { %4579 = vmatprep.mubr.bf16.mxu0 %v4028_v25 }
 0x584   : > { %4701 = vmatmul.mubr.bf16.gmra.mrb[120].mxu1 %v4072_v5 }
 0x585   : > { %4708 = vmatprep.mubr.bf16.mxu1 %v3956_v33 }
 0x589   : > { %4580 = vmatmul.mubr.bf16.gmra.mrb[108].mxu0 %v3964_v38 }
 0x58a   : > { %4587 = vmatprep.mubr.bf16.mxu0 %v4032_v29 }
 0x58c   : > { %4709 = vmatmul.mubr.bf16.gmra.mrb[124].mxu1 %v4076_v2 }
 0x58d   : > { %4716 = vmatprep.mubr.bf16.mxu1 %v3960_v12 }
 0x591   : > { %4588 = vmatmul.mubr.bf16.gmra.mrb[112].mxu0 %v3968_v40 }
 0x592   : > { %5786 = vmatprep.mubr.msk.bf16.mxu0 %vm1093_vm1, %v9123_v15  ;;  %v10175_v15 = vld [vmem:[#allocation107_spill] sm:$0xff] }
 0x593   : > { %v4088_v55 = vsel %vm1093_vm1, %v10175_v15, %v3895_v46 }
 0x594   : > { %4717 = vmatmul.mubr.bf16.gmra.mrb[128].mxu1 %v4080_v28 }
 0x595   : > { %4724 = vmatprep.mubr.bf16.mxu1 %v3964_v38  ;;  %v9440_v38 = vld [vmem:[%s9784_s11] ss:$0 sm:$0xff] }
 0x599   : > { %5787 = vmatmul.mubr.msk.bf16.vlgmr.msra.gmra.mrb[0].mxu0 %vm1093_vm1, %v9169_v21  ;;  %v3556_v21 = vld [vmem:[#allocation3 + $0x117] sm:$0xff] }
 0x59a   : > { %5790 = vmatprep.mubr.msk.bf16.mxu0 %vm1093_vm1, %v9155_v30  ;;  %v4100_v30 = vsel %vm1093_vm1, %v10176_v56, %v3903_v41  ;;  %v3592_v59 = vmul.f32 %v3556_v21, %v10177_v20 }
 0x59c   : > { %4725 = vmatmul.mubr.bf16.gmra.mrb[132].mxu1 %v4084_v11 }
 0x59d   : > { %4732 = vmatprep.mubr.bf16.mxu1 %v3968_v40 }
 0x5a1   : > { %5791 = vmatmul.mubr.msk.bf16.gmra.mrb[4].mxu0 %vm1093_vm1, %v9201_v26  ;;  %v10179_v26 = vld [vmem:[#allocation119_spill] sm:$0xff] }
 0x5a2   : > { %5794 = vmatprep.mubr.msk.bf16.mxu0 %vm1093_vm1, %v9187_v18  ;;  %v3611_v18 = vpack.c.bf16 %v3593_v52, %v3592_v59  ;;  %v4092_v51 = vsel %vm1093_vm1, %v10179_v26, %v3897_v57 }
 0x5a4   : > { %4733 = vmatmul.mubr.bf16.gmra.mrb[136].mxu1 %v4088_v55  ;;  %v4104_v45 = vsel %vm1093_vm1, %v3611_v18, %v3905_v7 }
 0x5a5   : > { %4740 = vmatprep.mubr.bf16.mxu1 %v4100_v30 }
 0x5a9   : > { %5795 = vmatmul.mubr.msk.bf16.gmra.mrb[8].mxu0 %vm1093_vm1, %v9233_v49  ;;  %v4096_v49 = vsel %vm1093_vm1, %v9295_v13, %v3899_v35  ;;  %v10181_v13 = vld [vmem:[#allocation113_spill] sm:$0xff] }
 0x5aa   : > { %5798 = vmatprep.mubr.msk.bf16.mxu0 %vm1093_vm1, %v9219_v10  ;;  %v3701_v10 = vld [vmem:[#allocation3 + $0x121] sm:$0xff] }
 0x5ab   : > { %v3737_v50 = vmul.f32 %v3701_v10, %v10181_v13 }
 0x5ac   : > { %4741 = vmatmul.mubr.bf16.gmra.mrb[140].mxu1 %v4092_v51 }
 0x5ad   : > { %4748 = vmatprep.mubr.bf16.mxu1 %v4104_v45 }
 0x5b1   : > { %5799 = vmatmul.mubr.msk.bf16.gmra.mrb[12].mxu0 %vm1093_vm1, %v9267_v0  ;;  %v10180_v0 = vld [vmem:[#allocation116_spill] sm:$0xff] }
 0x5b2   : > { %5802 = vmatprep.mubr.msk.bf16.mxu0 %vm1093_vm1, %v9239_v16  ;;  %v3700_v16 = vld [vmem:[#allocation3 + $0x119] sm:$0xff] }
 0x5b4   : > { %4749 = vmatmul.mubr.bf16.gmra.mrb[144].mxu1 %v4096_v49 }
 0x5b9   : > { %5803 = vmatmul.mubr.msk.bf16.gmra.mrb[116].mxu0 %vm1093_vm1, %v9279_v42  ;;  %v10182_v42 = vld [vmem:[#allocation114_spill] sm:$0xff] }
 0x5ba   : > { %5806 = vmatprep.mubr.msk.bf16.mxu0 %vm1093_vm1, %v9251_v44  ;;  %v3736_v54 = vmul.f32 %v3700_v16, %v10182_v42 }
 0x5bc   : > { %v3755_v62 = vpack.c.bf16 %v3737_v50, %v3736_v54 }
 0x5c1   : > { %5807 = vmatmul.mubr.msk.bf16.gmra.mrb[120].mxu0 %vm1093_vm1, %v9289_v17 }
 0x5c2   : > { %5810 = vmatprep.mubr.msk.bf16.mxu0 %vm1093_vm1, %v9263_v36 }
 0x5c9   : > { %5811 = vmatmul.mubr.msk.bf16.gmra.mrb[124].mxu0 %vm1093_vm1, %v9275_v19 }
 0x5ca   : > { %5814 = vmatprep.mubr.msk.bf16.mxu0 %vm1093_vm1, %v10180_v0 }
 0x5d1   : > { %5815 = vmatmul.mubr.msk.bf16.gmra.mrb[128].mxu0 %vm1093_vm1, %v3755_v62 }
 0x5e0   : > { %v5440_v44 = vpop.f32.mrb[52].mxu0 }
 0x5e1   : > { %v5441_v17 = vpop.f32.mrb[53].mxu0 }
 0x5e2   : > { %v5442_v63 = vadd.f32 %v5441_v17, %v5440_v44  ;;  %v5443_v31 = vpop.f32.mrb[54].mxu0 }
 0x5e3   : > { %v5444_v36 = vpop.f32.mrb[55].mxu0 }
 0x5e4   : > { %v5445_v1 = vadd.f32 %v5444_v36, %v5443_v31  ;;  %v4470_v48 = vadd.f32 %v5442_v63, %v9440_v38 }
 0x5e6   : > { %v4473_v41 = vadd.f32 %v5445_v1, %v9440_v38 }
 0x5f4   : > { %v5446_v61 = vpop.f32.mrb[56].mxu0 }
 0x5f5   : > { %v5447_v47 = vpop.f32.mrb[57].mxu0 }
 0x5f6   : > { %v5448_v19 = vadd.f32 %v5447_v47, %v5446_v61  ;;  %v5449_v43 = vpop.f32.mrb[58].mxu0 }
 0x5f7   : > { %v5450_v60 = vpop.f32.mrb[59].mxu0 }
 0x5f8   : > { %v5451_v4 = vadd.f32 %v5450_v60, %v5449_v43  ;;  %v4478_v7 = vadd.f32 %v5448_v19, %v9440_v38 }
 0x5fa   : > { %v4481_v45 = vadd.f32 %v5451_v4, %v9440_v38 }
 0x5fc   : > { %v5452_v8 = vpop.f32.mrb[60].mxu0 }
 0x5fd   : > { %v5453_v3 = vpop.f32.mrb[61].mxu0 }
 0x5fe   : > { %v5454_v39 = vadd.f32 %v5453_v3, %v5452_v8  ;;  %v5455_v37 = vpop.f32.mrb[62].mxu0 }
 0x5ff   : > { %v5456_v22 = vpop.f32.mrb[63].mxu0 }
 0x600   : > { %v5457_v33 = vadd.f32 %v5456_v22, %v5455_v37  ;;  %v4486_v17 = vadd.f32 %v5454_v39, %v9440_v38 }
 0x602   : > { %v4489_v1 = vadd.f32 %v5457_v33, %v9440_v38 }
 0x604   : > { %v5458_v24 = vpop.f32.mrb[64].mxu0 }
 0x605   : > { %v5459_v14 = vpop.f32.mrb[65].mxu0 }
 0x606   : > { %v5460_v9 = vadd.f32 %v5459_v14, %v5458_v24  ;;  %v5461_v32 = vpop.f32.mrb[66].mxu0 }
 0x607   : > { %v5462_v12 = vpop.f32.mrb[67].mxu0 }
 0x608   : > { %v5463_v25 = vadd.f32 %v5462_v12, %v5461_v32  ;;  %v4494_v39 = vadd.f32 %v5460_v9, %v9440_v38 }
 0x60a   : > { %v4497_v12 = vadd.f32 %v5463_v25, %v9440_v38 }
 0x60c   : > { %v5464_v5 = vpop.f32.mrb[68].mxu0 }
 0x60d   : > { %v5465_v27 = vpop.f32.mrb[69].mxu0 }
 0x60e   : > { %v9442_v29 = vadd.f32 %v5465_v27, %v5464_v5  ;;  %v5467_v2 = vpop.f32.mrb[70].mxu0 }
 0x60f   : > { %v5552_v23 = vpop.f32.mrb[84].mxu1  ;;  %v5468_v40 = vpop.f32.mrb[71].mxu0 }
 0x610   : > { %v5553_v6 = vpop.f32.mrb[85].mxu1  ;;  %v9444_v28 = vadd.f32 %v5468_v40, %v5467_v2  ;;  %v4502_v9 = vadd.f32 %v9442_v29, %v9440_v38 }
 0x611   : > { %v5554_v34 = vadd.f32 %v5553_v6, %v5552_v23  ;;  %v5555_v11 = vpop.f32.mrb[86].mxu1 }
 0x612   : > { %v5556_v46 = vpop.f32.mrb[87].mxu1 }
 0x613   : > { %v5557_v15 = vadd.f32 %v5556_v46, %v5555_v11  ;;  %v9448_v55 = vadd.f32 %v5554_v34, %v4470_v48 }
 0x614   : > { %v5470_v21 = vpop.f32.mrb[72].mxu0 }
 0x615   : > { %v5471_v56 = vpop.f32.mrb[73].mxu0  ;;  %v9450_v30 = vadd.f32 %v5557_v15, %v4473_v41 }
 0x616   : > { %v9452_v58 = vadd.f32 %v5471_v56, %v5470_v21  ;;  %v5473_v20 = vpop.f32.mrb[74].mxu0  ;;  %v4505_v56 = vadd.f32 %v9444_v28, %v9440_v38 }
 0x617   : > { %v5558_v59 = vpop.f32.mrb[88].mxu1  ;;  %v5474_v53 = vpop.f32.mrb[75].mxu0 }
 0x618   : > { %v5559_v52 = vpop.f32.mrb[89].mxu1  ;;  %v9454_v57 = vadd.f32 %v5474_v53, %v5473_v20 }
 0x619   : > { %v5560_v18 = vadd.f32 %v5559_v52, %v5558_v59  ;;  %v5561_v26 = vpop.f32.mrb[90].mxu1 }
 0x61a   : > { %v5562_v51 = vpop.f32.mrb[91].mxu1 }
 0x61b   : > { %v5563_v35 = vadd.f32 %v5562_v51, %v5561_v26  ;;  %v9458_v49 = vadd.f32 %v5560_v18, %v4478_v7 }
 0x61c   : > { %v5476_v10 = vpop.f32.mrb[76].mxu0 }
 0x61d   : > { %v5477_v16 = vpop.f32.mrb[77].mxu0  ;;  %v9460_v0 = vadd.f32 %v5563_v35, %v4481_v45 }
 0x61e   : > { %v9462_v13 = vadd.f32 %v5477_v16, %v5476_v10  ;;  %v5479_v50 = vpop.f32.mrb[78].mxu0  ;;  %v4510_v10 = vadd.f32 %v9452_v58, %v9440_v38 }
 0x61f   : > { %v5564_v42 = vpop.f32.mrb[92].mxu1  ;;  %v5480_v54 = vpop.f32.mrb[79].mxu0 }
 0x620   : > { %v5565_v62 = vpop.f32.mrb[93].mxu1  ;;  %v9464_v44 = vadd.f32 %v5480_v54, %v5479_v50 }
 0x621   : > { %v5566_v63 = vadd.f32 %v5565_v62, %v5564_v42  ;;  %v5567_v31 = vpop.f32.mrb[94].mxu1  ;;  %v4513_v42 = vadd.f32 %v9454_v57, %v9440_v38 }
 0x622   : > { %v5568_v36 = vpop.f32.mrb[95].mxu1 }
 0x623   : > { %v5569_v61 = vadd.f32 %v5568_v36, %v5567_v31  ;;  %v9468_v47 = vadd.f32 %v5566_v63, %v4486_v17 }
 0x624   : > { %v5482_v19 = vpop.f32.mrb[80].mxu0 }
 0x625   : > { %v5483_v43 = vpop.f32.mrb[81].mxu0  ;;  %v9470_v60 = vadd.f32 %v5569_v61, %v4489_v1 }
 0x626   : > { %v9472_v4 = vadd.f32 %v5483_v43, %v5482_v19  ;;  %v5485_v8 = vpop.f32.mrb[82].mxu0 }
 0x627   : > { %v5570_v3 = vpop.f32.mrb[96].mxu1  ;;  %v5486_v37 = vpop.f32.mrb[83].mxu0 }
 0x628   : > { %v5571_v22 = vpop.f32.mrb[97].mxu1  ;;  %v9474_v24 = vadd.f32 %v5486_v37, %v5485_v8  ;;  %v4518_v8 = vadd.f32 %v9462_v13, %v9440_v38 }
 0x629   : > { %v5572_v14 = vadd.f32 %v5571_v22, %v5570_v3  ;;  %v5573_v32 = vpop.f32.mrb[98].mxu1  ;;  %v4521_v22 = vadd.f32 %v9464_v44, %v9440_v38 }
 0x62a   : > { %v5574_v33 = vpop.f32.mrb[99].mxu1 }
 0x62b   : > { %v5575_v5 = vadd.f32 %v5574_v33, %v5573_v32  ;;  %v9478_v27 = vadd.f32 %v5572_v14, %v4494_v39 }
 0x62c   : > { %v5488_v2 = vpop.f32.mrb[84].mxu0 }
 0x62d   : > { %v5489_v23 = vpop.f32.mrb[85].mxu0  ;;  %v9480_v40 = vadd.f32 %v5575_v5, %v4497_v12 }
 0x62e   : > { %v9482_v6 = vadd.f32 %v5489_v23, %v5488_v2  ;;  %v5491_v48 = vpop.f32.mrb[86].mxu0 }
 0x62f   : > { %v5576_v34 = vpop.f32.mrb[100].mxu1  ;;  %v5492_v11 = vpop.f32.mrb[87].mxu0 }
 0x630   : > { %v5577_v46 = vpop.f32.mrb[101].mxu1  ;;  %v9484_v41 = vadd.f32 %v5492_v11, %v5491_v48  ;;  %v4526_v11 = vadd.f32 %v9472_v4, %v9440_v38 }
 0x631   : > { %v5578_v15 = vadd.f32 %v5577_v46, %v5576_v34  ;;  %v5579_v25 = vpop.f32.mrb[102].mxu1 }
 0x632   : > { %v5580_v21 = vpop.f32.mrb[103].mxu1 }
 0x633   : > { %v5581_v20 = vadd.f32 %v5580_v21, %v5579_v25  ;;  %v9490_v59 = vadd.f32 %v5578_v15, %v4502_v9  ;;  %v4529_v15 = vadd.f32 %v9474_v24, %v9440_v38 }
 0x634   : > { %v5494_v53 = vpop.f32.mrb[88].mxu0 }
 0x635   : > { %v5495_v52 = vpop.f32.mrb[89].mxu0  ;;  %v9492_v7 = vadd.f32 %v5581_v20, %v4505_v56 }
 0x636   : > { %v9494_v18 = vadd.f32 %v5495_v52, %v5494_v53  ;;  %v5497_v26 = vpop.f32.mrb[90].mxu0 }
 0x637   : > { %v5582_v51 = vpop.f32.mrb[104].mxu1  ;;  %v5498_v45 = vpop.f32.mrb[91].mxu0 }
 0x638   : > { %v5583_v35 = vpop.f32.mrb[105].mxu1  ;;  %v9496_v29 = vadd.f32 %v5498_v45, %v5497_v26 }
 0x639   : > { %v5584_v16 = vadd.f32 %v5583_v35, %v5582_v51  ;;  %v5585_v28 = vpop.f32.mrb[106].mxu1 }
 0x63a   : > { %v5586_v50 = vpop.f32.mrb[107].mxu1 }
 0x63b   : > { %v5587_v54 = vadd.f32 %v5586_v50, %v5585_v28  ;;  %v9502_v62 = vadd.f32 %v5584_v16, %v4510_v10  ;;  %v4534_v10 = vadd.f32 %v9482_v6, %v9440_v38  ;;  %v4537_v50 = vadd.f32 %v9484_v41, %v9440_v38  ;;  %v10184_v6 = vld [vmem:[#allocation35_spill] sm:$0xff] }
 0x63c   : > { %v5500_v17 = vpop.f32.mrb[92].mxu0  ;;  %v4542_v41 = vadd.f32 %v9494_v18, %v9440_v38  ;;  %v10186_v18 = vld [vmem:[#allocation33_spill] sm:$0xff] }
 0x63d   : > { %v5501_v63 = vpop.f32.mrb[93].mxu0  ;;  %v9504_v31 = vadd.f32 %v5587_v54, %v4513_v42 }
 0x63e   : > { %v9506_v36 = vadd.f32 %v5501_v63, %v5500_v17  ;;  %v5503_v1 = vpop.f32.mrb[94].mxu0 }
 0x63f   : > { %v5588_v61 = vpop.f32.mrb[108].mxu1  ;;  %v5504_v19 = vpop.f32.mrb[95].mxu0 }
 0x640   : > { %v5589_v43 = vpop.f32.mrb[109].mxu1  ;;  %v9508_v58 = vadd.f32 %v5504_v19, %v5503_v1 }
 0x641   : > { %v5590_v3 = vadd.f32 %v5589_v43, %v5588_v61  ;;  %v5591_v57 = vpop.f32.mrb[110].mxu1  ;;  %v10183_v61 = vld [vmem:[#allocation31_spill] sm:$0xff] }
 0x642   : > { %v5592_v37 = vpop.f32.mrb[111].mxu1 }
 0x643   : > { %v5593_v39 = vadd.f32 %v5592_v37, %v5591_v57  ;;  %v9514_v14 = vadd.f32 %v5590_v3, %v4518_v8 }
 0x644   : > { %v5506_v32 = vpop.f32.mrb[96].mxu0 }
 0x645   : > { %v5507_v33 = vpop.f32.mrb[97].mxu0  ;;  %v9516_v12 = vadd.f32 %v5593_v39, %v4521_v22 }
 0x646   : > { %v9518_v5 = vadd.f32 %v5507_v33, %v5506_v32  ;;  %v5509_v2 = vpop.f32.mrb[98].mxu0 }
 0x647   : > { %v5594_v23 = vpop.f32.mrb[112].mxu1  ;;  %v5510_v48 = vpop.f32.mrb[99].mxu0 }
 0x648   : > { %v5595_v34 = vpop.f32.mrb[113].mxu1  ;;  %v9520_v13 = vadd.f32 %v5510_v48, %v5509_v2 }
 0x649   : > { %v5596_v46 = vadd.f32 %v5595_v34, %v5594_v23  ;;  %v5597_v44 = vpop.f32.mrb[114].mxu1  ;;  %v4545_v23 = vadd.f32 %v9496_v29, %v9440_v38  ;;  %v4550_v29 = vadd.f32 %v9506_v36, %v9440_v38 }
 0x64a   : > { %v5598_v9 = vpop.f32.mrb[115].mxu1 }
 0x64b   : > { %v5599_v25 = vadd.f32 %v5598_v9, %v5597_v44  ;;  %v9526_v21 = vadd.f32 %v5596_v46, %v4526_v11  ;;  %v10185_v9 = vld [vmem:[#allocation30_spill] sm:$0xff] }
 0x64c   : > { %v5512_v56 = vpop.f32.mrb[100].mxu0 }
 0x64d   : > { %v5513_v20 = vpop.f32.mrb[101].mxu0  ;;  %v9528_v53 = vadd.f32 %v5599_v25, %v4529_v15 }
 0x64e   : > { %v9530_v52 = vadd.f32 %v5513_v20, %v5512_v56  ;;  %v5515_v26 = vpop.f32.mrb[102].mxu0 }
 0x64f   : > { %v5600_v51 = vpop.f32.mrb[116].mxu1  ;;  %v5516_v45 = vpop.f32.mrb[103].mxu0 }
 0x650   : > { %v5601_v35 = vpop.f32.mrb[117].mxu1  ;;  %v9532_v4 = vadd.f32 %v5516_v45, %v5515_v26 }
 0x651   : > { %v5602_v16 = vadd.f32 %v5601_v35, %v5600_v51  ;;  %v5603_v24 = vpop.f32.mrb[118].mxu1 }
 0x652   : > { %v5604_v28 = vpop.f32.mrb[119].mxu1 }
 0x653   : > { %v4695_v42 = vadd.f32 %v5602_v16, %v4534_v10  ;;  %v5605_v54 = vadd.f32 %v5604_v28, %v5603_v24  ;;  %v4553_v28 = vadd.f32 %v9508_v58, %v9440_v38  ;;  %v4558_v58 = vadd.f32 %v9518_v5, %v9440_v38 }
 0x654   : > { %v5518_v17 = vpop.f32.mrb[104].mxu0 }
 0x655   : > { %v4698_v63 = vadd.f32 %v5605_v54, %v4537_v50  ;;  %v5519_v1 = vpop.f32.mrb[105].mxu0  ;;  %v9539_v19 = vadd.f32 %v4695_v42, %v10183_v61 }
 0x656   : > { %v9541_v43 = vadd.f32 %v5519_v1, %v5518_v17  ;;  %v5521_v8 = vpop.f32.mrb[106].mxu0  ;;  %v10187_v1 = vld [vmem:[#allocation39_spill] sm:$0xff] }
 0x657   : > { %v5606_v3 = vpop.f32.mrb[120].mxu1  ;;  %v5522_v57 = vpop.f32.mrb[107].mxu0  ;;  %v9544_v37 = vadd.f32 %v4698_v63, %v10184_v6  ;;  %v10188_v6 = vld [vmem:[#allocation41_spill] sm:$0xff] }
 0x658   : > { %v5607_v22 = vpop.f32.mrb[121].mxu1  ;;  %v9546_v39 = vadd.f32 %v5522_v57, %v5521_v8 }
 0x659   : > { %v5608_v32 = vadd.f32 %v5607_v22, %v5606_v3  ;;  %v5609_v33 = vpop.f32.mrb[122].mxu1 }
 0x65a   : > { %v5610_v2 = vpop.f32.mrb[123].mxu1 }
 0x65b   : > { %v4703_v48 = vadd.f32 %v5608_v32, %v4542_v41  ;;  %v5611_v34 = vadd.f32 %v5610_v2, %v5609_v33 }
 0x65c   : > { %v5524_v11 = vpop.f32.mrb[108].mxu0 }
 0x65d   : > { %v4706_v46 = vadd.f32 %v5611_v34, %v4545_v23  ;;  %v5525_v44 = vpop.f32.mrb[109].mxu0  ;;  %v9553_v15 = vadd.f32 %v10185_v9, %v4703_v48  ;;  %v4561_v48 = vadd.f32 %v9520_v13, %v9440_v38 }
 0x65e   : > { %v9555_v25 = vadd.f32 %v5525_v44, %v5524_v11  ;;  %v5527_v56 = vpop.f32.mrb[110].mxu0 }
 0x65f   : > { %v5612_v20 = vpop.f32.mrb[124].mxu1  ;;  %v5528_v26 = vpop.f32.mrb[111].mxu0  ;;  %v9558_v51 = vadd.f32 %v10186_v18, %v4706_v46 }
 0x660   : > { %v5613_v45 = vpop.f32.mrb[125].mxu1  ;;  %v9560_v35 = vadd.f32 %v5528_v26, %v5527_v56 }
 0x661   : > { %v5614_v10 = vadd.f32 %v5613_v45, %v5612_v20  ;;  %v5615_v16 = vpop.f32.mrb[126].mxu1  ;;  %v10189_v20 = vld [vmem:[#allocation37_spill] sm:$0xff] }
 0x662   : > { %v5616_v24 = vpop.f32.mrb[127].mxu1 }
 0x663   : > { %v4711_v50 = vadd.f32 %v5614_v10, %v4550_v29  ;;  %v5617_v42 = vadd.f32 %v5616_v24, %v5615_v16  ;;  %v10190_v16 = vld [vmem:[#allocation40_spill] sm:$0xff] }
 0x664   : > { %v5530_v54 = vpop.f32.mrb[112].mxu0 }
 0x665   : > { %v4714_v17 = vadd.f32 %v5617_v42, %v4553_v28  ;;  %v5531_v63 = vpop.f32.mrb[113].mxu0  ;;  %v9567_v61 = vadd.f32 %v4711_v50, %v10187_v1 }
 0x666   : > { %v9569_v8 = vadd.f32 %v5531_v63, %v5530_v54  ;;  %v5533_v3 = vpop.f32.mrb[114].mxu0 }
 0x667   : > { %v5618_v36 = vpop.f32.mrb[128].mxu1  ;;  %v5534_v57 = vpop.f32.mrb[115].mxu0  ;;  %v9572_v22 = vadd.f32 %v4714_v17, %v10188_v6 }
 0x668   : > { %v5619_v41 = vpop.f32.mrb[129].mxu1  ;;  %v9574_v32 = vadd.f32 %v5534_v57, %v5533_v3 }
 0x669   : > { %v5620_v33 = vadd.f32 %v5619_v41, %v5618_v36  ;;  %v5621_v2 = vpop.f32.mrb[130].mxu1  ;;  %v10191_v41 = vld [vmem:[#allocation45_spill] sm:$0xff] }
 0x66a   : > { %v5622_v23 = vpop.f32.mrb[131].mxu1 }
 0x66b   : > { %v4719_v34 = vadd.f32 %v5620_v33, %v4558_v58  ;;  %v5623_v11 = vadd.f32 %v5622_v23, %v5621_v2 }
 0x66c   : > { %v5788_v46 = vpop.f32.mrb[0].mxu0 }
 0x66d   : > { %v4722_v44 = vadd.f32 %v5623_v11, %v4561_v48  ;;  %v4800_v9 = vadd.f32 %v5788_v46, %v9458_v49  ;;  %v4791_v56 = vpop.f32.mrb[1].mxu0  ;;  %v9585_v26 = vadd.f32 %v10189_v20, %v4719_v34  ;;  %v4566_v49 = vadd.f32 %v9530_v52, %v9440_v38  ;;  %v10192_v11 = vld [vmem:[#allocation47_spill] sm:$0xff] }
 0x66e   : > { %v4792_v5 = vadd.f32 %v4791_v56, %v9448_v55  ;;  %v5789_v18 = vpop.f32.mrb[2].mxu0  ;;  %v4574_v56 = vadd.f32 %v9541_v43, %v9440_v38 }
 0x66f   : > { %v5624_v45 = vpop.f32.mrb[132].mxu1  ;;  %v4952_v29 = vmul.f32 0.70710677, %v4800_v9  ;;  %v4803_v10 = vadd.f32 %v5789_v18, %v9460_v0  ;;  %v4794_v13 = vpop.f32.mrb[3].mxu0  ;;  %v9590_v24 = vadd.f32 %v10190_v16, %v4722_v44 }
 0x670   : > { %v5625_v28 = vpop.f32.mrb[133].mxu1  ;;  %v4950_v50 = vmul.f32 0.70710677, %v4792_v5  ;;  %v4795_v42 = vadd.f32 %v4794_v13, %v9450_v30  ;;  %v4569_v30 = vadd.f32 %v9532_v4, %v9440_v38 }
 0x671   : > { %v5626_v54 = vadd.f32 %v5625_v28, %v5624_v45  ;;  %4984 = vst.msk [vmem:[%s9595_s21 + $0x10] sm:$0xff] %vm1093_vm1, %v4952_v29  ;;  %v5627_v55 = vpop.f32.mrb[134].mxu1  ;;  %v4953_v0 = vmul.f32 0.70710677, %v4803_v10  ;;  %v4577_v45 = vadd.f32 %v9546_v39, %v9440_v38  ;;  %v10193_v28 = vld [vmem:[#allocation44_spill] sm:$0xff] }
 0x672   : > { %4982 = vst.msk [vmem:[%s9595_s21] sm:$0xff] %vm1093_vm1, %v4950_v50  ;;  %v5628_v17 = vpop.f32.mrb[135].mxu1  ;;  %v4951_v63 = vmul.f32 0.70710677, %v4795_v42 }
 0x673   : > { %v4727_v1 = vadd.f32 %v5626_v54, %v4566_v49  ;;  %v5629_v52 = vadd.f32 %v5628_v17, %v5627_v55  ;;  %4985 = vst.msk [vmem:[%s9595_s21 + $0x18] sm:$0xff] %vm1093_vm1, %v4953_v0  ;;  %v10194_v17 = vld [vmem:[#allocation46_spill] sm:$0xff] }
 0x674   : > { %4983 = vst.msk [vmem:[%s9595_s21 + $0x8] sm:$0xff] %vm1093_vm1, %v4951_v63  ;;  %v5792_v3 = vpop.f32.mrb[4].mxu0 }
 0x675   : > { %v4730_v36 = vadd.f32 %v5629_v52, %v4569_v30  ;;  %v4816_v57 = vadd.f32 %v5792_v3, %v9478_v27  ;;  %v4807_v6 = vpop.f32.mrb[5].mxu0  ;;  %v9609_v58 = vadd.f32 %v4727_v1, %v10191_v41  ;;  %v4582_v52 = vadd.f32 %v9555_v25, %v9440_v38 }
 0x676   : > { %v4808_v33 = vadd.f32 %v4807_v6, %v9468_v47  ;;  %v5793_v2 = vpop.f32.mrb[6].mxu0  ;;  %v4585_v6 = vadd.f32 %v9560_v35, %v9440_v38 }
 0x677   : > { %v5630_v4 = vpop.f32.mrb[136].mxu1  ;;  %v4956_v23 = vmul.f32 0.70710677, %v4816_v57  ;;  %v4819_v48 = vadd.f32 %v5793_v2, %v9480_v40  ;;  %v4810_v34 = vpop.f32.mrb[7].mxu0  ;;  %v9614_v46 = vadd.f32 %v4730_v36, %v10192_v11 }
 0x678   : > { %v5631_v44 = vpop.f32.mrb[137].mxu1  ;;  %v4954_v27 = vmul.f32 0.70710677, %v4808_v33  ;;  %v4811_v9 = vadd.f32 %v4810_v34, %v9470_v60 }
 0x679   : > { %v5632_v20 = vadd.f32 %v5631_v44, %v5630_v4  ;;  %4988 = vst.msk [vmem:[%s9595_s21 + $0x30] sm:$0xff] %vm1093_vm1, %v4956_v23  ;;  %v5633_v47 = vpop.f32.mrb[138].mxu1  ;;  %v4957_v5 = vmul.f32 0.70710677, %v4819_v48  ;;  %v10195_v23 = vld [vmem:[#allocation51_spill] sm:$0xff] }
 0x67a   : > { %4986 = vst.msk [vmem:[%s9595_s21 + $0x20] sm:$0xff] %vm1093_vm1, %v4954_v27  ;;  %v5634_v40 = vpop.f32.mrb[139].mxu1  ;;  %v4955_v18 = vmul.f32 0.70710677, %v4811_v9 }
 0x67b   : > { %v4735_v29 = vadd.f32 %v5632_v20, %v4574_v56  ;;  %v5635_v10 = vadd.f32 %v5634_v40, %v5633_v47  ;;  %4989 = vst.msk [vmem:[%s9595_s21 + $0x38] sm:$0xff] %vm1093_vm1, %v4957_v5  ;;  %v10196_v56 = vld [vmem:[#allocation55_spill] sm:$0xff]  ;;  %v4590_v40 = vadd.f32 %v9569_v8, %v9440_v38 }
 0x67c   : > { %4987 = vst.msk [vmem:[%s9595_s21 + $0x28] sm:$0xff] %vm1093_vm1, %v4955_v18  ;;  %v5796_v60 = vpop.f32.mrb[8].mxu0 }
 0x67d   : > { %v4738_v43 = vadd.f32 %v5635_v10, %v4577_v45  ;;  %v4832_v13 = vadd.f32 %v5796_v60, %v9502_v62  ;;  %v4823_v16 = vpop.f32.mrb[9].mxu0  ;;  %v9631_v50 = vadd.f32 %v10193_v28, %v4735_v29  ;;  %v4593_v10 = vadd.f32 %v9574_v32, %v9440_v38  ;;  %v10197_v28 = vld [vmem:[#allocation50_spill] sm:$0xff] }
 0x67e   : > { %v4824_v42 = vadd.f32 %v4823_v16, %v9490_v59  ;;  %v5797_v49 = vpop.f32.mrb[10].mxu0 }
 0x67f   : > { %v5636_v39 = vpop.f32.mrb[140].mxu1  ;;  %v4960_v54 = vmul.f32 0.70710677, %v4832_v13  ;;  %v4835_v55 = vadd.f32 %v5797_v49, %v9504_v31  ;;  %v4826_v0 = vpop.f32.mrb[11].mxu0  ;;  %v9636_v63 = vadd.f32 %v10194_v17, %v4738_v43 }
 0x680   : > { %v5637_v30 = vpop.f32.mrb[141].mxu1  ;;  %v4958_v62 = vmul.f32 0.70710677, %v4824_v42  ;;  %v4827_v1 = vadd.f32 %v4826_v0, %v9492_v7 }
 0x681   : > { %v5638_v3 = vadd.f32 %v5637_v30, %v5636_v39  ;;  %4992 = vst.msk [vmem:[%s9595_s21 + $0x50] sm:$0xff] %vm1093_vm1, %v4960_v54  ;;  %v5639_v59 = vpop.f32.mrb[142].mxu1  ;;  %v4961_v36 = vmul.f32 0.70710677, %v4835_v55  ;;  %v10198_v55 = vld [vmem:[#allocation53_spill] sm:$0xff] }
 0x682   : > { %4990 = vst.msk [vmem:[%s9595_s21 + $0x40] sm:$0xff] %vm1093_vm1, %v4958_v62  ;;  %v5640_v31 = vpop.f32.mrb[143].mxu1  ;;  %v4959_v57 = vmul.f32 0.70710677, %v4827_v1 }
 0x683   : > { %v4743_v41 = vadd.f32 %v5638_v3, %v4582_v52  ;;  %v5641_v33 = vadd.f32 %v5640_v31, %v5639_v59  ;;  %4993 = vst.msk [vmem:[%s9595_s21 + $0x58] sm:$0xff] %vm1093_vm1, %v4961_v36 }
 0x684   : > { %4991 = vst.msk [vmem:[%s9595_s21 + $0x48] sm:$0xff] %vm1093_vm1, %v4959_v57  ;;  %v5800_v7 = vpop.f32.mrb[12].mxu0 }
 0x685   : > { %v4746_v25 = vadd.f32 %v5641_v33, %v4585_v6  ;;  %v4848_v2 = vadd.f32 %v5800_v7, %v9526_v21  ;;  %v4839_v4 = vpop.f32.mrb[13].mxu0  ;;  %v9653_v48 = vadd.f32 %v4743_v41, %v10195_v23 }
 0x686   : > { %v4840_v34 = vadd.f32 %v4839_v4, %v9514_v14  ;;  %v5801_v11 = vpop.f32.mrb[14].mxu0 }
 0x687   : > { %v5642_v35 = vpop.f32.mrb[144].mxu1  ;;  %v4964_v44 = vmul.f32 0.70710677, %v4848_v2  ;;  %v4851_v27 = vadd.f32 %v5801_v11, %v9528_v53  ;;  %v4842_v9 = vpop.f32.mrb[15].mxu0  ;;  %v9658_v20 = vadd.f32 %v4746_v25, %v10196_v56 }
 0x688   : > { %v5643_v47 = vpop.f32.mrb[145].mxu1  ;;  %v4962_v21 = vmul.f32 0.70710677, %v4840_v34  ;;  %v4843_v5 = vadd.f32 %v4842_v9, %v9516_v12 }
 0x689   : > { %v5644_v18 = vadd.f32 %v5643_v47, %v5642_v35  ;;  %4996 = vst.msk [vmem:[%s9595_s21 + $0x70] sm:$0xff] %vm1093_vm1, %v4964_v44  ;;  %v5645_v14 = vpop.f32.mrb[146].mxu1  ;;  %v4965_v45 = vmul.f32 0.70710677, %v4851_v27 }
 0x68a   : > { %4994 = vst.msk [vmem:[%s9595_s21 + $0x60] sm:$0xff] %vm1093_vm1, %v4962_v21  ;;  %v5646_v53 = vpop.f32.mrb[147].mxu1  ;;  %v4963_v29 = vmul.f32 0.70710677, %v4843_v5 }
 0x68b   : > { %v4751_v60 = vadd.f32 %v5644_v18, %v4590_v40  ;;  %v5647_v43 = vadd.f32 %v5646_v53, %v5645_v14  ;;  %4997 = vst.msk [vmem:[%s9595_s21 + $0x78] sm:$0xff] %vm1093_vm1, %v4965_v45 }
 0x68c   : > { %4995 = vst.msk [vmem:[%s9595_s21 + $0x68] sm:$0xff] %vm1093_vm1, %v4963_v29  ;;  %v5804_v12 = vpop.f32.mrb[116].mxu0 }
 0x68d   : > { %v4754_v8 = vadd.f32 %v5647_v43, %v4593_v10  ;;  %v5863_v13 = vadd.f32 %v9553_v15, %v5804_v12  ;;  %v4855_v16 = vpop.f32.mrb[117].mxu0  ;;  %v5886_v42 = vadd.f32 %v10197_v28, %v4751_v60 }
 0x68e   : > { %v5865_v49 = vadd.f32 %v9539_v19, %v4855_v16  ;;  %v5805_v38 = vpop.f32.mrb[118].mxu0 }
 0x68f   : > { %v4968_v32 = vmul.f32 0.70710677, %v5863_v13  ;;  %v5867_v39 = vadd.f32 %v9558_v51, %v5805_v38  ;;  %v4858_v54 = vpop.f32.mrb[119].mxu0  ;;  %v5890_v0 = vadd.f32 %v10198_v55, %v4754_v8 }
 0x690   : > { %v4966_v17 = vmul.f32 0.70710677, %v5865_v49  ;;  %v5869_v30 = vadd.f32 %v9544_v37, %v4858_v54 }
 0x691   : > { %5000 = vst.msk [vmem:[%s9595_s21 + $0x90] sm:$0xff] %vm1093_vm1, %v4968_v32  ;;  %v4969_v15 = vmul.f32 0.70710677, %v5867_v39 }
 0x692   : > { %4998 = vst.msk [vmem:[%s9595_s21 + $0x80] sm:$0xff] %vm1093_vm1, %v4966_v17  ;;  %v4967_v62 = vmul.f32 0.70710677, %v5869_v30 }
 0x693   : > { %5001 = vst.msk [vmem:[%s9595_s21 + $0x98] sm:$0xff] %vm1093_vm1, %v4969_v15 }
 0x694   : > { %4999 = vst.msk [vmem:[%s9595_s21 + $0x88] sm:$0xff] %vm1093_vm1, %v4967_v62  ;;  %v5808_v19 = vpop.f32.mrb[120].mxu0 }
 0x695   : > { %v5871_v51 = vadd.f32 %v9585_v26, %v5808_v19  ;;  %v4871_v1 = vpop.f32.mrb[121].mxu0 }
 0x696   : > { %v5873_v37 = vadd.f32 %v9567_v61, %v4871_v1  ;;  %v5809_v52 = vpop.f32.mrb[122].mxu0 }
 0x697   : > { %v4972_v3 = vmul.f32 0.70710677, %v5871_v51  ;;  %v5875_v59 = vadd.f32 %v9590_v24, %v5809_v52  ;;  %v4874_v36 = vpop.f32.mrb[123].mxu0 }
 0x698   : > { %v4970_v31 = vmul.f32 0.70710677, %v5873_v37  ;;  %v5877_v57 = vadd.f32 %v9572_v22, %v4874_v36 }
 0x699   : > { %5004 = vst.msk [vmem:[%s9595_s21 + $0xb0] sm:$0xff] %vm1093_vm1, %v4972_v3  ;;  %v4973_v6 = vmul.f32 0.70710677, %v5875_v59 }
 0x69a   : > { %5002 = vst.msk [vmem:[%s9595_s21 + $0xa0] sm:$0xff] %vm1093_vm1, %v4970_v31  ;;  %v4971_v41 = vmul.f32 0.70710677, %v5877_v57 }
 0x69b   : > { %5005 = vst.msk [vmem:[%s9595_s21 + $0xb8] sm:$0xff] %vm1093_vm1, %v4973_v6 }
 0x69c   : > { %5003 = vst.msk [vmem:[%s9595_s21 + $0xa8] sm:$0xff] %vm1093_vm1, %v4971_v41  ;;  %v5812_v61 = vpop.f32.mrb[124].mxu0 }
 0x69d   : > { %v5879_v26 = vadd.f32 %v9631_v50, %v5812_v61  ;;  %v4887_v24 = vpop.f32.mrb[125].mxu0 }
 0x69e   : > { %v5881_v22 = vadd.f32 %v9609_v58, %v4887_v24  ;;  %v5813_v33 = vpop.f32.mrb[126].mxu0 }
 0x69f   : > { %v4976_v7 = vmul.f32 0.70710677, %v5879_v26  ;;  %v5883_v25 = vadd.f32 %v9636_v63, %v5813_v33  ;;  %v4890_v2 = vpop.f32.mrb[127].mxu0 }
 0x6a0   : > { %v4974_v4 = vmul.f32 0.70710677, %v5881_v22  ;;  %v5885_v23 = vadd.f32 %v9614_v46, %v4890_v2 }
 0x6a1   : > { %5008 = vst.msk [vmem:[%s9595_s21 + $0xd0] sm:$0xff] %vm1093_vm1, %v4976_v7  ;;  %v4977_v34 = vmul.f32 0.70710677, %v5883_v25 }
 0x6a2   : > { %5006 = vst.msk [vmem:[%s9595_s21 + $0xc0] sm:$0xff] %vm1093_vm1, %v4974_v4  ;;  %v4975_v50 = vmul.f32 0.70710677, %v5885_v23 }
 0x6a3   : > { %5009 = vst.msk [vmem:[%s9595_s21 + $0xd8] sm:$0xff] %vm1093_vm1, %v4977_v34 }
 0x6a4   : > { %5007 = vst.msk [vmem:[%s9595_s21 + $0xc8] sm:$0xff] %vm1093_vm1, %v4975_v50  ;;  %v5816_v58 = vpop.f32.mrb[128].mxu0 }
 0x6a5   : > { %v5887_v11 = vadd.f32 %v5886_v42, %v5816_v58  ;;  %v4903_v63 = vpop.f32.mrb[129].mxu0 }
 0x6a6   : > { %v5889_v35 = vadd.f32 %v9653_v48, %v4903_v63  ;;  %v5817_v46 = vpop.f32.mrb[130].mxu0 }
 0x6a7   : > { %v4980_v44 = vmul.f32 0.70710677, %v5887_v11  ;;  %v5891_v27 = vadd.f32 %v5890_v0, %v5817_v46  ;;  %v4906_v9 = vpop.f32.mrb[131].mxu0 }
 0x6a8   : > { %v4978_v56 = vmul.f32 0.70710677, %v5889_v35  ;;  %v5893_v47 = vadd.f32 %v9658_v20, %v4906_v9 }
 0x6a9   : > { %5012 = vst.msk [vmem:[%s9595_s21 + $0xf0] sm:$0xff] %vm1093_vm1, %v4980_v44  ;;  %v4981_v21 = vmul.f32 0.70710677, %v5891_v27 }
 0x6aa   : > { %5010 = vst.msk [vmem:[%s9595_s21 + $0xe0] sm:$0xff] %vm1093_vm1, %v4978_v56  ;;  %v4979_v48 = vmul.f32 0.70710677, %v5893_v47 }
 0x6ab   : > { %5013 = vst.msk [vmem:[%s9595_s21 + $0xf8] sm:$0xff] %vm1093_vm1, %v4981_v21 }
 0x6ac   : > { %5011 = vst.msk [vmem:[%s9595_s21 + $0xe8] sm:$0xff] %vm1093_vm1, %v4979_v48 }
 0x6ad   : > { %6166 = shalt.err (!%p6163_p11)
}
 0x6ae   : > { %s6167_s28 = scalar_lea.hbm %s9720_s24, 4096  ;;  %s6171_s23 = scalar_lea.hbm %s10200_s16, 8192 }
 0x6af   : > { %p6168_p13 = scmp.ne.s32.totalorder %s9720_s24, %s6167_s28  ;;  %p6172_p6 = scmp.lt.u32.totalorder %s9720_s24, %s10200_s16 }
 0x6b0   : > { %p6173_p9 = scmp.lt.u32.totalorder %s6171_s23, %s6167_s28  ;;  %p6175_p12 = scmp.lt.u32.totalorder %s6167_s28, %s9720_s24 }
 0x6b1   : > { %p6169_p5 = pnand %p6168_p13, %p10201_p1 }
 0x6b2   : > { %p6174_p10 = por %p6173_p9, %p6172_p6 }
 0x6b3   : > { %p6170_p0 = pneg %p6169_p5 }
 0x6b4   : > { %p6176_p2 = por %p6175_p12, %p6174_p10 }
 0x6b6   : > { %p6177_p3 = pnand %p6176_p2, %p6170_p0 }
 0x6b8   : > { %6180 = shalt.err (!%p6177_p3)
}
 0x6b9   : > { %s6240_s25 = smov 128   ;;  %s6241_s19 = smov 8  }
 0x6ba   : > { %5922 = dma.vmem_to_hbm [thread:$0]  (%p10201_p1), %s9722_s27, 4096, %s9720_s24, %s9732_s29, %s6240_s25, %s6240_s25, %s6241_s19  }
 0x6bb PF: > { %s10202_s17 = sld [smem:[#allocation16_spill]]  ;;  %s10203_s15 = sld [smem:[#allocation14_spill]] }
 0x6bc   : > { %s10204_s30 = sld [smem:[#allocation20_spill]] }
 0x6c1   : > { %p5944_p4 = scmp.ge.s32.totalorder %s10202_s17, 2  ;;  %s5043_s13 = sand.u32 1, %s10203_s15  }
 0x6c2   : > { %p10205_p7 = scmp.ne.s32.totalorder %s10204_s30, 0  ;;  %s5044_s22 = scalar_lea.sflag [#allocation6], %s5043_s13 }
 0x6c4   : > { %p5935_p8 = pnand %p5944_p4, %p10205_p7 }
 0x6c6   : > { %6206 = dma.done.wait (!%p5935_p8), %s5044_s22, 4096  }
 0x6c7   : > { %6208 = vsyncadd (!%p5935_p8), %s5044_s22, 4294963200  ;;  %s10206_s28 = sld [smem:[#allocation17_spill]]  ;;  %s10207_s18 = sld [smem:[#allocation15_spill]] }
 0x6c8   : > { %s10208_s27 = sld [smem:[#allocation18_spill]]  ;;  %s10209_s25 = smov %s6215_s26 }
 0x6cd   : > { %p25_p11 = scmp.ge.s32.totalorder %s10206_s28, 4   ;;  %s10210_s26 = smov %s10207_s18 }
 0x6cf   :  { %27 = sbr.rel (!%p25_p11) target bundleno = 8 (0x8), region = 123 }
 0x6d6   :  { %5049 = vsyncpa [#allocation5], 1 }
 0x6d7   :  { %5051 = vsyncpa [#allocation5 + $0x1], 1 }
 0x6d8   :  { %5052 = vsyncpa [#allocation8], 1 }
 0x6d9   :  { %5053 = vsyncpa [#allocation6], 1 }
 0x6da   :  { %5055 = vsyncpa [#allocation6 + $0x1], 1 }

</bundles_post_ra>
